<compile_context>
chip_gen: v5e
topology: v5e:2x2
jax: 0.10.0
libtpu: 0.0.40
codegen_flags: <defaults>
</compile_context>

<pallas_src>
import functools

import jax
import jax.numpy as jnp
from jax.experimental import pallas as pl
from jax.experimental.pallas import tpu as pltpu


# ---------------------------------------------------------------------------
# Fused forward kernel (single invocation, everything VMEM-resident).
# ---------------------------------------------------------------------------
def _fused_rnn_seq_ae_kernel(x_ref, gw_ref, gb_ref, lw_ref, lb_ref, o_ref,
                             *, seq_in, seq_out, batch, emb, code):
    f32 = jnp.float32
    B, E, C = batch, emb, code
    # (input_size, hidden_size) per GRU layer: enc1, enc2, dec1, dec2
    gru_dims = ((E, C), (C, C), (C, C), (C, E))

    def dot(a, b):
        return jnp.dot(a, b, preferred_element_type=f32)

    def leaky(y):                                   # LeakyReLU(0.2)
        return jnp.where(y >= 0, y, 0.2 * y)

    def gru_layer(l, x2d, h0, steps, static_input=False):
        """Fused-gate GRU: hoisted input projection + unrolled recurrence.

        x2d: (steps*B, In) per-step inputs, or (B, In) if static_input
             (same input every step, e.g. decoder GRU1 fed `code`).
        """
        In, H = gru_dims[l]
        # Load this layer's weights exactly once (reused across the unroll).
        wih = gw_ref[l, 0:In, 0:3 * H]              # (In, 3H)  [r | z | n]
        whh = gw_ref[l, In:In + H, 0:3 * H]         # (H, 3H)
        bi = gb_ref[l, 0:1, 0:3 * H]                # (1, 3H)  b_ih + [bhr,bhz,0]
        bhn = gb_ref[l, 1:2, 0:H]                   # (1, H)   b_hh_n

        # Hoisted input projection: ONE fused matmul (+ one bias add) per layer.
        gi_all = dot(x2d, wih) + bi                 # (steps*B or B, 3H)
        # Pre-broadcast the only remaining per-step bias once (not per iter).
        bhn_b = jnp.broadcast_to(bhn, (B, H))

        h = h0
        outs = []
        for t in range(steps):                      # fully unrolled (static S)
            gi = gi_all if static_input else gi_all[t * B:(t + 1) * B]
            gh = dot(h, whh)                        # ONE recurrent matmul/step
            # ONE sigmoid over the concatenated (r || z) pre-activation.
            rz = jax.nn.sigmoid(gi[:, 0:2 * H] + gh[:, 0:2 * H])
            r = rz[:, 0:H]
            z = rz[:, H:2 * H]
            n = jnp.tanh(gi[:, 2 * H:3 * H] + r * (gh[:, 2 * H:3 * H] + bhn_b))
            h = n + z * (h - n)                     # == (1 - z) * n + z * h
            outs.append(h)
        return outs, h

    def linear(i, x2d, out_dim, act):
        w = lw_ref[i, :, 0:out_dim]                 # (C, out)
        b = lb_ref[i:i + 1, 0:out_dim]              # (1, out)
        y = dot(x2d, w) + b
        return leaky(y) if act else y

    # ------------------------------- encoder ------------------------------- #
    x = x_ref[...]                                  # (S_in*B, E)
    h0 = jnp.zeros((B, C), f32)

    H1, res_h = gru_layer(0, x, h0, seq_in)         # enc GRU1
    proj_h = linear(0, res_h, C, act=True)          # enc proj (LeakyReLU 0.2)

    H1cat = jnp.concatenate(H1, axis=0)             # (S_in*B, C)
    _, last_enc = gru_layer(1, H1cat, proj_h, seq_in)   # enc GRU2

    code_v = last_enc + res_h                       # (B, C)

    # ------------------------------- decoder ------------------------------- #
    h1 = linear(1, code_v, C, act=True)             # dec proj1
    # Decoder GRU1 sees `code` every step: project once, reuse every step.
    H3, last_dec = gru_layer(2, code_v, h1, seq_out, static_input=True)

    h2 = linear(2, last_dec, E, act=True)           # dec proj2

    H3cat = jnp.concatenate(H3, axis=0)             # (S_out*B, C)
    X4, _ = gru_layer(3, H3cat, h2, seq_out)        # dec GRU2

    X4cat = jnp.concatenate(X4, axis=0)             # (S_out*B, E)
    p3 = linear(3, H3cat, E, act=False)             # dec proj3

    # Single store of the whole result.
    o_ref[...] = X4cat + p3


# ---------------------------------------------------------------------------
# One-time parameter prep (OUTSIDE the jitted forward): transpose, fuse gates,
# fold biases, and pack everything into 4 slabs -> 5 input DMAs total.
# ---------------------------------------------------------------------------
def prep_params(params, emb_size, code_size):
    E, C = emb_size, code_size
    f32 = jnp.float32
    gru_layers = [params["enc_gru1"], params["enc_gru2"],
                  params["dec_gru1"], params["dec_gru2"]]
    gru_dims = ((E, C), (C, C), (C, C), (C, E))
    max_rows = max(i + h for i, h in gru_dims)
    max_lanes = max(3 * h for _, h in gru_dims)

    gw = jnp.zeros((4, max_rows, max_lanes), f32)   # [W_ih.T ; W_hh.T] per layer
    gb = jnp.zeros((4, 2, max_lanes), f32)          # row0: fused input bias, row1: b_hh_n
    for l, (p, (In, H)) in enumerate(zip(gru_layers, gru_dims)):
        wih_t = p["w_ih"].T                         # (In, 3H), gate order r,z,n
        whh_t = p["w_hh"].T                         # (H, 3H)
        gw = gw.at[l, :In + H, :3 * H].set(jnp.concatenate([wih_t, whh_t], 0))
        b_fused = p["b_ih"] + jnp.concatenate(
            [p["b_hh"][:2 * H], jnp.zeros((H,), f32)])
        gb = gb.at[l, 0, :3 * H].set(b_fused)
        gb = gb.at[l, 1, :H].set(p["b_hh"][2 * H:])

    lin_layers = [params["enc_proj"], params["dec_proj1"],
                  params["dec_proj2"], params["dec_proj3"]]
    lw = jnp.zeros((4, C, C), f32)                  # W.T per linear, lane-padded
    lb = jnp.zeros((4, C), f32)
    for i, p in enumerate(lin_layers):
        wt = p["w"].T                               # (C, out)
        lw = lw.at[i, :, :wt.shape[1]].set(wt)
        lb = lb.at[i, :p["b"].shape[0]].set(p["b"])

    return gw, gb, lw, lb


# ---------------------------------------------------------------------------
# Forward wrapper: pad batch, one pallas_call with 5 inputs.
# ---------------------------------------------------------------------------
def rnn_seq_ae_forward(prepped, X, seq_length):
    """X: (seq_len, batch, emb) — PyTorch GRU (seq, batch, feature) layout."""
    gw, gb, lw, lb = prepped
    S, B, E = X.shape
    C = lw.shape[1]

    # Pad batch to a multiple of 8 sublanes: every per-timestep row slice inside
    # the kernel is then tile-aligned and vreg sublane utilization is full.
    Bp = ((B + 7) // 8) * 8
    Xp = jnp.pad(X, ((0, 0), (0, Bp - B), (0, 0))).reshape(S * Bp, E)

    vmem = pl.BlockSpec(memory_space=pltpu.MemorySpace.VMEM)
    out2d = pl.pallas_call(
        functools.partial(_fused_rnn_seq_ae_kernel,
                          seq_in=S, seq_out=seq_length,
                          batch=Bp, emb=E, code=C),
        out_shape=jax.ShapeDtypeStruct((seq_length * Bp, E), jnp.float32),
        in_specs=[vmem] * 5,
        out_specs=vmem,
    )(Xp, gw, gb, lw, lb)
    # TODO(synk): at production batch sizes add a leading "parallel" grid axis
    # over batch tiles (v7x second TensorCore) and switch to a batch-in-lanes
    # layout for lane-dense matmuls/stores; at batch<=8 a single VMEM-resident
    # invocation is optimal on all generations.
    return out2d.reshape(seq_length, Bp, E)[:, :B, :]


# ---------------------------------------------------------------------------
# Parameter construction (deterministic, PyTorch-style uniform init, PT layout).
# ---------------------------------------------------------------------------
def _uniform(key, shape, bound):
    return jax.random.uniform(key, shape, jnp.float32, -bound, bound)


def make_gru_params(key, in_size, hid_size):
    b = 1.0 / (hid_size ** 0.5)
    ks = jax.random.split(key, 4)
    return dict(
        w_ih=_uniform(ks[0], (3 * hid_size, in_size), b),
        w_hh=_uniform(ks[1], (3 * hid_size, hid_size), b),
        b_ih=_uniform(ks[2], (3 * hid_size,), b),
        b_hh=_uniform(ks[3], (3 * hid_size,), b),
    )


def make_linear_params(key, in_size, out_size):
    b = 1.0 / (in_size ** 0.5)
    ks = jax.random.split(key, 2)
    return dict(
        w=_uniform(ks[0], (out_size, in_size), b),
        b=_uniform(ks[1], (out_size,), b),
    )


def make_params(key, emb_size, code_size):
    ks = jax.random.split(key, 8)
    return dict(
        enc_gru1=make_gru_params(ks[0], emb_size, code_size),
        enc_gru2=make_gru_params(ks[1], code_size, code_size),
        enc_proj=make_linear_params(ks[2], code_size, code_size),
        dec_gru1=make_gru_params(ks[3], code_size, code_size),
        dec_gru2=make_gru_params(ks[4], code_size, emb_size),
        dec_proj1=make_linear_params(ks[5], code_size, code_size),
        dec_proj2=make_linear_params(ks[6], code_size, emb_size),
        dec_proj3=make_linear_params(ks[7], code_size, emb_size),
    )


# ---------------------------------------------------------------------------
# Pure-JAX reference (mirrors PyTorch nn.GRU / nn.Linear semantics).
# ---------------------------------------------------------------------------
def _gru_ref(p, x, h0):
    w_ih, w_hh, b_ih, b_hh = p["w_ih"], p["w_hh"], p["b_ih"], p["b_hh"]

    def step(h, xt):
        gi = xt @ w_ih.T + b_ih
        gh = h @ w_hh.T + b_hh
        i_r, i_z, i_n = jnp.split(gi, 3, axis=-1)
        h_r, h_z, h_n = jnp.split(gh, 3, axis=-1)
        r = jax.nn.sigmoid(i_r + h_r)
        z = jax.nn.sigmoid(i_z + h_z)
        n = jnp.tanh(i_n + r * h_n)
        hn = (1.0 - z) * n + z * h
        return hn, hn

    last, outs = jax.lax.scan(step, h0[0], x)
    return outs, last[None]


def _linear_ref(p, x, neg_slope=None):
    y = x @ p["w"].T + p["b"]
    if neg_slope is not None:
        y = jnp.where(y >= 0, y, neg_slope * y)
    return y


def rnn_seq_ae_ref(params, X, seq_length):
    S, B, emb = X.shape
    C = params["enc_gru1"]["w_hh"].shape[1]
    h0 = jnp.zeros((1, B, C), jnp.float32)
    H_enc, res_h = _gru_ref(params["enc_gru1"], X, h0)
    proj_h = _linear_ref(params["enc_proj"], res_h.reshape(B, C), 0.2)
    _, last_enc = _gru_ref(params["enc_gru2"], H_enc, proj_h.reshape(1, B, C))
    code = last_enc + res_h
    H_in = jnp.broadcast_to(code, (seq_length, B, C))
    h1 = _linear_ref(params["dec_proj1"], code.reshape(B, C), 0.2)
    H_dec, last_dec = _gru_ref(params["dec_gru1"], H_in, h1.reshape(1, B, C))
    h2 = _linear_ref(params["dec_proj2"], last_dec.reshape(B, C), 0.2)
    X_dec, _ = _gru_ref(params["dec_gru2"], H_dec, h2.reshape(1, B, emb))
    p3 = _linear_ref(params["dec_proj3"], H_dec.reshape(seq_length * B, C))
    return X_dec + p3.reshape(seq_length, B, emb)


# ---------------------------------------------------------------------------
if __name__ == "__main__":
    emb_size, code_size, seq_length, batch = 16, 32, 8, 4

    key = jax.random.PRNGKey(0)
    k_params, k_x = jax.random.split(key)
    params = make_params(k_params, emb_size, code_size)

    # X layout: (seq_len, batch, emb) — PyTorch GRU default (batch_first=False).
    X = jax.random.normal(k_x, (seq_length, batch, emb_size), jnp.float32)

    # One-time host/device-side prep (outside the jitted forward path).
    prepped = prep_params(params, emb_size, code_size)

    fwd = jax.jit(rnn_seq_ae_forward, static_argnums=2)
    out = jax.block_until_ready(fwd(prepped, X, seq_length))

    ref = jax.block_until_ready(rnn_seq_ae_ref(params, X, seq_length))
    assert out.shape == (seq_length, batch, emb_size), out.shape
    max_err = float(jnp.max(jnp.abs(out - ref)))
    assert jnp.allclose(out, ref, atol=1e-4, rtol=1e-4), max_err
    print("KERNEL_OK")
</pallas_src>

<mosaic_0001>
module attributes {stable_mosaic.version = 11 : i64} {
  func.func @_fused_rnn_seq_ae_kernel(%arg0: memref<64x16xf32, #tpu.memory_space<vmem>>, %arg1: memref<4x64x96xf32, #tpu.memory_space<vmem>>, %arg2: memref<4x2x96xf32, #tpu.memory_space<vmem>>, %arg3: memref<4x32x32xf32, #tpu.memory_space<vmem>>, %arg4: memref<4x32xf32, #tpu.memory_space<vmem>>, %arg5: memref<64x16xf32, #tpu.memory_space<vmem>>) attributes {dimension_semantics = [], scalar_prefetch = 0 : i64, scratch_operands = 0 : i64, tpu.core_type = #tpu.core_type<tc>} {
    %c0 = arith.constant 0 : index
    %c0_0 = arith.constant 0 : index
    %0 = vector.load %arg0[%c0, %c0_0] : memref<64x16xf32, #tpu.memory_space<vmem>>, vector<64x16xf32>
    %cst = arith.constant 0.000000e+00 : f32
    %1 = vector.broadcast %cst : f32 to vector<8x32xf32>
    %c0_1 = arith.constant 0 : index
    %c0_2 = arith.constant 0 : index
    %c0_3 = arith.constant 0 : index
    %2 = vector.load %arg1[%c0_1, %c0_2, %c0_3] : memref<4x64x96xf32, #tpu.memory_space<vmem>>, vector<1x16x96xf32>
    %3 = vector.shape_cast %2 : vector<1x16x96xf32> to vector<16x96xf32>
    %c0_4 = arith.constant 0 : index
    %c16 = arith.constant 16 : index
    %c0_5 = arith.constant 0 : index
    %4 = vector.load %arg1[%c0_4, %c16, %c0_5] : memref<4x64x96xf32, #tpu.memory_space<vmem>>, vector<1x32x96xf32>
    %5 = vector.shape_cast %4 : vector<1x32x96xf32> to vector<32x96xf32>
    %c0_6 = arith.constant 0 : index
    %c0_7 = arith.constant 0 : index
    %c0_8 = arith.constant 0 : index
    %6 = vector.load %arg2[%c0_6, %c0_7, %c0_8] : memref<4x2x96xf32, #tpu.memory_space<vmem>>, vector<1x1x96xf32>
    %7 = vector.shape_cast %6 : vector<1x1x96xf32> to vector<1x96xf32>
    %c0_9 = arith.constant 0 : index
    %c1 = arith.constant 1 : index
    %c0_10 = arith.constant 0 : index
    %8 = vector.load %arg2[%c0_9, %c1, %c0_10] : memref<4x2x96xf32, #tpu.memory_space<vmem>>, vector<1x1x32xf32>
    %9 = vector.shape_cast %8 : vector<1x1x32xf32> to vector<1x32xf32>
    %cst_11 = arith.constant dense<0.000000e+00> : vector<64x96xf32>
    %10 = tpu.matmul %0, %3, %cst_11 {dimension_numbers = #tpu.dot_dimension_numbers<[1], [0], [0], [1], [0, 0, 1, 1], [], []>} : vector<64x16xf32>, vector<16x96xf32>, vector<64x96xf32> -> vector<64x96xf32>
    %11 = vector.broadcast %7 : vector<1x96xf32> to vector<64x96xf32>
    %12 = arith.addf %10, %11 : vector<64x96xf32>
    %13 = vector.shape_cast %9 : vector<1x32xf32> to vector<1x32xf32>
    %14 = vector.broadcast %13 : vector<1x32xf32> to vector<8x32xf32>
    %15 = vector.extract_strided_slice %12 {offsets = [0, 0], sizes = [8, 96], strides = [1, 1]} : vector<64x96xf32> to vector<8x96xf32>
    %cst_12 = arith.constant dense<0.000000e+00> : vector<8x96xf32>
    %16 = tpu.matmul %1, %5, %cst_12 {dimension_numbers = #tpu.dot_dimension_numbers<[1], [0], [0], [1], [0, 0, 1, 1], [], []>} : vector<8x32xf32>, vector<32x96xf32>, vector<8x96xf32> -> vector<8x96xf32>
    %17 = vector.extract_strided_slice %15 {offsets = [0, 0], sizes = [8, 64], strides = [1, 1]} : vector<8x96xf32> to vector<8x64xf32>
    %18 = vector.extract_strided_slice %16 {offsets = [0, 0], sizes = [8, 64], strides = [1, 1]} : vector<8x96xf32> to vector<8x64xf32>
    %19 = arith.addf %17, %18 : vector<8x64xf32>
    %20 = arith.negf %19 : vector<8x64xf32>
    %21 = math.exp %20 : vector<8x64xf32>
    %cst_13 = arith.constant 1.000000e+00 : f32
    %22 = vector.broadcast %cst_13 : f32 to vector<8x64xf32>
    %23 = arith.addf %22, %21 : vector<8x64xf32>
    %24 = arith.divf %22, %23 : vector<8x64xf32>
    %25 = vector.extract_strided_slice %24 {offsets = [0, 0], sizes = [8, 32], strides = [1, 1]} : vector<8x64xf32> to vector<8x32xf32>
    %26 = vector.extract_strided_slice %24 {offsets = [0, 32], sizes = [8, 32], strides = [1, 1]} : vector<8x64xf32> to vector<8x32xf32>
    %27 = vector.extract_strided_slice %15 {offsets = [0, 64], sizes = [8, 32], strides = [1, 1]} : vector<8x96xf32> to vector<8x32xf32>
    %28 = vector.extract_strided_slice %16 {offsets = [0, 64], sizes = [8, 32], strides = [1, 1]} : vector<8x96xf32> to vector<8x32xf32>
    %29 = arith.addf %28, %14 : vector<8x32xf32>
    %30 = arith.mulf %25, %29 : vector<8x32xf32>
    %31 = arith.addf %27, %30 : vector<8x32xf32>
    %32 = math.tanh %31 : vector<8x32xf32>
    %33 = arith.subf %1, %32 : vector<8x32xf32>
    %34 = arith.mulf %26, %33 : vector<8x32xf32>
    %35 = arith.addf %32, %34 : vector<8x32xf32>
    %36 = vector.extract_strided_slice %12 {offsets = [8, 0], sizes = [8, 96], strides = [1, 1]} : vector<64x96xf32> to vector<8x96xf32>
    %cst_14 = arith.constant dense<0.000000e+00> : vector<8x96xf32>
    %37 = tpu.matmul %35, %5, %cst_14 {dimension_numbers = #tpu.dot_dimension_numbers<[1], [0], [0], [1], [0, 0, 1, 1], [], []>} : vector<8x32xf32>, vector<32x96xf32>, vector<8x96xf32> -> vector<8x96xf32>
    %38 = vector.extract_strided_slice %36 {offsets = [0, 0], sizes = [8, 64], strides = [1, 1]} : vector<8x96xf32> to vector<8x64xf32>
    %39 = vector.extract_strided_slice %37 {offsets = [0, 0], sizes = [8, 64], strides = [1, 1]} : vector<8x96xf32> to vector<8x64xf32>
    %40 = arith.addf %38, %39 : vector<8x64xf32>
    %41 = arith.negf %40 : vector<8x64xf32>
    %42 = math.exp %41 : vector<8x64xf32>
    %cst_15 = arith.constant 1.000000e+00 : f32
    %43 = vector.broadcast %cst_15 : f32 to vector<8x64xf32>
    %44 = arith.addf %43, %42 : vector<8x64xf32>
    %45 = arith.divf %43, %44 : vector<8x64xf32>
    %46 = vector.extract_strided_slice %45 {offsets = [0, 0], sizes = [8, 32], strides = [1, 1]} : vector<8x64xf32> to vector<8x32xf32>
    %47 = vector.extract_strided_slice %45 {offsets = [0, 32], sizes = [8, 32], strides = [1, 1]} : vector<8x64xf32> to vector<8x32xf32>
    %48 = vector.extract_strided_slice %36 {offsets = [0, 64], sizes = [8, 32], strides = [1, 1]} : vector<8x96xf32> to vector<8x32xf32>
    %49 = vector.extract_strided_slice %37 {offsets = [0, 64], sizes = [8, 32], strides = [1, 1]} : vector<8x96xf32> to vector<8x32xf32>
    %50 = arith.addf %49, %14 : vector<8x32xf32>
    %51 = arith.mulf %46, %50 : vector<8x32xf32>
    %52 = arith.addf %48, %51 : vector<8x32xf32>
    %53 = math.tanh %52 : vector<8x32xf32>
    %54 = arith.subf %35, %53 : vector<8x32xf32>
    %55 = arith.mulf %47, %54 : vector<8x32xf32>
    %56 = arith.addf %53, %55 : vector<8x32xf32>
    %57 = vector.extract_strided_slice %12 {offsets = [16, 0], sizes = [8, 96], strides = [1, 1]} : vector<64x96xf32> to vector<8x96xf32>
    %cst_16 = arith.constant dense<0.000000e+00> : vector<8x96xf32>
    %58 = tpu.matmul %56, %5, %cst_16 {dimension_numbers = #tpu.dot_dimension_numbers<[1], [0], [0], [1], [0, 0, 1, 1], [], []>} : vector<8x32xf32>, vector<32x96xf32>, vector<8x96xf32> -> vector<8x96xf32>
    %59 = vector.extract_strided_slice %57 {offsets = [0, 0], sizes = [8, 64], strides = [1, 1]} : vector<8x96xf32> to vector<8x64xf32>
    %60 = vector.extract_strided_slice %58 {offsets = [0, 0], sizes = [8, 64], strides = [1, 1]} : vector<8x96xf32> to vector<8x64xf32>
    %61 = arith.addf %59, %60 : vector<8x64xf32>
    %62 = arith.negf %61 : vector<8x64xf32>
    %63 = math.exp %62 : vector<8x64xf32>
    %cst_17 = arith.constant 1.000000e+00 : f32
    %64 = vector.broadcast %cst_17 : f32 to vector<8x64xf32>
    %65 = arith.addf %64, %63 : vector<8x64xf32>
    %66 = arith.divf %64, %65 : vector<8x64xf32>
    %67 = vector.extract_strided_slice %66 {offsets = [0, 0], sizes = [8, 32], strides = [1, 1]} : vector<8x64xf32> to vector<8x32xf32>
    %68 = vector.extract_strided_slice %66 {offsets = [0, 32], sizes = [8, 32], strides = [1, 1]} : vector<8x64xf32> to vector<8x32xf32>
    %69 = vector.extract_strided_slice %57 {offsets = [0, 64], sizes = [8, 32], strides = [1, 1]} : vector<8x96xf32> to vector<8x32xf32>
    %70 = vector.extract_strided_slice %58 {offsets = [0, 64], sizes = [8, 32], strides = [1, 1]} : vector<8x96xf32> to vector<8x32xf32>
    %71 = arith.addf %70, %14 : vector<8x32xf32>
    %72 = arith.mulf %67, %71 : vector<8x32xf32>
    %73 = arith.addf %69, %72 : vector<8x32xf32>
    %74 = math.tanh %73 : vector<8x32xf32>
    %75 = arith.subf %56, %74 : vector<8x32xf32>
    %76 = arith.mulf %68, %75 : vector<8x32xf32>
    %77 = arith.addf %74, %76 : vector<8x32xf32>
    %78 = vector.extract_strided_slice %12 {offsets = [24, 0], sizes = [8, 96], strides = [1, 1]} : vector<64x96xf32> to vector<8x96xf32>
    %cst_18 = arith.constant dense<0.000000e+00> : vector<8x96xf32>
    %79 = tpu.matmul %77, %5, %cst_18 {dimension_numbers = #tpu.dot_dimension_numbers<[1], [0], [0], [1], [0, 0, 1, 1], [], []>} : vector<8x32xf32>, vector<32x96xf32>, vector<8x96xf32> -> vector<8x96xf32>
    %80 = vector.extract_strided_slice %78 {offsets = [0, 0], sizes = [8, 64], strides = [1, 1]} : vector<8x96xf32> to vector<8x64xf32>
    %81 = vector.extract_strided_slice %79 {offsets = [0, 0], sizes = [8, 64], strides = [1, 1]} : vector<8x96xf32> to vector<8x64xf32>
    %82 = arith.addf %80, %81 : vector<8x64xf32>
    %83 = arith.negf %82 : vector<8x64xf32>
    %84 = math.exp %83 : vector<8x64xf32>
    %cst_19 = arith.constant 1.000000e+00 : f32
    %85 = vector.broadcast %cst_19 : f32 to vector<8x64xf32>
    %86 = arith.addf %85, %84 : vector<8x64xf32>
    %87 = arith.divf %85, %86 : vector<8x64xf32>
    %88 = vector.extract_strided_slice %87 {offsets = [0, 0], sizes = [8, 32], strides = [1, 1]} : vector<8x64xf32> to vector<8x32xf32>
    %89 = vector.extract_strided_slice %87 {offsets = [0, 32], sizes = [8, 32], strides = [1, 1]} : vector<8x64xf32> to vector<8x32xf32>
    %90 = vector.extract_strided_slice %78 {offsets = [0, 64], sizes = [8, 32], strides = [1, 1]} : vector<8x96xf32> to vector<8x32xf32>
    %91 = vector.extract_strided_slice %79 {offsets = [0, 64], sizes = [8, 32], strides = [1, 1]} : vector<8x96xf32> to vector<8x32xf32>
    %92 = arith.addf %91, %14 : vector<8x32xf32>
    %93 = arith.mulf %88, %92 : vector<8x32xf32>
    %94 = arith.addf %90, %93 : vector<8x32xf32>
    %95 = math.tanh %94 : vector<8x32xf32>
    %96 = arith.subf %77, %95 : vector<8x32xf32>
    %97 = arith.mulf %89, %96 : vector<8x32xf32>
    %98 = arith.addf %95, %97 : vector<8x32xf32>
    %99 = vector.extract_strided_slice %12 {offsets = [32, 0], sizes = [8, 96], strides = [1, 1]} : vector<64x96xf32> to vector<8x96xf32>
    %cst_20 = arith.constant dense<0.000000e+00> : vector<8x96xf32>
    %100 = tpu.matmul %98, %5, %cst_20 {dimension_numbers = #tpu.dot_dimension_numbers<[1], [0], [0], [1], [0, 0, 1, 1], [], []>} : vector<8x32xf32>, vector<32x96xf32>, vector<8x96xf32> -> vector<8x96xf32>
    %101 = vector.extract_strided_slice %99 {offsets = [0, 0], sizes = [8, 64], strides = [1, 1]} : vector<8x96xf32> to vector<8x64xf32>
    %102 = vector.extract_strided_slice %100 {offsets = [0, 0], sizes = [8, 64], strides = [1, 1]} : vector<8x96xf32> to vector<8x64xf32>
    %103 = arith.addf %101, %102 : vector<8x64xf32>
    %104 = arith.negf %103 : vector<8x64xf32>
    %105 = math.exp %104 : vector<8x64xf32>
    %cst_21 = arith.constant 1.000000e+00 : f32
    %106 = vector.broadcast %cst_21 : f32 to vector<8x64xf32>
    %107 = arith.addf %106, %105 : vector<8x64xf32>
    %108 = arith.divf %106, %107 : vector<8x64xf32>
    %109 = vector.extract_strided_slice %108 {offsets = [0, 0], sizes = [8, 32], strides = [1, 1]} : vector<8x64xf32> to vector<8x32xf32>
    %110 = vector.extract_strided_slice %108 {offsets = [0, 32], sizes = [8, 32], strides = [1, 1]} : vector<8x64xf32> to vector<8x32xf32>
    %111 = vector.extract_strided_slice %99 {offsets = [0, 64], sizes = [8, 32], strides = [1, 1]} : vector<8x96xf32> to vector<8x32xf32>
    %112 = vector.extract_strided_slice %100 {offsets = [0, 64], sizes = [8, 32], strides = [1, 1]} : vector<8x96xf32> to vector<8x32xf32>
    %113 = arith.addf %112, %14 : vector<8x32xf32>
    %114 = arith.mulf %109, %113 : vector<8x32xf32>
    %115 = arith.addf %111, %114 : vector<8x32xf32>
    %116 = math.tanh %115 : vector<8x32xf32>
    %117 = arith.subf %98, %116 : vector<8x32xf32>
    %118 = arith.mulf %110, %117 : vector<8x32xf32>
    %119 = arith.addf %116, %118 : vector<8x32xf32>
    %120 = vector.extract_strided_slice %12 {offsets = [40, 0], sizes = [8, 96], strides = [1, 1]} : vector<64x96xf32> to vector<8x96xf32>
    %cst_22 = arith.constant dense<0.000000e+00> : vector<8x96xf32>
    %121 = tpu.matmul %119, %5, %cst_22 {dimension_numbers = #tpu.dot_dimension_numbers<[1], [0], [0], [1], [0, 0, 1, 1], [], []>} : vector<8x32xf32>, vector<32x96xf32>, vector<8x96xf32> -> vector<8x96xf32>
    %122 = vector.extract_strided_slice %120 {offsets = [0, 0], sizes = [8, 64], strides = [1, 1]} : vector<8x96xf32> to vector<8x64xf32>
    %123 = vector.extract_strided_slice %121 {offsets = [0, 0], sizes = [8, 64], strides = [1, 1]} : vector<8x96xf32> to vector<8x64xf32>
    %124 = arith.addf %122, %123 : vector<8x64xf32>
    %125 = arith.negf %124 : vector<8x64xf32>
    %126 = math.exp %125 : vector<8x64xf32>
    %cst_23 = arith.constant 1.000000e+00 : f32
    %127 = vector.broadcast %cst_23 : f32 to vector<8x64xf32>
    %128 = arith.addf %127, %126 : vector<8x64xf32>
    %129 = arith.divf %127, %128 : vector<8x64xf32>
    %130 = vector.extract_strided_slice %129 {offsets = [0, 0], sizes = [8, 32], strides = [1, 1]} : vector<8x64xf32> to vector<8x32xf32>
    %131 = vector.extract_strided_slice %129 {offsets = [0, 32], sizes = [8, 32], strides = [1, 1]} : vector<8x64xf32> to vector<8x32xf32>
    %132 = vector.extract_strided_slice %120 {offsets = [0, 64], sizes = [8, 32], strides = [1, 1]} : vector<8x96xf32> to vector<8x32xf32>
    %133 = vector.extract_strided_slice %121 {offsets = [0, 64], sizes = [8, 32], strides = [1, 1]} : vector<8x96xf32> to vector<8x32xf32>
    %134 = arith.addf %133, %14 : vector<8x32xf32>
    %135 = arith.mulf %130, %134 : vector<8x32xf32>
    %136 = arith.addf %132, %135 : vector<8x32xf32>
    %137 = math.tanh %136 : vector<8x32xf32>
    %138 = arith.subf %119, %137 : vector<8x32xf32>
    %139 = arith.mulf %131, %138 : vector<8x32xf32>
    %140 = arith.addf %137, %139 : vector<8x32xf32>
    %141 = vector.extract_strided_slice %12 {offsets = [48, 0], sizes = [8, 96], strides = [1, 1]} : vector<64x96xf32> to vector<8x96xf32>
    %cst_24 = arith.constant dense<0.000000e+00> : vector<8x96xf32>
    %142 = tpu.matmul %140, %5, %cst_24 {dimension_numbers = #tpu.dot_dimension_numbers<[1], [0], [0], [1], [0, 0, 1, 1], [], []>} : vector<8x32xf32>, vector<32x96xf32>, vector<8x96xf32> -> vector<8x96xf32>
    %143 = vector.extract_strided_slice %141 {offsets = [0, 0], sizes = [8, 64], strides = [1, 1]} : vector<8x96xf32> to vector<8x64xf32>
    %144 = vector.extract_strided_slice %142 {offsets = [0, 0], sizes = [8, 64], strides = [1, 1]} : vector<8x96xf32> to vector<8x64xf32>
    %145 = arith.addf %143, %144 : vector<8x64xf32>
    %146 = arith.negf %145 : vector<8x64xf32>
    %147 = math.exp %146 : vector<8x64xf32>
    %cst_25 = arith.constant 1.000000e+00 : f32
    %148 = vector.broadcast %cst_25 : f32 to vector<8x64xf32>
    %149 = arith.addf %148, %147 : vector<8x64xf32>
    %150 = arith.divf %148, %149 : vector<8x64xf32>
    %151 = vector.extract_strided_slice %150 {offsets = [0, 0], sizes = [8, 32], strides = [1, 1]} : vector<8x64xf32> to vector<8x32xf32>
    %152 = vector.extract_strided_slice %150 {offsets = [0, 32], sizes = [8, 32], strides = [1, 1]} : vector<8x64xf32> to vector<8x32xf32>
    %153 = vector.extract_strided_slice %141 {offsets = [0, 64], sizes = [8, 32], strides = [1, 1]} : vector<8x96xf32> to vector<8x32xf32>
    %154 = vector.extract_strided_slice %142 {offsets = [0, 64], sizes = [8, 32], strides = [1, 1]} : vector<8x96xf32> to vector<8x32xf32>
    %155 = arith.addf %154, %14 : vector<8x32xf32>
    %156 = arith.mulf %151, %155 : vector<8x32xf32>
    %157 = arith.addf %153, %156 : vector<8x32xf32>
    %158 = math.tanh %157 : vector<8x32xf32>
    %159 = arith.subf %140, %158 : vector<8x32xf32>
    %160 = arith.mulf %152, %159 : vector<8x32xf32>
    %161 = arith.addf %158, %160 : vector<8x32xf32>
    %162 = vector.extract_strided_slice %12 {offsets = [56, 0], sizes = [8, 96], strides = [1, 1]} : vector<64x96xf32> to vector<8x96xf32>
    %cst_26 = arith.constant dense<0.000000e+00> : vector<8x96xf32>
    %163 = tpu.matmul %161, %5, %cst_26 {dimension_numbers = #tpu.dot_dimension_numbers<[1], [0], [0], [1], [0, 0, 1, 1], [], []>} : vector<8x32xf32>, vector<32x96xf32>, vector<8x96xf32> -> vector<8x96xf32>
    %164 = vector.extract_strided_slice %162 {offsets = [0, 0], sizes = [8, 64], strides = [1, 1]} : vector<8x96xf32> to vector<8x64xf32>
    %165 = vector.extract_strided_slice %163 {offsets = [0, 0], sizes = [8, 64], strides = [1, 1]} : vector<8x96xf32> to vector<8x64xf32>
    %166 = arith.addf %164, %165 : vector<8x64xf32>
    %167 = arith.negf %166 : vector<8x64xf32>
    %168 = math.exp %167 : vector<8x64xf32>
    %cst_27 = arith.constant 1.000000e+00 : f32
    %169 = vector.broadcast %cst_27 : f32 to vector<8x64xf32>
    %170 = arith.addf %169, %168 : vector<8x64xf32>
    %171 = arith.divf %169, %170 : vector<8x64xf32>
    %172 = vector.extract_strided_slice %171 {offsets = [0, 0], sizes = [8, 32], strides = [1, 1]} : vector<8x64xf32> to vector<8x32xf32>
    %173 = vector.extract_strided_slice %171 {offsets = [0, 32], sizes = [8, 32], strides = [1, 1]} : vector<8x64xf32> to vector<8x32xf32>
    %174 = vector.extract_strided_slice %162 {offsets = [0, 64], sizes = [8, 32], strides = [1, 1]} : vector<8x96xf32> to vector<8x32xf32>
    %175 = vector.extract_strided_slice %163 {offsets = [0, 64], sizes = [8, 32], strides = [1, 1]} : vector<8x96xf32> to vector<8x32xf32>
    %176 = arith.addf %175, %14 : vector<8x32xf32>
    %177 = arith.mulf %172, %176 : vector<8x32xf32>
    %178 = arith.addf %174, %177 : vector<8x32xf32>
    %179 = math.tanh %178 : vector<8x32xf32>
    %180 = arith.subf %161, %179 : vector<8x32xf32>
    %181 = arith.mulf %173, %180 : vector<8x32xf32>
    %182 = arith.addf %179, %181 : vector<8x32xf32>
    %c0_28 = arith.constant 0 : index
    %c0_29 = arith.constant 0 : index
    %c0_30 = arith.constant 0 : index
    %183 = vector.load %arg3[%c0_28, %c0_29, %c0_30] : memref<4x32x32xf32, #tpu.memory_space<vmem>>, vector<1x32x32xf32>
    %184 = vector.shape_cast %183 : vector<1x32x32xf32> to vector<32x32xf32>
    %c0_31 = arith.constant 0 : index
    %c0_32 = arith.constant 0 : index
    %185 = vector.load %arg4[%c0_31, %c0_32] : memref<4x32xf32, #tpu.memory_space<vmem>>, vector<1x32xf32>
    %cst_33 = arith.constant dense<0.000000e+00> : vector<8x32xf32>
    %186 = tpu.matmul %182, %184, %cst_33 {dimension_numbers = #tpu.dot_dimension_numbers<[1], [0], [0], [1], [0, 0, 1, 1], [], []>} : vector<8x32xf32>, vector<32x32xf32>, vector<8x32xf32> -> vector<8x32xf32>
    %187 = vector.broadcast %185 : vector<1x32xf32> to vector<8x32xf32>
    %188 = arith.addf %186, %187 : vector<8x32xf32>
    %cst_34 = arith.constant 0.000000e+00 : f32
    %189 = vector.broadcast %cst_34 : f32 to vector<8x32xf32>
    %190 = arith.cmpf oge, %188, %189 : vector<8x32xf32>
    %cst_35 = arith.constant 2.000000e-01 : f32
    %191 = vector.broadcast %cst_35 : f32 to vector<8x32xf32>
    %192 = arith.mulf %191, %188 : vector<8x32xf32>
    %193 = arith.select %190, %188, %192 : vector<8x32xi1>, vector<8x32xf32>
    %194 = tpu.concatenate %35, %56, %77, %98, %119, %140, %161, %182 in 0 : vector<8x32xf32>, vector<8x32xf32>, vector<8x32xf32>, vector<8x32xf32>, vector<8x32xf32>, vector<8x32xf32>, vector<8x32xf32>, vector<8x32xf32> -> vector<64x32xf32>
    %c1_36 = arith.constant 1 : index
    %c0_37 = arith.constant 0 : index
    %c0_38 = arith.constant 0 : index
    %195 = vector.load %arg1[%c1_36, %c0_37, %c0_38] : memref<4x64x96xf32, #tpu.memory_space<vmem>>, vector<1x32x96xf32>
    %196 = vector.shape_cast %195 : vector<1x32x96xf32> to vector<32x96xf32>
    %c1_39 = arith.constant 1 : index
    %c32 = arith.constant 32 : index
    %c0_40 = arith.constant 0 : index
    %197 = vector.load %arg1[%c1_39, %c32, %c0_40] : memref<4x64x96xf32, #tpu.memory_space<vmem>>, vector<1x32x96xf32>
    %198 = vector.shape_cast %197 : vector<1x32x96xf32> to vector<32x96xf32>
    %c1_41 = arith.constant 1 : index
    %c0_42 = arith.constant 0 : index
    %c0_43 = arith.constant 0 : index
    %199 = vector.load %arg2[%c1_41, %c0_42, %c0_43] : memref<4x2x96xf32, #tpu.memory_space<vmem>>, vector<1x1x96xf32>
    %200 = vector.shape_cast %199 : vector<1x1x96xf32> to vector<1x96xf32>
    %c1_44 = arith.constant 1 : index
    %c1_45 = arith.constant 1 : index
    %c0_46 = arith.constant 0 : index
    %201 = vector.load %arg2[%c1_44, %c1_45, %c0_46] : memref<4x2x96xf32, #tpu.memory_space<vmem>>, vector<1x1x32xf32>
    %202 = vector.shape_cast %201 : vector<1x1x32xf32> to vector<1x32xf32>
    %cst_47 = arith.constant dense<0.000000e+00> : vector<64x96xf32>
    %203 = tpu.matmul %194, %196, %cst_47 {dimension_numbers = #tpu.dot_dimension_numbers<[1], [0], [0], [1], [0, 0, 1, 1], [], []>} : vector<64x32xf32>, vector<32x96xf32>, vector<64x96xf32> -> vector<64x96xf32>
    %204 = vector.broadcast %200 : vector<1x96xf32> to vector<64x96xf32>
    %205 = arith.addf %203, %204 : vector<64x96xf32>
    %206 = vector.shape_cast %202 : vector<1x32xf32> to vector<1x32xf32>
    %207 = vector.broadcast %206 : vector<1x32xf32> to vector<8x32xf32>
    %208 = vector.extract_strided_slice %205 {offsets = [0, 0], sizes = [8, 96], strides = [1, 1]} : vector<64x96xf32> to vector<8x96xf32>
    %cst_48 = arith.constant dense<0.000000e+00> : vector<8x96xf32>
    %209 = tpu.matmul %193, %198, %cst_48 {dimension_numbers = #tpu.dot_dimension_numbers<[1], [0], [0], [1], [0, 0, 1, 1], [], []>} : vector<8x32xf32>, vector<32x96xf32>, vector<8x96xf32> -> vector<8x96xf32>
    %210 = vector.extract_strided_slice %208 {offsets = [0, 0], sizes = [8, 64], strides = [1, 1]} : vector<8x96xf32> to vector<8x64xf32>
    %211 = vector.extract_strided_slice %209 {offsets = [0, 0], sizes = [8, 64], strides = [1, 1]} : vector<8x96xf32> to vector<8x64xf32>
    %212 = arith.addf %210, %211 : vector<8x64xf32>
    %213 = arith.negf %212 : vector<8x64xf32>
    %214 = math.exp %213 : vector<8x64xf32>
    %cst_49 = arith.constant 1.000000e+00 : f32
    %215 = vector.broadcast %cst_49 : f32 to vector<8x64xf32>
    %216 = arith.addf %215, %214 : vector<8x64xf32>
    %217 = arith.divf %215, %216 : vector<8x64xf32>
    %218 = vector.extract_strided_slice %217 {offsets = [0, 0], sizes = [8, 32], strides = [1, 1]} : vector<8x64xf32> to vector<8x32xf32>
    %219 = vector.extract_strided_slice %217 {offsets = [0, 32], sizes = [8, 32], strides = [1, 1]} : vector<8x64xf32> to vector<8x32xf32>
    %220 = vector.extract_strided_slice %208 {offsets = [0, 64], sizes = [8, 32], strides = [1, 1]} : vector<8x96xf32> to vector<8x32xf32>
    %221 = vector.extract_strided_slice %209 {offsets = [0, 64], sizes = [8, 32], strides = [1, 1]} : vector<8x96xf32> to vector<8x32xf32>
    %222 = arith.addf %221, %207 : vector<8x32xf32>
    %223 = arith.mulf %218, %222 : vector<8x32xf32>
    %224 = arith.addf %220, %223 : vector<8x32xf32>
    %225 = math.tanh %224 : vector<8x32xf32>
    %226 = arith.subf %193, %225 : vector<8x32xf32>
    %227 = arith.mulf %219, %226 : vector<8x32xf32>
    %228 = arith.addf %225, %227 : vector<8x32xf32>
    %229 = vector.extract_strided_slice %205 {offsets = [8, 0], sizes = [8, 96], strides = [1, 1]} : vector<64x96xf32> to vector<8x96xf32>
    %cst_50 = arith.constant dense<0.000000e+00> : vector<8x96xf32>
    %230 = tpu.matmul %228, %198, %cst_50 {dimension_numbers = #tpu.dot_dimension_numbers<[1], [0], [0], [1], [0, 0, 1, 1], [], []>} : vector<8x32xf32>, vector<32x96xf32>, vector<8x96xf32> -> vector<8x96xf32>
    %231 = vector.extract_strided_slice %229 {offsets = [0, 0], sizes = [8, 64], strides = [1, 1]} : vector<8x96xf32> to vector<8x64xf32>
    %232 = vector.extract_strided_slice %230 {offsets = [0, 0], sizes = [8, 64], strides = [1, 1]} : vector<8x96xf32> to vector<8x64xf32>
    %233 = arith.addf %231, %232 : vector<8x64xf32>
    %234 = arith.negf %233 : vector<8x64xf32>
    %235 = math.exp %234 : vector<8x64xf32>
    %cst_51 = arith.constant 1.000000e+00 : f32
    %236 = vector.broadcast %cst_51 : f32 to vector<8x64xf32>
    %237 = arith.addf %236, %235 : vector<8x64xf32>
    %238 = arith.divf %236, %237 : vector<8x64xf32>
    %239 = vector.extract_strided_slice %238 {offsets = [0, 0], sizes = [8, 32], strides = [1, 1]} : vector<8x64xf32> to vector<8x32xf32>
    %240 = vector.extract_strided_slice %238 {offsets = [0, 32], sizes = [8, 32], strides = [1, 1]} : vector<8x64xf32> to vector<8x32xf32>
    %241 = vector.extract_strided_slice %229 {offsets = [0, 64], sizes = [8, 32], strides = [1, 1]} : vector<8x96xf32> to vector<8x32xf32>
    %242 = vector.extract_strided_slice %230 {offsets = [0, 64], sizes = [8, 32], strides = [1, 1]} : vector<8x96xf32> to vector<8x32xf32>
    %243 = arith.addf %242, %207 : vector<8x32xf32>
    %244 = arith.mulf %239, %243 : vector<8x32xf32>
    %245 = arith.addf %241, %244 : vector<8x32xf32>
    %246 = math.tanh %245 : vector<8x32xf32>
    %247 = arith.subf %228, %246 : vector<8x32xf32>
    %248 = arith.mulf %240, %247 : vector<8x32xf32>
    %249 = arith.addf %246, %248 : vector<8x32xf32>
    %250 = vector.extract_strided_slice %205 {offsets = [16, 0], sizes = [8, 96], strides = [1, 1]} : vector<64x96xf32> to vector<8x96xf32>
    %cst_52 = arith.constant dense<0.000000e+00> : vector<8x96xf32>
    %251 = tpu.matmul %249, %198, %cst_52 {dimension_numbers = #tpu.dot_dimension_numbers<[1], [0], [0], [1], [0, 0, 1, 1], [], []>} : vector<8x32xf32>, vector<32x96xf32>, vector<8x96xf32> -> vector<8x96xf32>
    %252 = vector.extract_strided_slice %250 {offsets = [0, 0], sizes = [8, 64], strides = [1, 1]} : vector<8x96xf32> to vector<8x64xf32>
    %253 = vector.extract_strided_slice %251 {offsets = [0, 0], sizes = [8, 64], strides = [1, 1]} : vector<8x96xf32> to vector<8x64xf32>
    %254 = arith.addf %252, %253 : vector<8x64xf32>
    %255 = arith.negf %254 : vector<8x64xf32>
    %256 = math.exp %255 : vector<8x64xf32>
    %cst_53 = arith.constant 1.000000e+00 : f32
    %257 = vector.broadcast %cst_53 : f32 to vector<8x64xf32>
    %258 = arith.addf %257, %256 : vector<8x64xf32>
    %259 = arith.divf %257, %258 : vector<8x64xf32>
    %260 = vector.extract_strided_slice %259 {offsets = [0, 0], sizes = [8, 32], strides = [1, 1]} : vector<8x64xf32> to vector<8x32xf32>
    %261 = vector.extract_strided_slice %259 {offsets = [0, 32], sizes = [8, 32], strides = [1, 1]} : vector<8x64xf32> to vector<8x32xf32>
    %262 = vector.extract_strided_slice %250 {offsets = [0, 64], sizes = [8, 32], strides = [1, 1]} : vector<8x96xf32> to vector<8x32xf32>
    %263 = vector.extract_strided_slice %251 {offsets = [0, 64], sizes = [8, 32], strides = [1, 1]} : vector<8x96xf32> to vector<8x32xf32>
    %264 = arith.addf %263, %207 : vector<8x32xf32>
    %265 = arith.mulf %260, %264 : vector<8x32xf32>
    %266 = arith.addf %262, %265 : vector<8x32xf32>
    %267 = math.tanh %266 : vector<8x32xf32>
    %268 = arith.subf %249, %267 : vector<8x32xf32>
    %269 = arith.mulf %261, %268 : vector<8x32xf32>
    %270 = arith.addf %267, %269 : vector<8x32xf32>
    %271 = vector.extract_strided_slice %205 {offsets = [24, 0], sizes = [8, 96], strides = [1, 1]} : vector<64x96xf32> to vector<8x96xf32>
    %cst_54 = arith.constant dense<0.000000e+00> : vector<8x96xf32>
    %272 = tpu.matmul %270, %198, %cst_54 {dimension_numbers = #tpu.dot_dimension_numbers<[1], [0], [0], [1], [0, 0, 1, 1], [], []>} : vector<8x32xf32>, vector<32x96xf32>, vector<8x96xf32> -> vector<8x96xf32>
    %273 = vector.extract_strided_slice %271 {offsets = [0, 0], sizes = [8, 64], strides = [1, 1]} : vector<8x96xf32> to vector<8x64xf32>
    %274 = vector.extract_strided_slice %272 {offsets = [0, 0], sizes = [8, 64], strides = [1, 1]} : vector<8x96xf32> to vector<8x64xf32>
    %275 = arith.addf %273, %274 : vector<8x64xf32>
    %276 = arith.negf %275 : vector<8x64xf32>
    %277 = math.exp %276 : vector<8x64xf32>
    %cst_55 = arith.constant 1.000000e+00 : f32
    %278 = vector.broadcast %cst_55 : f32 to vector<8x64xf32>
    %279 = arith.addf %278, %277 : vector<8x64xf32>
    %280 = arith.divf %278, %279 : vector<8x64xf32>
    %281 = vector.extract_strided_slice %280 {offsets = [0, 0], sizes = [8, 32], strides = [1, 1]} : vector<8x64xf32> to vector<8x32xf32>
    %282 = vector.extract_strided_slice %280 {offsets = [0, 32], sizes = [8, 32], strides = [1, 1]} : vector<8x64xf32> to vector<8x32xf32>
    %283 = vector.extract_strided_slice %271 {offsets = [0, 64], sizes = [8, 32], strides = [1, 1]} : vector<8x96xf32> to vector<8x32xf32>
    %284 = vector.extract_strided_slice %272 {offsets = [0, 64], sizes = [8, 32], strides = [1, 1]} : vector<8x96xf32> to vector<8x32xf32>
    %285 = arith.addf %284, %207 : vector<8x32xf32>
    %286 = arith.mulf %281, %285 : vector<8x32xf32>
    %287 = arith.addf %283, %286 : vector<8x32xf32>
    %288 = math.tanh %287 : vector<8x32xf32>
    %289 = arith.subf %270, %288 : vector<8x32xf32>
    %290 = arith.mulf %282, %289 : vector<8x32xf32>
    %291 = arith.addf %288, %290 : vector<8x32xf32>
    %292 = vector.extract_strided_slice %205 {offsets = [32, 0], sizes = [8, 96], strides = [1, 1]} : vector<64x96xf32> to vector<8x96xf32>
    %cst_56 = arith.constant dense<0.000000e+00> : vector<8x96xf32>
    %293 = tpu.matmul %291, %198, %cst_56 {dimension_numbers = #tpu.dot_dimension_numbers<[1], [0], [0], [1], [0, 0, 1, 1], [], []>} : vector<8x32xf32>, vector<32x96xf32>, vector<8x96xf32> -> vector<8x96xf32>
    %294 = vector.extract_strided_slice %292 {offsets = [0, 0], sizes = [8, 64], strides = [1, 1]} : vector<8x96xf32> to vector<8x64xf32>
    %295 = vector.extract_strided_slice %293 {offsets = [0, 0], sizes = [8, 64], strides = [1, 1]} : vector<8x96xf32> to vector<8x64xf32>
    %296 = arith.addf %294, %295 : vector<8x64xf32>
    %297 = arith.negf %296 : vector<8x64xf32>
    %298 = math.exp %297 : vector<8x64xf32>
    %cst_57 = arith.constant 1.000000e+00 : f32
    %299 = vector.broadcast %cst_57 : f32 to vector<8x64xf32>
    %300 = arith.addf %299, %298 : vector<8x64xf32>
    %301 = arith.divf %299, %300 : vector<8x64xf32>
    %302 = vector.extract_strided_slice %301 {offsets = [0, 0], sizes = [8, 32], strides = [1, 1]} : vector<8x64xf32> to vector<8x32xf32>
    %303 = vector.extract_strided_slice %301 {offsets = [0, 32], sizes = [8, 32], strides = [1, 1]} : vector<8x64xf32> to vector<8x32xf32>
    %304 = vector.extract_strided_slice %292 {offsets = [0, 64], sizes = [8, 32], strides = [1, 1]} : vector<8x96xf32> to vector<8x32xf32>
    %305 = vector.extract_strided_slice %293 {offsets = [0, 64], sizes = [8, 32], strides = [1, 1]} : vector<8x96xf32> to vector<8x32xf32>
    %306 = arith.addf %305, %207 : vector<8x32xf32>
    %307 = arith.mulf %302, %306 : vector<8x32xf32>
    %308 = arith.addf %304, %307 : vector<8x32xf32>
    %309 = math.tanh %308 : vector<8x32xf32>
    %310 = arith.subf %291, %309 : vector<8x32xf32>
    %311 = arith.mulf %303, %310 : vector<8x32xf32>
    %312 = arith.addf %309, %311 : vector<8x32xf32>
    %313 = vector.extract_strided_slice %205 {offsets = [40, 0], sizes = [8, 96], strides = [1, 1]} : vector<64x96xf32> to vector<8x96xf32>
    %cst_58 = arith.constant dense<0.000000e+00> : vector<8x96xf32>
    %314 = tpu.matmul %312, %198, %cst_58 {dimension_numbers = #tpu.dot_dimension_numbers<[1], [0], [0], [1], [0, 0, 1, 1], [], []>} : vector<8x32xf32>, vector<32x96xf32>, vector<8x96xf32> -> vector<8x96xf32>
    %315 = vector.extract_strided_slice %313 {offsets = [0, 0], sizes = [8, 64], strides = [1, 1]} : vector<8x96xf32> to vector<8x64xf32>
    %316 = vector.extract_strided_slice %314 {offsets = [0, 0], sizes = [8, 64], strides = [1, 1]} : vector<8x96xf32> to vector<8x64xf32>
    %317 = arith.addf %315, %316 : vector<8x64xf32>
    %318 = arith.negf %317 : vector<8x64xf32>
    %319 = math.exp %318 : vector<8x64xf32>
    %cst_59 = arith.constant 1.000000e+00 : f32
    %320 = vector.broadcast %cst_59 : f32 to vector<8x64xf32>
    %321 = arith.addf %320, %319 : vector<8x64xf32>
    %322 = arith.divf %320, %321 : vector<8x64xf32>
    %323 = vector.extract_strided_slice %322 {offsets = [0, 0], sizes = [8, 32], strides = [1, 1]} : vector<8x64xf32> to vector<8x32xf32>
    %324 = vector.extract_strided_slice %322 {offsets = [0, 32], sizes = [8, 32], strides = [1, 1]} : vector<8x64xf32> to vector<8x32xf32>
    %325 = vector.extract_strided_slice %313 {offsets = [0, 64], sizes = [8, 32], strides = [1, 1]} : vector<8x96xf32> to vector<8x32xf32>
    %326 = vector.extract_strided_slice %314 {offsets = [0, 64], sizes = [8, 32], strides = [1, 1]} : vector<8x96xf32> to vector<8x32xf32>
    %327 = arith.addf %326, %207 : vector<8x32xf32>
    %328 = arith.mulf %323, %327 : vector<8x32xf32>
    %329 = arith.addf %325, %328 : vector<8x32xf32>
    %330 = math.tanh %329 : vector<8x32xf32>
    %331 = arith.subf %312, %330 : vector<8x32xf32>
    %332 = arith.mulf %324, %331 : vector<8x32xf32>
    %333 = arith.addf %330, %332 : vector<8x32xf32>
    %334 = vector.extract_strided_slice %205 {offsets = [48, 0], sizes = [8, 96], strides = [1, 1]} : vector<64x96xf32> to vector<8x96xf32>
    %cst_60 = arith.constant dense<0.000000e+00> : vector<8x96xf32>
    %335 = tpu.matmul %333, %198, %cst_60 {dimension_numbers = #tpu.dot_dimension_numbers<[1], [0], [0], [1], [0, 0, 1, 1], [], []>} : vector<8x32xf32>, vector<32x96xf32>, vector<8x96xf32> -> vector<8x96xf32>
    %336 = vector.extract_strided_slice %334 {offsets = [0, 0], sizes = [8, 64], strides = [1, 1]} : vector<8x96xf32> to vector<8x64xf32>
    %337 = vector.extract_strided_slice %335 {offsets = [0, 0], sizes = [8, 64], strides = [1, 1]} : vector<8x96xf32> to vector<8x64xf32>
    %338 = arith.addf %336, %337 : vector<8x64xf32>
    %339 = arith.negf %338 : vector<8x64xf32>
    %340 = math.exp %339 : vector<8x64xf32>
    %cst_61 = arith.constant 1.000000e+00 : f32
    %341 = vector.broadcast %cst_61 : f32 to vector<8x64xf32>
    %342 = arith.addf %341, %340 : vector<8x64xf32>
    %343 = arith.divf %341, %342 : vector<8x64xf32>
    %344 = vector.extract_strided_slice %343 {offsets = [0, 0], sizes = [8, 32], strides = [1, 1]} : vector<8x64xf32> to vector<8x32xf32>
    %345 = vector.extract_strided_slice %343 {offsets = [0, 32], sizes = [8, 32], strides = [1, 1]} : vector<8x64xf32> to vector<8x32xf32>
    %346 = vector.extract_strided_slice %334 {offsets = [0, 64], sizes = [8, 32], strides = [1, 1]} : vector<8x96xf32> to vector<8x32xf32>
    %347 = vector.extract_strided_slice %335 {offsets = [0, 64], sizes = [8, 32], strides = [1, 1]} : vector<8x96xf32> to vector<8x32xf32>
    %348 = arith.addf %347, %207 : vector<8x32xf32>
    %349 = arith.mulf %344, %348 : vector<8x32xf32>
    %350 = arith.addf %346, %349 : vector<8x32xf32>
    %351 = math.tanh %350 : vector<8x32xf32>
    %352 = arith.subf %333, %351 : vector<8x32xf32>
    %353 = arith.mulf %345, %352 : vector<8x32xf32>
    %354 = arith.addf %351, %353 : vector<8x32xf32>
    %355 = vector.extract_strided_slice %205 {offsets = [56, 0], sizes = [8, 96], strides = [1, 1]} : vector<64x96xf32> to vector<8x96xf32>
    %cst_62 = arith.constant dense<0.000000e+00> : vector<8x96xf32>
    %356 = tpu.matmul %354, %198, %cst_62 {dimension_numbers = #tpu.dot_dimension_numbers<[1], [0], [0], [1], [0, 0, 1, 1], [], []>} : vector<8x32xf32>, vector<32x96xf32>, vector<8x96xf32> -> vector<8x96xf32>
    %357 = vector.extract_strided_slice %355 {offsets = [0, 0], sizes = [8, 64], strides = [1, 1]} : vector<8x96xf32> to vector<8x64xf32>
    %358 = vector.extract_strided_slice %356 {offsets = [0, 0], sizes = [8, 64], strides = [1, 1]} : vector<8x96xf32> to vector<8x64xf32>
    %359 = arith.addf %357, %358 : vector<8x64xf32>
    %360 = arith.negf %359 : vector<8x64xf32>
    %361 = math.exp %360 : vector<8x64xf32>
    %cst_63 = arith.constant 1.000000e+00 : f32
    %362 = vector.broadcast %cst_63 : f32 to vector<8x64xf32>
    %363 = arith.addf %362, %361 : vector<8x64xf32>
    %364 = arith.divf %362, %363 : vector<8x64xf32>
    %365 = vector.extract_strided_slice %364 {offsets = [0, 0], sizes = [8, 32], strides = [1, 1]} : vector<8x64xf32> to vector<8x32xf32>
    %366 = vector.extract_strided_slice %364 {offsets = [0, 32], sizes = [8, 32], strides = [1, 1]} : vector<8x64xf32> to vector<8x32xf32>
    %367 = vector.extract_strided_slice %355 {offsets = [0, 64], sizes = [8, 32], strides = [1, 1]} : vector<8x96xf32> to vector<8x32xf32>
    %368 = vector.extract_strided_slice %356 {offsets = [0, 64], sizes = [8, 32], strides = [1, 1]} : vector<8x96xf32> to vector<8x32xf32>
    %369 = arith.addf %368, %207 : vector<8x32xf32>
    %370 = arith.mulf %365, %369 : vector<8x32xf32>
    %371 = arith.addf %367, %370 : vector<8x32xf32>
    %372 = math.tanh %371 : vector<8x32xf32>
    %373 = arith.subf %354, %372 : vector<8x32xf32>
    %374 = arith.mulf %366, %373 : vector<8x32xf32>
    %375 = arith.addf %372, %374 : vector<8x32xf32>
    %376 = arith.addf %375, %182 : vector<8x32xf32>
    %c1_64 = arith.constant 1 : index
    %c0_65 = arith.constant 0 : index
    %c0_66 = arith.constant 0 : index
    %377 = vector.load %arg3[%c1_64, %c0_65, %c0_66] : memref<4x32x32xf32, #tpu.memory_space<vmem>>, vector<1x32x32xf32>
    %378 = vector.shape_cast %377 : vector<1x32x32xf32> to vector<32x32xf32>
    %c1_67 = arith.constant 1 : index
    %c0_68 = arith.constant 0 : index
    %379 = vector.load %arg4[%c1_67, %c0_68] : memref<4x32xf32, #tpu.memory_space<vmem>>, vector<1x32xf32>
    %cst_69 = arith.constant dense<0.000000e+00> : vector<8x32xf32>
    %380 = tpu.matmul %376, %378, %cst_69 {dimension_numbers = #tpu.dot_dimension_numbers<[1], [0], [0], [1], [0, 0, 1, 1], [], []>} : vector<8x32xf32>, vector<32x32xf32>, vector<8x32xf32> -> vector<8x32xf32>
    %381 = vector.broadcast %379 : vector<1x32xf32> to vector<8x32xf32>
    %382 = arith.addf %380, %381 : vector<8x32xf32>
    %cst_70 = arith.constant 0.000000e+00 : f32
    %383 = vector.broadcast %cst_70 : f32 to vector<8x32xf32>
    %384 = arith.cmpf oge, %382, %383 : vector<8x32xf32>
    %cst_71 = arith.constant 2.000000e-01 : f32
    %385 = vector.broadcast %cst_71 : f32 to vector<8x32xf32>
    %386 = arith.mulf %385, %382 : vector<8x32xf32>
    %387 = arith.select %384, %382, %386 : vector<8x32xi1>, vector<8x32xf32>
    %c2 = arith.constant 2 : index
    %c0_72 = arith.constant 0 : index
    %c0_73 = arith.constant 0 : index
    %388 = vector.load %arg1[%c2, %c0_72, %c0_73] : memref<4x64x96xf32, #tpu.memory_space<vmem>>, vector<1x32x96xf32>
    %389 = vector.shape_cast %388 : vector<1x32x96xf32> to vector<32x96xf32>
    %c2_74 = arith.constant 2 : index
    %c32_75 = arith.constant 32 : index
    %c0_76 = arith.constant 0 : index
    %390 = vector.load %arg1[%c2_74, %c32_75, %c0_76] : memref<4x64x96xf32, #tpu.memory_space<vmem>>, vector<1x32x96xf32>
    %391 = vector.shape_cast %390 : vector<1x32x96xf32> to vector<32x96xf32>
    %c2_77 = arith.constant 2 : index
    %c0_78 = arith.constant 0 : index
    %c0_79 = arith.constant 0 : index
    %392 = vector.load %arg2[%c2_77, %c0_78, %c0_79] : memref<4x2x96xf32, #tpu.memory_space<vmem>>, vector<1x1x96xf32>
    %393 = vector.shape_cast %392 : vector<1x1x96xf32> to vector<1x96xf32>
    %c2_80 = arith.constant 2 : index
    %c1_81 = arith.constant 1 : index
    %c0_82 = arith.constant 0 : index
    %394 = vector.load %arg2[%c2_80, %c1_81, %c0_82] : memref<4x2x96xf32, #tpu.memory_space<vmem>>, vector<1x1x32xf32>
    %395 = vector.shape_cast %394 : vector<1x1x32xf32> to vector<1x32xf32>
    %cst_83 = arith.constant dense<0.000000e+00> : vector<8x96xf32>
    %396 = tpu.matmul %376, %389, %cst_83 {dimension_numbers = #tpu.dot_dimension_numbers<[1], [0], [0], [1], [0, 0, 1, 1], [], []>} : vector<8x32xf32>, vector<32x96xf32>, vector<8x96xf32> -> vector<8x96xf32>
    %397 = vector.broadcast %393 : vector<1x96xf32> to vector<8x96xf32>
    %398 = arith.addf %396, %397 : vector<8x96xf32>
    %399 = vector.shape_cast %395 : vector<1x32xf32> to vector<1x32xf32>
    %400 = vector.broadcast %399 : vector<1x32xf32> to vector<8x32xf32>
    %cst_84 = arith.constant dense<0.000000e+00> : vector<8x96xf32>
    %401 = tpu.matmul %387, %391, %cst_84 {dimension_numbers = #tpu.dot_dimension_numbers<[1], [0], [0], [1], [0, 0, 1, 1], [], []>} : vector<8x32xf32>, vector<32x96xf32>, vector<8x96xf32> -> vector<8x96xf32>
    %402 = vector.extract_strided_slice %398 {offsets = [0, 0], sizes = [8, 64], strides = [1, 1]} : vector<8x96xf32> to vector<8x64xf32>
    %403 = vector.extract_strided_slice %401 {offsets = [0, 0], sizes = [8, 64], strides = [1, 1]} : vector<8x96xf32> to vector<8x64xf32>
    %404 = arith.addf %402, %403 : vector<8x64xf32>
    %405 = arith.negf %404 : vector<8x64xf32>
    %406 = math.exp %405 : vector<8x64xf32>
    %cst_85 = arith.constant 1.000000e+00 : f32
    %407 = vector.broadcast %cst_85 : f32 to vector<8x64xf32>
    %408 = arith.addf %407, %406 : vector<8x64xf32>
    %409 = arith.divf %407, %408 : vector<8x64xf32>
    %410 = vector.extract_strided_slice %409 {offsets = [0, 0], sizes = [8, 32], strides = [1, 1]} : vector<8x64xf32> to vector<8x32xf32>
    %411 = vector.extract_strided_slice %409 {offsets = [0, 32], sizes = [8, 32], strides = [1, 1]} : vector<8x64xf32> to vector<8x32xf32>
    %412 = vector.extract_strided_slice %398 {offsets = [0, 64], sizes = [8, 32], strides = [1, 1]} : vector<8x96xf32> to vector<8x32xf32>
    %413 = vector.extract_strided_slice %401 {offsets = [0, 64], sizes = [8, 32], strides = [1, 1]} : vector<8x96xf32> to vector<8x32xf32>
    %414 = arith.addf %413, %400 : vector<8x32xf32>
    %415 = arith.mulf %410, %414 : vector<8x32xf32>
    %416 = arith.addf %412, %415 : vector<8x32xf32>
    %417 = math.tanh %416 : vector<8x32xf32>
    %418 = arith.subf %387, %417 : vector<8x32xf32>
    %419 = arith.mulf %411, %418 : vector<8x32xf32>
    %420 = arith.addf %417, %419 : vector<8x32xf32>
    %cst_86 = arith.constant dense<0.000000e+00> : vector<8x96xf32>
    %421 = tpu.matmul %420, %391, %cst_86 {dimension_numbers = #tpu.dot_dimension_numbers<[1], [0], [0], [1], [0, 0, 1, 1], [], []>} : vector<8x32xf32>, vector<32x96xf32>, vector<8x96xf32> -> vector<8x96xf32>
    %422 = vector.extract_strided_slice %398 {offsets = [0, 0], sizes = [8, 64], strides = [1, 1]} : vector<8x96xf32> to vector<8x64xf32>
    %423 = vector.extract_strided_slice %421 {offsets = [0, 0], sizes = [8, 64], strides = [1, 1]} : vector<8x96xf32> to vector<8x64xf32>
    %424 = arith.addf %422, %423 : vector<8x64xf32>
    %425 = arith.negf %424 : vector<8x64xf32>
    %426 = math.exp %425 : vector<8x64xf32>
    %cst_87 = arith.constant 1.000000e+00 : f32
    %427 = vector.broadcast %cst_87 : f32 to vector<8x64xf32>
    %428 = arith.addf %427, %426 : vector<8x64xf32>
    %429 = arith.divf %427, %428 : vector<8x64xf32>
    %430 = vector.extract_strided_slice %429 {offsets = [0, 0], sizes = [8, 32], strides = [1, 1]} : vector<8x64xf32> to vector<8x32xf32>
    %431 = vector.extract_strided_slice %429 {offsets = [0, 32], sizes = [8, 32], strides = [1, 1]} : vector<8x64xf32> to vector<8x32xf32>
    %432 = vector.extract_strided_slice %398 {offsets = [0, 64], sizes = [8, 32], strides = [1, 1]} : vector<8x96xf32> to vector<8x32xf32>
    %433 = vector.extract_strided_slice %421 {offsets = [0, 64], sizes = [8, 32], strides = [1, 1]} : vector<8x96xf32> to vector<8x32xf32>
    %434 = arith.addf %433, %400 : vector<8x32xf32>
    %435 = arith.mulf %430, %434 : vector<8x32xf32>
    %436 = arith.addf %432, %435 : vector<8x32xf32>
    %437 = math.tanh %436 : vector<8x32xf32>
    %438 = arith.subf %420, %437 : vector<8x32xf32>
    %439 = arith.mulf %431, %438 : vector<8x32xf32>
    %440 = arith.addf %437, %439 : vector<8x32xf32>
    %cst_88 = arith.constant dense<0.000000e+00> : vector<8x96xf32>
    %441 = tpu.matmul %440, %391, %cst_88 {dimension_numbers = #tpu.dot_dimension_numbers<[1], [0], [0], [1], [0, 0, 1, 1], [], []>} : vector<8x32xf32>, vector<32x96xf32>, vector<8x96xf32> -> vector<8x96xf32>
    %442 = vector.extract_strided_slice %398 {offsets = [0, 0], sizes = [8, 64], strides = [1, 1]} : vector<8x96xf32> to vector<8x64xf32>
    %443 = vector.extract_strided_slice %441 {offsets = [0, 0], sizes = [8, 64], strides = [1, 1]} : vector<8x96xf32> to vector<8x64xf32>
    %444 = arith.addf %442, %443 : vector<8x64xf32>
    %445 = arith.negf %444 : vector<8x64xf32>
    %446 = math.exp %445 : vector<8x64xf32>
    %cst_89 = arith.constant 1.000000e+00 : f32
    %447 = vector.broadcast %cst_89 : f32 to vector<8x64xf32>
    %448 = arith.addf %447, %446 : vector<8x64xf32>
    %449 = arith.divf %447, %448 : vector<8x64xf32>
    %450 = vector.extract_strided_slice %449 {offsets = [0, 0], sizes = [8, 32], strides = [1, 1]} : vector<8x64xf32> to vector<8x32xf32>
    %451 = vector.extract_strided_slice %449 {offsets = [0, 32], sizes = [8, 32], strides = [1, 1]} : vector<8x64xf32> to vector<8x32xf32>
    %452 = vector.extract_strided_slice %398 {offsets = [0, 64], sizes = [8, 32], strides = [1, 1]} : vector<8x96xf32> to vector<8x32xf32>
    %453 = vector.extract_strided_slice %441 {offsets = [0, 64], sizes = [8, 32], strides = [1, 1]} : vector<8x96xf32> to vector<8x32xf32>
    %454 = arith.addf %453, %400 : vector<8x32xf32>
    %455 = arith.mulf %450, %454 : vector<8x32xf32>
    %456 = arith.addf %452, %455 : vector<8x32xf32>
    %457 = math.tanh %456 : vector<8x32xf32>
    %458 = arith.subf %440, %457 : vector<8x32xf32>
    %459 = arith.mulf %451, %458 : vector<8x32xf32>
    %460 = arith.addf %457, %459 : vector<8x32xf32>
    %cst_90 = arith.constant dense<0.000000e+00> : vector<8x96xf32>
    %461 = tpu.matmul %460, %391, %cst_90 {dimension_numbers = #tpu.dot_dimension_numbers<[1], [0], [0], [1], [0, 0, 1, 1], [], []>} : vector<8x32xf32>, vector<32x96xf32>, vector<8x96xf32> -> vector<8x96xf32>
    %462 = vector.extract_strided_slice %398 {offsets = [0, 0], sizes = [8, 64], strides = [1, 1]} : vector<8x96xf32> to vector<8x64xf32>
    %463 = vector.extract_strided_slice %461 {offsets = [0, 0], sizes = [8, 64], strides = [1, 1]} : vector<8x96xf32> to vector<8x64xf32>
    %464 = arith.addf %462, %463 : vector<8x64xf32>
    %465 = arith.negf %464 : vector<8x64xf32>
    %466 = math.exp %465 : vector<8x64xf32>
    %cst_91 = arith.constant 1.000000e+00 : f32
    %467 = vector.broadcast %cst_91 : f32 to vector<8x64xf32>
    %468 = arith.addf %467, %466 : vector<8x64xf32>
    %469 = arith.divf %467, %468 : vector<8x64xf32>
    %470 = vector.extract_strided_slice %469 {offsets = [0, 0], sizes = [8, 32], strides = [1, 1]} : vector<8x64xf32> to vector<8x32xf32>
    %471 = vector.extract_strided_slice %469 {offsets = [0, 32], sizes = [8, 32], strides = [1, 1]} : vector<8x64xf32> to vector<8x32xf32>
    %472 = vector.extract_strided_slice %398 {offsets = [0, 64], sizes = [8, 32], strides = [1, 1]} : vector<8x96xf32> to vector<8x32xf32>
    %473 = vector.extract_strided_slice %461 {offsets = [0, 64], sizes = [8, 32], strides = [1, 1]} : vector<8x96xf32> to vector<8x32xf32>
    %474 = arith.addf %473, %400 : vector<8x32xf32>
    %475 = arith.mulf %470, %474 : vector<8x32xf32>
    %476 = arith.addf %472, %475 : vector<8x32xf32>
    %477 = math.tanh %476 : vector<8x32xf32>
    %478 = arith.subf %460, %477 : vector<8x32xf32>
    %479 = arith.mulf %471, %478 : vector<8x32xf32>
    %480 = arith.addf %477, %479 : vector<8x32xf32>
    %cst_92 = arith.constant dense<0.000000e+00> : vector<8x96xf32>
    %481 = tpu.matmul %480, %391, %cst_92 {dimension_numbers = #tpu.dot_dimension_numbers<[1], [0], [0], [1], [0, 0, 1, 1], [], []>} : vector<8x32xf32>, vector<32x96xf32>, vector<8x96xf32> -> vector<8x96xf32>
    %482 = vector.extract_strided_slice %398 {offsets = [0, 0], sizes = [8, 64], strides = [1, 1]} : vector<8x96xf32> to vector<8x64xf32>
    %483 = vector.extract_strided_slice %481 {offsets = [0, 0], sizes = [8, 64], strides = [1, 1]} : vector<8x96xf32> to vector<8x64xf32>
    %484 = arith.addf %482, %483 : vector<8x64xf32>
    %485 = arith.negf %484 : vector<8x64xf32>
    %486 = math.exp %485 : vector<8x64xf32>
    %cst_93 = arith.constant 1.000000e+00 : f32
    %487 = vector.broadcast %cst_93 : f32 to vector<8x64xf32>
    %488 = arith.addf %487, %486 : vector<8x64xf32>
    %489 = arith.divf %487, %488 : vector<8x64xf32>
    %490 = vector.extract_strided_slice %489 {offsets = [0, 0], sizes = [8, 32], strides = [1, 1]} : vector<8x64xf32> to vector<8x32xf32>
    %491 = vector.extract_strided_slice %489 {offsets = [0, 32], sizes = [8, 32], strides = [1, 1]} : vector<8x64xf32> to vector<8x32xf32>
    %492 = vector.extract_strided_slice %398 {offsets = [0, 64], sizes = [8, 32], strides = [1, 1]} : vector<8x96xf32> to vector<8x32xf32>
    %493 = vector.extract_strided_slice %481 {offsets = [0, 64], sizes = [8, 32], strides = [1, 1]} : vector<8x96xf32> to vector<8x32xf32>
    %494 = arith.addf %493, %400 : vector<8x32xf32>
    %495 = arith.mulf %490, %494 : vector<8x32xf32>
    %496 = arith.addf %492, %495 : vector<8x32xf32>
    %497 = math.tanh %496 : vector<8x32xf32>
    %498 = arith.subf %480, %497 : vector<8x32xf32>
    %499 = arith.mulf %491, %498 : vector<8x32xf32>
    %500 = arith.addf %497, %499 : vector<8x32xf32>
    %cst_94 = arith.constant dense<0.000000e+00> : vector<8x96xf32>
    %501 = tpu.matmul %500, %391, %cst_94 {dimension_numbers = #tpu.dot_dimension_numbers<[1], [0], [0], [1], [0, 0, 1, 1], [], []>} : vector<8x32xf32>, vector<32x96xf32>, vector<8x96xf32> -> vector<8x96xf32>
    %502 = vector.extract_strided_slice %398 {offsets = [0, 0], sizes = [8, 64], strides = [1, 1]} : vector<8x96xf32> to vector<8x64xf32>
    %503 = vector.extract_strided_slice %501 {offsets = [0, 0], sizes = [8, 64], strides = [1, 1]} : vector<8x96xf32> to vector<8x64xf32>
    %504 = arith.addf %502, %503 : vector<8x64xf32>
    %505 = arith.negf %504 : vector<8x64xf32>
    %506 = math.exp %505 : vector<8x64xf32>
    %cst_95 = arith.constant 1.000000e+00 : f32
    %507 = vector.broadcast %cst_95 : f32 to vector<8x64xf32>
    %508 = arith.addf %507, %506 : vector<8x64xf32>
    %509 = arith.divf %507, %508 : vector<8x64xf32>
    %510 = vector.extract_strided_slice %509 {offsets = [0, 0], sizes = [8, 32], strides = [1, 1]} : vector<8x64xf32> to vector<8x32xf32>
    %511 = vector.extract_strided_slice %509 {offsets = [0, 32], sizes = [8, 32], strides = [1, 1]} : vector<8x64xf32> to vector<8x32xf32>
    %512 = vector.extract_strided_slice %398 {offsets = [0, 64], sizes = [8, 32], strides = [1, 1]} : vector<8x96xf32> to vector<8x32xf32>
    %513 = vector.extract_strided_slice %501 {offsets = [0, 64], sizes = [8, 32], strides = [1, 1]} : vector<8x96xf32> to vector<8x32xf32>
    %514 = arith.addf %513, %400 : vector<8x32xf32>
    %515 = arith.mulf %510, %514 : vector<8x32xf32>
    %516 = arith.addf %512, %515 : vector<8x32xf32>
    %517 = math.tanh %516 : vector<8x32xf32>
    %518 = arith.subf %500, %517 : vector<8x32xf32>
    %519 = arith.mulf %511, %518 : vector<8x32xf32>
    %520 = arith.addf %517, %519 : vector<8x32xf32>
    %cst_96 = arith.constant dense<0.000000e+00> : vector<8x96xf32>
    %521 = tpu.matmul %520, %391, %cst_96 {dimension_numbers = #tpu.dot_dimension_numbers<[1], [0], [0], [1], [0, 0, 1, 1], [], []>} : vector<8x32xf32>, vector<32x96xf32>, vector<8x96xf32> -> vector<8x96xf32>
    %522 = vector.extract_strided_slice %398 {offsets = [0, 0], sizes = [8, 64], strides = [1, 1]} : vector<8x96xf32> to vector<8x64xf32>
    %523 = vector.extract_strided_slice %521 {offsets = [0, 0], sizes = [8, 64], strides = [1, 1]} : vector<8x96xf32> to vector<8x64xf32>
    %524 = arith.addf %522, %523 : vector<8x64xf32>
    %525 = arith.negf %524 : vector<8x64xf32>
    %526 = math.exp %525 : vector<8x64xf32>
    %cst_97 = arith.constant 1.000000e+00 : f32
    %527 = vector.broadcast %cst_97 : f32 to vector<8x64xf32>
    %528 = arith.addf %527, %526 : vector<8x64xf32>
    %529 = arith.divf %527, %528 : vector<8x64xf32>
    %530 = vector.extract_strided_slice %529 {offsets = [0, 0], sizes = [8, 32], strides = [1, 1]} : vector<8x64xf32> to vector<8x32xf32>
    %531 = vector.extract_strided_slice %529 {offsets = [0, 32], sizes = [8, 32], strides = [1, 1]} : vector<8x64xf32> to vector<8x32xf32>
    %532 = vector.extract_strided_slice %398 {offsets = [0, 64], sizes = [8, 32], strides = [1, 1]} : vector<8x96xf32> to vector<8x32xf32>
    %533 = vector.extract_strided_slice %521 {offsets = [0, 64], sizes = [8, 32], strides = [1, 1]} : vector<8x96xf32> to vector<8x32xf32>
    %534 = arith.addf %533, %400 : vector<8x32xf32>
    %535 = arith.mulf %530, %534 : vector<8x32xf32>
    %536 = arith.addf %532, %535 : vector<8x32xf32>
    %537 = math.tanh %536 : vector<8x32xf32>
    %538 = arith.subf %520, %537 : vector<8x32xf32>
    %539 = arith.mulf %531, %538 : vector<8x32xf32>
    %540 = arith.addf %537, %539 : vector<8x32xf32>
    %cst_98 = arith.constant dense<0.000000e+00> : vector<8x96xf32>
    %541 = tpu.matmul %540, %391, %cst_98 {dimension_numbers = #tpu.dot_dimension_numbers<[1], [0], [0], [1], [0, 0, 1, 1], [], []>} : vector<8x32xf32>, vector<32x96xf32>, vector<8x96xf32> -> vector<8x96xf32>
    %542 = vector.extract_strided_slice %398 {offsets = [0, 0], sizes = [8, 64], strides = [1, 1]} : vector<8x96xf32> to vector<8x64xf32>
    %543 = vector.extract_strided_slice %541 {offsets = [0, 0], sizes = [8, 64], strides = [1, 1]} : vector<8x96xf32> to vector<8x64xf32>
    %544 = arith.addf %542, %543 : vector<8x64xf32>
    %545 = arith.negf %544 : vector<8x64xf32>
    %546 = math.exp %545 : vector<8x64xf32>
    %cst_99 = arith.constant 1.000000e+00 : f32
    %547 = vector.broadcast %cst_99 : f32 to vector<8x64xf32>
    %548 = arith.addf %547, %546 : vector<8x64xf32>
    %549 = arith.divf %547, %548 : vector<8x64xf32>
    %550 = vector.extract_strided_slice %549 {offsets = [0, 0], sizes = [8, 32], strides = [1, 1]} : vector<8x64xf32> to vector<8x32xf32>
    %551 = vector.extract_strided_slice %549 {offsets = [0, 32], sizes = [8, 32], strides = [1, 1]} : vector<8x64xf32> to vector<8x32xf32>
    %552 = vector.extract_strided_slice %398 {offsets = [0, 64], sizes = [8, 32], strides = [1, 1]} : vector<8x96xf32> to vector<8x32xf32>
    %553 = vector.extract_strided_slice %541 {offsets = [0, 64], sizes = [8, 32], strides = [1, 1]} : vector<8x96xf32> to vector<8x32xf32>
    %554 = arith.addf %553, %400 : vector<8x32xf32>
    %555 = arith.mulf %550, %554 : vector<8x32xf32>
    %556 = arith.addf %552, %555 : vector<8x32xf32>
    %557 = math.tanh %556 : vector<8x32xf32>
    %558 = arith.subf %540, %557 : vector<8x32xf32>
    %559 = arith.mulf %551, %558 : vector<8x32xf32>
    %560 = arith.addf %557, %559 : vector<8x32xf32>
    %c2_100 = arith.constant 2 : index
    %c0_101 = arith.constant 0 : index
    %c0_102 = arith.constant 0 : index
    %561 = vector.load %arg3[%c2_100, %c0_101, %c0_102] : memref<4x32x32xf32, #tpu.memory_space<vmem>>, vector<1x32x16xf32>
    %562 = vector.shape_cast %561 : vector<1x32x16xf32> to vector<32x16xf32>
    %c2_103 = arith.constant 2 : index
    %c0_104 = arith.constant 0 : index
    %563 = vector.load %arg4[%c2_103, %c0_104] : memref<4x32xf32, #tpu.memory_space<vmem>>, vector<1x16xf32>
    %cst_105 = arith.constant dense<0.000000e+00> : vector<8x16xf32>
    %564 = tpu.matmul %560, %562, %cst_105 {dimension_numbers = #tpu.dot_dimension_numbers<[1], [0], [0], [1], [0, 0, 1, 1], [], []>} : vector<8x32xf32>, vector<32x16xf32>, vector<8x16xf32> -> vector<8x16xf32>
    %565 = vector.broadcast %563 : vector<1x16xf32> to vector<8x16xf32>
    %566 = arith.addf %564, %565 : vector<8x16xf32>
    %cst_106 = arith.constant 0.000000e+00 : f32
    %567 = vector.broadcast %cst_106 : f32 to vector<8x16xf32>
    %568 = arith.cmpf oge, %566, %567 : vector<8x16xf32>
    %cst_107 = arith.constant 2.000000e-01 : f32
    %569 = vector.broadcast %cst_107 : f32 to vector<8x16xf32>
    %570 = arith.mulf %569, %566 : vector<8x16xf32>
    %571 = arith.select %568, %566, %570 : vector<8x16xi1>, vector<8x16xf32>
    %572 = tpu.concatenate %420, %440, %460, %480, %500, %520, %540, %560 in 0 : vector<8x32xf32>, vector<8x32xf32>, vector<8x32xf32>, vector<8x32xf32>, vector<8x32xf32>, vector<8x32xf32>, vector<8x32xf32>, vector<8x32xf32> -> vector<64x32xf32>
    %c3 = arith.constant 3 : index
    %c0_108 = arith.constant 0 : index
    %c0_109 = arith.constant 0 : index
    %573 = vector.load %arg1[%c3, %c0_108, %c0_109] : memref<4x64x96xf32, #tpu.memory_space<vmem>>, vector<1x32x48xf32>
    %574 = vector.shape_cast %573 : vector<1x32x48xf32> to vector<32x48xf32>
    %c3_110 = arith.constant 3 : index
    %c32_111 = arith.constant 32 : index
    %c0_112 = arith.constant 0 : index
    %575 = vector.load %arg1[%c3_110, %c32_111, %c0_112] : memref<4x64x96xf32, #tpu.memory_space<vmem>>, vector<1x16x48xf32>
    %576 = vector.shape_cast %575 : vector<1x16x48xf32> to vector<16x48xf32>
    %c3_113 = arith.constant 3 : index
    %c0_114 = arith.constant 0 : index
    %c0_115 = arith.constant 0 : index
    %577 = vector.load %arg2[%c3_113, %c0_114, %c0_115] : memref<4x2x96xf32, #tpu.memory_space<vmem>>, vector<1x1x48xf32>
    %578 = vector.shape_cast %577 : vector<1x1x48xf32> to vector<1x48xf32>
    %c3_116 = arith.constant 3 : index
    %c1_117 = arith.constant 1 : index
    %c0_118 = arith.constant 0 : index
    %579 = vector.load %arg2[%c3_116, %c1_117, %c0_118] : memref<4x2x96xf32, #tpu.memory_space<vmem>>, vector<1x1x16xf32>
    %580 = vector.shape_cast %579 : vector<1x1x16xf32> to vector<1x16xf32>
    %cst_119 = arith.constant dense<0.000000e+00> : vector<64x48xf32>
    %581 = tpu.matmul %572, %574, %cst_119 {dimension_numbers = #tpu.dot_dimension_numbers<[1], [0], [0], [1], [0, 0, 1, 1], [], []>} : vector<64x32xf32>, vector<32x48xf32>, vector<64x48xf32> -> vector<64x48xf32>
    %582 = vector.broadcast %578 : vector<1x48xf32> to vector<64x48xf32>
    %583 = arith.addf %581, %582 : vector<64x48xf32>
    %584 = vector.shape_cast %580 : vector<1x16xf32> to vector<1x16xf32>
    %585 = vector.broadcast %584 : vector<1x16xf32> to vector<8x16xf32>
    %586 = vector.extract_strided_slice %583 {offsets = [0, 0], sizes = [8, 48], strides = [1, 1]} : vector<64x48xf32> to vector<8x48xf32>
    %cst_120 = arith.constant dense<0.000000e+00> : vector<8x48xf32>
    %587 = tpu.matmul %571, %576, %cst_120 {dimension_numbers = #tpu.dot_dimension_numbers<[1], [0], [0], [1], [0, 0, 1, 1], [], []>} : vector<8x16xf32>, vector<16x48xf32>, vector<8x48xf32> -> vector<8x48xf32>
    %588 = vector.extract_strided_slice %586 {offsets = [0, 0], sizes = [8, 32], strides = [1, 1]} : vector<8x48xf32> to vector<8x32xf32>
    %589 = vector.extract_strided_slice %587 {offsets = [0, 0], sizes = [8, 32], strides = [1, 1]} : vector<8x48xf32> to vector<8x32xf32>
    %590 = arith.addf %588, %589 : vector<8x32xf32>
    %591 = arith.negf %590 : vector<8x32xf32>
    %592 = math.exp %591 : vector<8x32xf32>
    %cst_121 = arith.constant 1.000000e+00 : f32
    %593 = vector.broadcast %cst_121 : f32 to vector<8x32xf32>
    %594 = arith.addf %593, %592 : vector<8x32xf32>
    %595 = arith.divf %593, %594 : vector<8x32xf32>
    %596 = vector.extract_strided_slice %595 {offsets = [0, 0], sizes = [8, 16], strides = [1, 1]} : vector<8x32xf32> to vector<8x16xf32>
    %597 = vector.extract_strided_slice %595 {offsets = [0, 16], sizes = [8, 16], strides = [1, 1]} : vector<8x32xf32> to vector<8x16xf32>
    %598 = vector.extract_strided_slice %586 {offsets = [0, 32], sizes = [8, 16], strides = [1, 1]} : vector<8x48xf32> to vector<8x16xf32>
    %599 = vector.extract_strided_slice %587 {offsets = [0, 32], sizes = [8, 16], strides = [1, 1]} : vector<8x48xf32> to vector<8x16xf32>
    %600 = arith.addf %599, %585 : vector<8x16xf32>
    %601 = arith.mulf %596, %600 : vector<8x16xf32>
    %602 = arith.addf %598, %601 : vector<8x16xf32>
    %603 = math.tanh %602 : vector<8x16xf32>
    %604 = arith.subf %571, %603 : vector<8x16xf32>
    %605 = arith.mulf %597, %604 : vector<8x16xf32>
    %606 = arith.addf %603, %605 : vector<8x16xf32>
    %607 = vector.extract_strided_slice %583 {offsets = [8, 0], sizes = [8, 48], strides = [1, 1]} : vector<64x48xf32> to vector<8x48xf32>
    %cst_122 = arith.constant dense<0.000000e+00> : vector<8x48xf32>
    %608 = tpu.matmul %606, %576, %cst_122 {dimension_numbers = #tpu.dot_dimension_numbers<[1], [0], [0], [1], [0, 0, 1, 1], [], []>} : vector<8x16xf32>, vector<16x48xf32>, vector<8x48xf32> -> vector<8x48xf32>
    %609 = vector.extract_strided_slice %607 {offsets = [0, 0], sizes = [8, 32], strides = [1, 1]} : vector<8x48xf32> to vector<8x32xf32>
    %610 = vector.extract_strided_slice %608 {offsets = [0, 0], sizes = [8, 32], strides = [1, 1]} : vector<8x48xf32> to vector<8x32xf32>
    %611 = arith.addf %609, %610 : vector<8x32xf32>
    %612 = arith.negf %611 : vector<8x32xf32>
    %613 = math.exp %612 : vector<8x32xf32>
    %cst_123 = arith.constant 1.000000e+00 : f32
    %614 = vector.broadcast %cst_123 : f32 to vector<8x32xf32>
    %615 = arith.addf %614, %613 : vector<8x32xf32>
    %616 = arith.divf %614, %615 : vector<8x32xf32>
    %617 = vector.extract_strided_slice %616 {offsets = [0, 0], sizes = [8, 16], strides = [1, 1]} : vector<8x32xf32> to vector<8x16xf32>
    %618 = vector.extract_strided_slice %616 {offsets = [0, 16], sizes = [8, 16], strides = [1, 1]} : vector<8x32xf32> to vector<8x16xf32>
    %619 = vector.extract_strided_slice %607 {offsets = [0, 32], sizes = [8, 16], strides = [1, 1]} : vector<8x48xf32> to vector<8x16xf32>
    %620 = vector.extract_strided_slice %608 {offsets = [0, 32], sizes = [8, 16], strides = [1, 1]} : vector<8x48xf32> to vector<8x16xf32>
    %621 = arith.addf %620, %585 : vector<8x16xf32>
    %622 = arith.mulf %617, %621 : vector<8x16xf32>
    %623 = arith.addf %619, %622 : vector<8x16xf32>
    %624 = math.tanh %623 : vector<8x16xf32>
    %625 = arith.subf %606, %624 : vector<8x16xf32>
    %626 = arith.mulf %618, %625 : vector<8x16xf32>
    %627 = arith.addf %624, %626 : vector<8x16xf32>
    %628 = vector.extract_strided_slice %583 {offsets = [16, 0], sizes = [8, 48], strides = [1, 1]} : vector<64x48xf32> to vector<8x48xf32>
    %cst_124 = arith.constant dense<0.000000e+00> : vector<8x48xf32>
    %629 = tpu.matmul %627, %576, %cst_124 {dimension_numbers = #tpu.dot_dimension_numbers<[1], [0], [0], [1], [0, 0, 1, 1], [], []>} : vector<8x16xf32>, vector<16x48xf32>, vector<8x48xf32> -> vector<8x48xf32>
    %630 = vector.extract_strided_slice %628 {offsets = [0, 0], sizes = [8, 32], strides = [1, 1]} : vector<8x48xf32> to vector<8x32xf32>
    %631 = vector.extract_strided_slice %629 {offsets = [0, 0], sizes = [8, 32], strides = [1, 1]} : vector<8x48xf32> to vector<8x32xf32>
    %632 = arith.addf %630, %631 : vector<8x32xf32>
    %633 = arith.negf %632 : vector<8x32xf32>
    %634 = math.exp %633 : vector<8x32xf32>
    %cst_125 = arith.constant 1.000000e+00 : f32
    %635 = vector.broadcast %cst_125 : f32 to vector<8x32xf32>
    %636 = arith.addf %635, %634 : vector<8x32xf32>
    %637 = arith.divf %635, %636 : vector<8x32xf32>
    %638 = vector.extract_strided_slice %637 {offsets = [0, 0], sizes = [8, 16], strides = [1, 1]} : vector<8x32xf32> to vector<8x16xf32>
    %639 = vector.extract_strided_slice %637 {offsets = [0, 16], sizes = [8, 16], strides = [1, 1]} : vector<8x32xf32> to vector<8x16xf32>
    %640 = vector.extract_strided_slice %628 {offsets = [0, 32], sizes = [8, 16], strides = [1, 1]} : vector<8x48xf32> to vector<8x16xf32>
    %641 = vector.extract_strided_slice %629 {offsets = [0, 32], sizes = [8, 16], strides = [1, 1]} : vector<8x48xf32> to vector<8x16xf32>
    %642 = arith.addf %641, %585 : vector<8x16xf32>
    %643 = arith.mulf %638, %642 : vector<8x16xf32>
    %644 = arith.addf %640, %643 : vector<8x16xf32>
    %645 = math.tanh %644 : vector<8x16xf32>
    %646 = arith.subf %627, %645 : vector<8x16xf32>
    %647 = arith.mulf %639, %646 : vector<8x16xf32>
    %648 = arith.addf %645, %647 : vector<8x16xf32>
    %649 = vector.extract_strided_slice %583 {offsets = [24, 0], sizes = [8, 48], strides = [1, 1]} : vector<64x48xf32> to vector<8x48xf32>
    %cst_126 = arith.constant dense<0.000000e+00> : vector<8x48xf32>
    %650 = tpu.matmul %648, %576, %cst_126 {dimension_numbers = #tpu.dot_dimension_numbers<[1], [0], [0], [1], [0, 0, 1, 1], [], []>} : vector<8x16xf32>, vector<16x48xf32>, vector<8x48xf32> -> vector<8x48xf32>
    %651 = vector.extract_strided_slice %649 {offsets = [0, 0], sizes = [8, 32], strides = [1, 1]} : vector<8x48xf32> to vector<8x32xf32>
    %652 = vector.extract_strided_slice %650 {offsets = [0, 0], sizes = [8, 32], strides = [1, 1]} : vector<8x48xf32> to vector<8x32xf32>
    %653 = arith.addf %651, %652 : vector<8x32xf32>
    %654 = arith.negf %653 : vector<8x32xf32>
    %655 = math.exp %654 : vector<8x32xf32>
    %cst_127 = arith.constant 1.000000e+00 : f32
    %656 = vector.broadcast %cst_127 : f32 to vector<8x32xf32>
    %657 = arith.addf %656, %655 : vector<8x32xf32>
    %658 = arith.divf %656, %657 : vector<8x32xf32>
    %659 = vector.extract_strided_slice %658 {offsets = [0, 0], sizes = [8, 16], strides = [1, 1]} : vector<8x32xf32> to vector<8x16xf32>
    %660 = vector.extract_strided_slice %658 {offsets = [0, 16], sizes = [8, 16], strides = [1, 1]} : vector<8x32xf32> to vector<8x16xf32>
    %661 = vector.extract_strided_slice %649 {offsets = [0, 32], sizes = [8, 16], strides = [1, 1]} : vector<8x48xf32> to vector<8x16xf32>
    %662 = vector.extract_strided_slice %650 {offsets = [0, 32], sizes = [8, 16], strides = [1, 1]} : vector<8x48xf32> to vector<8x16xf32>
    %663 = arith.addf %662, %585 : vector<8x16xf32>
    %664 = arith.mulf %659, %663 : vector<8x16xf32>
    %665 = arith.addf %661, %664 : vector<8x16xf32>
    %666 = math.tanh %665 : vector<8x16xf32>
    %667 = arith.subf %648, %666 : vector<8x16xf32>
    %668 = arith.mulf %660, %667 : vector<8x16xf32>
    %669 = arith.addf %666, %668 : vector<8x16xf32>
    %670 = vector.extract_strided_slice %583 {offsets = [32, 0], sizes = [8, 48], strides = [1, 1]} : vector<64x48xf32> to vector<8x48xf32>
    %cst_128 = arith.constant dense<0.000000e+00> : vector<8x48xf32>
    %671 = tpu.matmul %669, %576, %cst_128 {dimension_numbers = #tpu.dot_dimension_numbers<[1], [0], [0], [1], [0, 0, 1, 1], [], []>} : vector<8x16xf32>, vector<16x48xf32>, vector<8x48xf32> -> vector<8x48xf32>
    %672 = vector.extract_strided_slice %670 {offsets = [0, 0], sizes = [8, 32], strides = [1, 1]} : vector<8x48xf32> to vector<8x32xf32>
    %673 = vector.extract_strided_slice %671 {offsets = [0, 0], sizes = [8, 32], strides = [1, 1]} : vector<8x48xf32> to vector<8x32xf32>
    %674 = arith.addf %672, %673 : vector<8x32xf32>
    %675 = arith.negf %674 : vector<8x32xf32>
    %676 = math.exp %675 : vector<8x32xf32>
    %cst_129 = arith.constant 1.000000e+00 : f32
    %677 = vector.broadcast %cst_129 : f32 to vector<8x32xf32>
    %678 = arith.addf %677, %676 : vector<8x32xf32>
    %679 = arith.divf %677, %678 : vector<8x32xf32>
    %680 = vector.extract_strided_slice %679 {offsets = [0, 0], sizes = [8, 16], strides = [1, 1]} : vector<8x32xf32> to vector<8x16xf32>
    %681 = vector.extract_strided_slice %679 {offsets = [0, 16], sizes = [8, 16], strides = [1, 1]} : vector<8x32xf32> to vector<8x16xf32>
    %682 = vector.extract_strided_slice %670 {offsets = [0, 32], sizes = [8, 16], strides = [1, 1]} : vector<8x48xf32> to vector<8x16xf32>
    %683 = vector.extract_strided_slice %671 {offsets = [0, 32], sizes = [8, 16], strides = [1, 1]} : vector<8x48xf32> to vector<8x16xf32>
    %684 = arith.addf %683, %585 : vector<8x16xf32>
    %685 = arith.mulf %680, %684 : vector<8x16xf32>
    %686 = arith.addf %682, %685 : vector<8x16xf32>
    %687 = math.tanh %686 : vector<8x16xf32>
    %688 = arith.subf %669, %687 : vector<8x16xf32>
    %689 = arith.mulf %681, %688 : vector<8x16xf32>
    %690 = arith.addf %687, %689 : vector<8x16xf32>
    %691 = vector.extract_strided_slice %583 {offsets = [40, 0], sizes = [8, 48], strides = [1, 1]} : vector<64x48xf32> to vector<8x48xf32>
    %cst_130 = arith.constant dense<0.000000e+00> : vector<8x48xf32>
    %692 = tpu.matmul %690, %576, %cst_130 {dimension_numbers = #tpu.dot_dimension_numbers<[1], [0], [0], [1], [0, 0, 1, 1], [], []>} : vector<8x16xf32>, vector<16x48xf32>, vector<8x48xf32> -> vector<8x48xf32>
    %693 = vector.extract_strided_slice %691 {offsets = [0, 0], sizes = [8, 32], strides = [1, 1]} : vector<8x48xf32> to vector<8x32xf32>
    %694 = vector.extract_strided_slice %692 {offsets = [0, 0], sizes = [8, 32], strides = [1, 1]} : vector<8x48xf32> to vector<8x32xf32>
    %695 = arith.addf %693, %694 : vector<8x32xf32>
    %696 = arith.negf %695 : vector<8x32xf32>
    %697 = math.exp %696 : vector<8x32xf32>
    %cst_131 = arith.constant 1.000000e+00 : f32
    %698 = vector.broadcast %cst_131 : f32 to vector<8x32xf32>
    %699 = arith.addf %698, %697 : vector<8x32xf32>
    %700 = arith.divf %698, %699 : vector<8x32xf32>
    %701 = vector.extract_strided_slice %700 {offsets = [0, 0], sizes = [8, 16], strides = [1, 1]} : vector<8x32xf32> to vector<8x16xf32>
    %702 = vector.extract_strided_slice %700 {offsets = [0, 16], sizes = [8, 16], strides = [1, 1]} : vector<8x32xf32> to vector<8x16xf32>
    %703 = vector.extract_strided_slice %691 {offsets = [0, 32], sizes = [8, 16], strides = [1, 1]} : vector<8x48xf32> to vector<8x16xf32>
    %704 = vector.extract_strided_slice %692 {offsets = [0, 32], sizes = [8, 16], strides = [1, 1]} : vector<8x48xf32> to vector<8x16xf32>
    %705 = arith.addf %704, %585 : vector<8x16xf32>
    %706 = arith.mulf %701, %705 : vector<8x16xf32>
    %707 = arith.addf %703, %706 : vector<8x16xf32>
    %708 = math.tanh %707 : vector<8x16xf32>
    %709 = arith.subf %690, %708 : vector<8x16xf32>
    %710 = arith.mulf %702, %709 : vector<8x16xf32>
    %711 = arith.addf %708, %710 : vector<8x16xf32>
    %712 = vector.extract_strided_slice %583 {offsets = [48, 0], sizes = [8, 48], strides = [1, 1]} : vector<64x48xf32> to vector<8x48xf32>
    %cst_132 = arith.constant dense<0.000000e+00> : vector<8x48xf32>
    %713 = tpu.matmul %711, %576, %cst_132 {dimension_numbers = #tpu.dot_dimension_numbers<[1], [0], [0], [1], [0, 0, 1, 1], [], []>} : vector<8x16xf32>, vector<16x48xf32>, vector<8x48xf32> -> vector<8x48xf32>
    %714 = vector.extract_strided_slice %712 {offsets = [0, 0], sizes = [8, 32], strides = [1, 1]} : vector<8x48xf32> to vector<8x32xf32>
    %715 = vector.extract_strided_slice %713 {offsets = [0, 0], sizes = [8, 32], strides = [1, 1]} : vector<8x48xf32> to vector<8x32xf32>
    %716 = arith.addf %714, %715 : vector<8x32xf32>
    %717 = arith.negf %716 : vector<8x32xf32>
    %718 = math.exp %717 : vector<8x32xf32>
    %cst_133 = arith.constant 1.000000e+00 : f32
    %719 = vector.broadcast %cst_133 : f32 to vector<8x32xf32>
    %720 = arith.addf %719, %718 : vector<8x32xf32>
    %721 = arith.divf %719, %720 : vector<8x32xf32>
    %722 = vector.extract_strided_slice %721 {offsets = [0, 0], sizes = [8, 16], strides = [1, 1]} : vector<8x32xf32> to vector<8x16xf32>
    %723 = vector.extract_strided_slice %721 {offsets = [0, 16], sizes = [8, 16], strides = [1, 1]} : vector<8x32xf32> to vector<8x16xf32>
    %724 = vector.extract_strided_slice %712 {offsets = [0, 32], sizes = [8, 16], strides = [1, 1]} : vector<8x48xf32> to vector<8x16xf32>
    %725 = vector.extract_strided_slice %713 {offsets = [0, 32], sizes = [8, 16], strides = [1, 1]} : vector<8x48xf32> to vector<8x16xf32>
    %726 = arith.addf %725, %585 : vector<8x16xf32>
    %727 = arith.mulf %722, %726 : vector<8x16xf32>
    %728 = arith.addf %724, %727 : vector<8x16xf32>
    %729 = math.tanh %728 : vector<8x16xf32>
    %730 = arith.subf %711, %729 : vector<8x16xf32>
    %731 = arith.mulf %723, %730 : vector<8x16xf32>
    %732 = arith.addf %729, %731 : vector<8x16xf32>
    %733 = vector.extract_strided_slice %583 {offsets = [56, 0], sizes = [8, 48], strides = [1, 1]} : vector<64x48xf32> to vector<8x48xf32>
    %cst_134 = arith.constant dense<0.000000e+00> : vector<8x48xf32>
    %734 = tpu.matmul %732, %576, %cst_134 {dimension_numbers = #tpu.dot_dimension_numbers<[1], [0], [0], [1], [0, 0, 1, 1], [], []>} : vector<8x16xf32>, vector<16x48xf32>, vector<8x48xf32> -> vector<8x48xf32>
    %735 = vector.extract_strided_slice %733 {offsets = [0, 0], sizes = [8, 32], strides = [1, 1]} : vector<8x48xf32> to vector<8x32xf32>
    %736 = vector.extract_strided_slice %734 {offsets = [0, 0], sizes = [8, 32], strides = [1, 1]} : vector<8x48xf32> to vector<8x32xf32>
    %737 = arith.addf %735, %736 : vector<8x32xf32>
    %738 = arith.negf %737 : vector<8x32xf32>
    %739 = math.exp %738 : vector<8x32xf32>
    %cst_135 = arith.constant 1.000000e+00 : f32
    %740 = vector.broadcast %cst_135 : f32 to vector<8x32xf32>
    %741 = arith.addf %740, %739 : vector<8x32xf32>
    %742 = arith.divf %740, %741 : vector<8x32xf32>
    %743 = vector.extract_strided_slice %742 {offsets = [0, 0], sizes = [8, 16], strides = [1, 1]} : vector<8x32xf32> to vector<8x16xf32>
    %744 = vector.extract_strided_slice %742 {offsets = [0, 16], sizes = [8, 16], strides = [1, 1]} : vector<8x32xf32> to vector<8x16xf32>
    %745 = vector.extract_strided_slice %733 {offsets = [0, 32], sizes = [8, 16], strides = [1, 1]} : vector<8x48xf32> to vector<8x16xf32>
    %746 = vector.extract_strided_slice %734 {offsets = [0, 32], sizes = [8, 16], strides = [1, 1]} : vector<8x48xf32> to vector<8x16xf32>
    %747 = arith.addf %746, %585 : vector<8x16xf32>
    %748 = arith.mulf %743, %747 : vector<8x16xf32>
    %749 = arith.addf %745, %748 : vector<8x16xf32>
    %750 = math.tanh %749 : vector<8x16xf32>
    %751 = arith.subf %732, %750 : vector<8x16xf32>
    %752 = arith.mulf %744, %751 : vector<8x16xf32>
    %753 = arith.addf %750, %752 : vector<8x16xf32>
    %754 = tpu.concatenate %606, %627, %648, %669, %690, %711, %732, %753 in 0 : vector<8x16xf32>, vector<8x16xf32>, vector<8x16xf32>, vector<8x16xf32>, vector<8x16xf32>, vector<8x16xf32>, vector<8x16xf32>, vector<8x16xf32> -> vector<64x16xf32>
    %c3_136 = arith.constant 3 : index
    %c0_137 = arith.constant 0 : index
    %c0_138 = arith.constant 0 : index
    %755 = vector.load %arg3[%c3_136, %c0_137, %c0_138] : memref<4x32x32xf32, #tpu.memory_space<vmem>>, vector<1x32x16xf32>
    %756 = vector.shape_cast %755 : vector<1x32x16xf32> to vector<32x16xf32>
    %c3_139 = arith.constant 3 : index
    %c0_140 = arith.constant 0 : index
    %757 = vector.load %arg4[%c3_139, %c0_140] : memref<4x32xf32, #tpu.memory_space<vmem>>, vector<1x16xf32>
    %cst_141 = arith.constant dense<0.000000e+00> : vector<64x16xf32>
    %758 = tpu.matmul %572, %756, %cst_141 {dimension_numbers = #tpu.dot_dimension_numbers<[1], [0], [0], [1], [0, 0, 1, 1], [], []>} : vector<64x32xf32>, vector<32x16xf32>, vector<64x16xf32> -> vector<64x16xf32>
    %759 = vector.broadcast %757 : vector<1x16xf32> to vector<64x16xf32>
    %760 = arith.addf %758, %759 : vector<64x16xf32>
    %761 = arith.addf %754, %760 : vector<64x16xf32>
    %c0_142 = arith.constant 0 : index
    %c0_143 = arith.constant 0 : index
    %762 = vector.load %arg5[%c0_142, %c0_143] : memref<64x16xf32, #tpu.memory_space<vmem>>, vector<64x16xf32>
    tpu.vector_store %arg5[%c0_142, %c0_143], %761 {strides = array<i32>} : memref<64x16xf32, #tpu.memory_space<vmem>>, vector<64x16xf32>,
    return
  }
}

</mosaic_0001>

<bundles_post_ra>
// kernel: rnn_seq_ae_forward.1
= control target key start
LH: loop header
LB: loop body
LE: loop exit
PB: predicated region body
PF: predicated region fallthrough
CT: control target
= control target key end

     0   :  { %10 = vsyncpa [#allocation3], 0  ;;  %s3804_s0 = inlined_call_operand.vmem [shape: f32[64,16], index: 0, kind: input, shape index: {}]   ;;  %s3805_s1 = inlined_call_operand.hbm [shape: f32[4,64,96], index: 1, kind: input, shape index: {}]   ;;  %s3806_s2 = inlined_call_operand.vmem [shape: f32[4,2,96], index: 2, kind: input, shape index: {}]   ;;  %s3807_s3 = inlined_call_operand.hbm [shape: f32[4,32,32], index: 3, kind: input, shape index: {}]   ;;  %s3808_s4 = inlined_call_operand.vmem [shape: f32[4,32], index: 4, kind: input, shape index: {}]   ;;  %s3809_s5 = inlined_call_operand.vmem [shape: f32[64,16], index: 5, kind: output, shape index: {}]  }
   0x1   :  { %s18_s20 = sshll.u32 %s3805_s1, 4  ;;  %s19_s20 = int_to_ptr.hbm [resolvable:$true] %s18_s20 }
   0x2   :  { %11 = vsyncpa [#allocation5], 0  ;;  %s3091_s21 = smov [#allocation2]   ;;  %s33_s25 = sshll.u32 %s3807_s3, 4  ;;  %s34_s25 = int_to_ptr.hbm [resolvable:$true] %s33_s25 }
   0x3   :  { %s20_s22 = sshll.u32 %s3091_s21, 4  ;;  %s3092_s26 = smov 128   ;;  %s21_s22 = int_to_ptr.vmem [resolvable:$true] %s20_s22 }
   0x4   :  { %s3093_s27 = smov 8   ;;  %s3094_s28 = smov [#allocation4]  }
   0x5   :  { %26 = dma.hbm_to_vmem [thread:$0]  %s19_s20, 4096, %s21_s22, [#allocation3], %s3092_s26, %s3092_s26, %s3093_s27  }
   0x6   :  { %s35_s29 = sshll.u32 %s3094_s28, 4  ;;  %s36_s29 = int_to_ptr.vmem [resolvable:$true] %s35_s29 }
   0x7   :  { %41 = dma.hbm_to_vmem [thread:$0]  %s34_s25, 2048, %s36_s29, [#allocation5], %s3092_s26, %s3092_s26, %s3093_s27  }
   0x8   :  { %3087 = dma.done.wait [#allocation3], 4096  }
   0x9   :  { %3088 = vsyncadd [#allocation3], 4294963200 }
   0xa   :  { %3089 = dma.done.wait [#allocation5], 2048  }
   0xb   :  { %3090 = vsyncadd [#allocation5], 4294965248  ;;  %v61_v0 = vld [vmem:[#allocation2 + $0x8] sm:$0xff]  ;;  %v60_v1 = vld [vmem:[#allocation2] sm:$0xff]  ;;  %vm69_vm0 = vcmask 130048   ;;  %s3095_s9 = smov 64  }
   0xc   :  { %2819 = vmatpush.msra.mxu2 %v61_v0  ;;  %v59_v2 = vld [vmem:[%s3804_s0 + $0x38] sm:$0xff]  ;;  %v3140_v3 = vld [vmem:[#allocation2 + $0x28] sm:$0xff]  ;;  %108 = vmatpush.msra.mxu0 %v61_v0  ;;  %v52_v4 = vld [vmem:[%s3804_s0] sm:$0xff]  ;;  %v3096_v9 = vmov 0.0   ;;  %s3097_s12 = smov 96   ;;  %s3098_s13 = smov 32  }
   0xd   :  { %292 = vmatpush.msra.mxu3 %v3140_v3  ;;  %360 = vmatpush.msra.mxu1 %v3140_v3  ;;  %v3147_v5 = vld [vmem:[#allocation2 + $0x20] sm:$0xff]  ;;  %v3153_v7 = vld [vmem:[#allocation2 + $0x18] sm:$0xff]  ;;  %v3161_v8 = vld [vmem:[#allocation2 + $0x10] sm:$0xff]  ;;  %vm136_vm5 = vcmask 261120   ;;  %s3100_s18 = smov 112  }
   0xe   :  { %2820 = vmatpush.msra.mxu2 %v60_v1  ;;  %109 = vmatpush.msra.mxu0 %v60_v1  ;;  %v2835_v6 = vld [vmem:[%s3806_s2 + $0x1] ss:$0 sm:$0xff]  ;;  %v3194_v15 = vld [vmem:[%s3806_s2] ss:$0 sm:$0xff]  ;;  %v53_v41 = vld [vmem:[%s3804_s0 + $0x8] sm:$0xff] }
   0xf   :  { %2721 = vmatmul.msk.f32.vlgmr.msra.gmra.mxu2 %vm69_vm0, %v59_v2  ;;  %2714 = vmatmul.msk.f32.vlgmr.msra.gmra.mxu0 %vm69_vm0, %v52_v4 }
  0x10   :  { %152 = vmatpush.msrb.mxu2 %v3140_v3  ;;  %181 = vrot.lane.b32.xlu0 %v2835_v6, %s3095_s9 }
  0x11   :  { %293 = vmatpush.msra.mxu3 %v3147_v5  ;;  %361 = vmatpush.msra.mxu1 %v3147_v5 }
  0x12   :  { %153 = vmatpush.msrb.mxu2 %v3147_v5 }
  0x13   :  { %294 = vmatpush.msra.mxu3 %v3153_v7  ;;  %362 = vmatpush.msra.mxu1 %v3153_v7 }
  0x14   :  { %154 = vmatpush.msrb.mxu2 %v3153_v7 }
  0x15   :  { %295 = vmatpush.msra.mxu3 %v3161_v8  ;;  %363 = vmatpush.msra.mxu1 %v3161_v8 }
  0x16   :  { %155 = vmatpush.msrb.mxu2 %v3161_v8 }
  0x17   :  { %496 = vmatpush.msrb.mxu3 %v3140_v3  ;;  %156 = vmatmul.f32.vlgmr.msrb.gmra.mxu2 %v3096_v9 }
  0x18   :  { %564 = vmatpush.msrb.mxu1 %v3140_v3  ;;  %224 = vmatpush.msra.mxu2 %v3140_v3 }
  0x19   :  { %497 = vmatpush.msrb.mxu3 %v3147_v5  ;;  %2715 = vmatmul.msk.f32.gmra.mxu0 %vm69_vm0, %v53_v41 }
  0x1a   :  { %565 = vmatpush.msrb.mxu1 %v3147_v5  ;;  %225 = vmatpush.msra.mxu2 %v3147_v5 }
  0x1b   :  { %498 = vmatpush.msrb.mxu3 %v3153_v7 }
  0x1c   :  { %566 = vmatpush.msrb.mxu1 %v3153_v7  ;;  %226 = vmatpush.msra.mxu2 %v3153_v7 }
  0x1d   :  { %499 = vmatpush.msrb.mxu3 %v3161_v8 }
  0x1e   :  { %567 = vmatpush.msrb.mxu1 %v3161_v8  ;;  %227 = vmatpush.msra.mxu2 %v3161_v8 }
  0x20   :  { %428 = vmatpush.msrb.mxu2 %v3140_v3 }
  0x22   :  { %429 = vmatpush.msrb.mxu2 %v3147_v5 }
  0x24   :  { %430 = vmatpush.msrb.mxu2 %v3153_v7 }
  0x26   :  { %431 = vmatpush.msrb.mxu2 %v3161_v8 }
  0x82   :  { %v3187_v11 = vpop.permute.xlu0 %181 }
  0x8c   :  { %v111_v14 = vpop.f32.mrf.mxu0 }
  0x8d   :  { %v112_v16 = vadd.f32 %v3194_v15, %v111_v14 }
  0x92   :  { %v3185_v10 = vpop.f32.mrf.mxu2 }
  0x96   :  { %v114_v45 = vpop.f32.mrf.mxu0 }
  0x97   :  { %v115_v46 = vadd.f32 %v3194_v15, %v114_v45 }
  0x9a   :  { %v157_v12 = vpop.f32.mrf.mxu2 }
  0x9b   :  { %v184_v13 = vadd.f32 %v3187_v11, %v157_v12  ;;  %v160_v17 = vadd.f32 %v157_v12, %v112_v16 }
  0x9d   :  { %186 = vrot.lane.b32.xlu0 %v184_v13, %s3095_s9  ;;  %v2722_v18 = vmul.f32 -1.442695, %v160_v17 }
  0x9f   :  { %2847 = vpow2.f32 %v2722_v18 }
  0xa5   :  { %v2848_v19 = vpop.eup %2847 }
  0xa6   :  { %v164_v20 = vadd.f32 1.0, %v2848_v19 }
  0xa8   :  { %2849 = vrcp.f32 %v164_v20  ;;  %v176_v26 = vand.u32 2147483648, %v164_v20  ;;  %vm170_vm2 = vweird.f32 %v164_v20  ;;  %v174_v27 = vand.u32 2147483647, %v164_v20 }
  0xaa   :  { %v177_v29 = vor.u32 1.1754944e-38, %v176_v26  ;;  %vm175_vm4 = vcmp.eq.f32.partialorder %v174_v27, 8.507059e+37 }
  0xae   :  { %v2850_v21 = vpop.eup %2849 }
  0xaf   :  { %v166_v22 = vmul.f32 %v2850_v21, %v164_v20  ;;  %vm171_vm1 = vweird.f32 %v2850_v21 }
  0xb0   :  { %vm172_vm3 = vmor %vm170_vm2, %vm171_vm1 }
  0xb1   :  { %v167_v23 = vsub.f32 1.0, %v166_v22 }
  0xb3   :  { %v168_v24 = vmul.f32 %v2850_v21, %v167_v23 }
  0xb5   :  { %v169_v25 = vadd.f32 %v2850_v21, %v168_v24 }
  0xb7   :  { %v173_v28 = vsel %vm172_vm3, %v2850_v21, %v169_v25 }
  0xb8   :  { %v178_v31 = vsel %vm175_vm4, %v177_v29, %v173_v28 }
 0x10f   :  { %v187_v30 = vpop.permute.xlu0 %186 }
 0x110   :  { %v189_v32 = vmul.f32 %v187_v30, %v178_v31 }
 0x112   :  { %191 = vrot.lane.b32.xlu1 %v189_v32, %s3095_s9 }
 0x184   :  { %v192_v33 = vpop.permute.xlu1 %191 }
 0x185   :  { %v194_v34 = vadd.f32 %v192_v33, %v112_v16 }
 0x187   :  { %2851 = vtanh.f32 %v194_v34 }
 0x18d   :  { %v2852_v35 = vpop.eup %2851 }
 0x18e   :  { %v196_v36 = vsub.f32 0.0, %v2852_v35 }
 0x190   :  { %198 = vrot.lane.b32.xlu1 %v196_v36, %s3097_s12 }
 0x202   :  { %v199_v37 = vpop.permute.xlu1 %198 }
 0x203   :  { %v201_v38 = vmul.f32 %v199_v37, %v178_v31 }
 0x205   :  { %203 = vrot.lane.b32.xlu2 %v201_v38, %s3098_s13  ;;  %v55_v38 = vld [vmem:[%s3804_s0 + $0x18] sm:$0xff] }
 0x25f   :  { %v204_v39 = vpop.permute.xlu2 %203 }
 0x260   :  { %v206_v40 = vadd.f32 %v2852_v35, %v204_v39 }
 0x262   :  { %208 = vrot.lane.b32.xlu2 %v206_v40, %s3095_s9 }
 0x2bc   :  { %v3205_v42 = vpop.permute.xlu2 %208 }
 0x2bd   :  { %2723 = vmatmul.msk.f32.vlgmr.msra.gmra.mxu2 %vm136_vm5, %v3205_v42 }
 0x2be   :  { %632 = vmatpush.msra.mxu2 %v3140_v3 }
 0x2c0   :  { %633 = vmatpush.msra.mxu2 %v3147_v5 }
 0x2c2   :  { %634 = vmatpush.msra.mxu2 %v3153_v7  ;;  %v54_v7 = vld [vmem:[%s3804_s0 + $0x10] sm:$0xff] }
 0x2c3   :  { %2716 = vmatmul.msk.f32.gmra.mxu0 %vm69_vm0, %v54_v7  ;;  %v56_v7 = vld [vmem:[%s3804_s0 + $0x20] sm:$0xff] }
 0x2c4   :  { %635 = vmatpush.msra.mxu2 %v3161_v8 }
 0x2cb   :  { %2717 = vmatmul.msk.f32.gmra.mxu0 %vm69_vm0, %v55_v38 }
 0x2d3   :  { %2718 = vmatmul.msk.f32.gmra.mxu0 %vm69_vm0, %v56_v7  ;;  %v58_v7 = vld [vmem:[%s3804_s0 + $0x30] sm:$0xff] }
 0x340   :  { %v229_v43 = vpop.f32.mrf.mxu2  ;;  %v117_v13 = vpop.f32.mrf.mxu0 }
 0x341   :  { %v252_v44 = vadd.f32 %v229_v43, %v3187_v11  ;;  %v232_v47 = vadd.f32 %v229_v43, %v115_v46  ;;  %v118_v14 = vadd.f32 %v3194_v15, %v117_v13 }
 0x343   :  { %254 = vrot.lane.b32.xlu0 %v252_v44, %s3095_s9  ;;  %v2724_v48 = vmul.f32 -1.442695, %v232_v47 }
 0x345   :  { %2853 = vpow2.f32 %v2724_v48 }
 0x348   :  { %v120_v45 = vpop.f32.mrf.mxu0 }
 0x34b   :  { %v2854_v49 = vpop.eup %2853 }
 0x34c   :  { %v236_v50 = vadd.f32 1.0, %v2854_v49 }
 0x34e   :  { %2855 = vrcp.f32 %v236_v50  ;;  %v248_v56 = vand.u32 2147483648, %v236_v50  ;;  %vm242_vm7 = vweird.f32 %v236_v50  ;;  %v246_v57 = vand.u32 2147483647, %v236_v50 }
 0x350   :  { %v249_v59 = vor.u32 1.1754944e-38, %v248_v56  ;;  %vm247_vm9 = vcmp.eq.f32.partialorder %v246_v57, 8.507059e+37 }
 0x354   :  { %v2856_v51 = vpop.eup %2855 }
 0x355   :  { %v238_v52 = vmul.f32 %v2856_v51, %v236_v50  ;;  %vm243_vm6 = vweird.f32 %v2856_v51 }
 0x356   :  { %vm244_vm8 = vmor %vm242_vm7, %vm243_vm6 }
 0x357   :  { %v239_v53 = vsub.f32 1.0, %v238_v52 }
 0x359   :  { %v240_v54 = vmul.f32 %v2856_v51, %v239_v53 }
 0x35b   :  { %v241_v55 = vadd.f32 %v2856_v51, %v240_v54 }
 0x35d   :  { %v245_v58 = vsel %vm244_vm8, %v2856_v51, %v241_v55 }
 0x35e   :  { %v250_v61 = vsel %vm247_vm9, %v249_v59, %v245_v58 }
 0x3b5   :  { %v255_v60 = vpop.permute.xlu0 %254 }
 0x3b6   :  { %v257_v62 = vmul.f32 %v255_v60, %v250_v61 }
 0x3b8   :  { %259 = vrot.lane.b32.xlu1 %v257_v62, %s3095_s9 }
 0x42a   :  { %v260_v63 = vpop.permute.xlu1 %259 }
 0x42b   :  { %v262_v0 = vadd.f32 %v260_v63, %v115_v46  ;;  %v121_v46 = vadd.f32 %v3194_v15, %v120_v45 }
 0x42d   :  { %2857 = vtanh.f32 %v262_v0 }
 0x433   :  { %v2858_v1 = vpop.eup %2857 }
 0x434   :  { %v264_v2 = vsub.f32 %v206_v40, %v2858_v1 }
 0x436   :  { %266 = vrot.lane.b32.xlu2 %v264_v2, %s3097_s12 }
 0x490   :  { %v267_v3 = vpop.permute.xlu2 %266 }
 0x491   :  { %v269_v4 = vmul.f32 %v267_v3, %v250_v61 }
 0x493   :  { %271 = vrot.lane.b32.xlu0 %v269_v4, %s3098_s13 }
 0x505   :  { %v272_v5 = vpop.permute.xlu0 %271 }
 0x506   :  { %v274_v6 = vadd.f32 %v2858_v1, %v272_v5 }
 0x508   :  { %276 = vrot.lane.b32.xlu1 %v274_v6, %s3095_s9 }
 0x57a   :  { %v3224_v8 = vpop.permute.xlu1 %276 }
 0x57b   :  { %2725 = vmatmul.msk.f32.vlgmr.msra.gmra.mxu3 %vm136_vm5, %v3224_v8 }
 0x5fe   :  { %v297_v9 = vpop.f32.mrf.mxu3 }
 0x5ff   :  { %v320_v12 = vadd.f32 %v297_v9, %v3187_v11  ;;  %v300_v16 = vadd.f32 %v297_v9, %v118_v14 }
 0x601   :  { %322 = vrot.lane.b32.xlu2 %v320_v12, %s3095_s9  ;;  %v2726_v17 = vmul.f32 -1.442695, %v300_v16 }
 0x603   :  { %2859 = vpow2.f32 %v2726_v17 }
 0x609   :  { %v2860_v18 = vpop.eup %2859 }
 0x60a   :  { %v304_v19 = vadd.f32 1.0, %v2860_v18 }
 0x60c   :  { %2861 = vrcp.f32 %v304_v19  ;;  %v316_v25 = vand.u32 2147483648, %v304_v19  ;;  %vm310_vm11 = vweird.f32 %v304_v19  ;;  %v314_v26 = vand.u32 2147483647, %v304_v19 }
 0x60e   :  { %v317_v28 = vor.u32 1.1754944e-38, %v316_v25  ;;  %vm315_vm13 = vcmp.eq.f32.partialorder %v314_v26, 8.507059e+37 }
 0x612   :  { %v2862_v20 = vpop.eup %2861 }
 0x613   :  { %v306_v21 = vmul.f32 %v2862_v20, %v304_v19  ;;  %vm311_vm10 = vweird.f32 %v2862_v20 }
 0x614   :  { %vm312_vm12 = vmor %vm310_vm11, %vm311_vm10 }
 0x615   :  { %v307_v22 = vsub.f32 1.0, %v306_v21 }
 0x617   :  { %v308_v23 = vmul.f32 %v2862_v20, %v307_v22 }
 0x619   :  { %v309_v24 = vadd.f32 %v2862_v20, %v308_v23 }
 0x61b   :  { %v313_v27 = vsel %vm312_vm12, %v2862_v20, %v309_v24 }
 0x61c   :  { %v318_v30 = vsel %vm315_vm13, %v317_v28, %v313_v27 }
 0x65b   :  { %v323_v29 = vpop.permute.xlu2 %322 }
 0x65c   :  { %v325_v31 = vmul.f32 %v323_v29, %v318_v30 }
 0x65e   :  { %327 = vrot.lane.b32.xlu0 %v325_v31, %s3095_s9 }
 0x6d0   :  { %v328_v32 = vpop.permute.xlu0 %327 }
 0x6d1   :  { %v330_v33 = vadd.f32 %v328_v32, %v118_v14  ;;  %v123_v14 = vpop.f32.mrf.mxu0 }
 0x6d2   :  { %v124_v16 = vadd.f32 %v3194_v15, %v123_v14  ;;  %v721_v14 = vld [vmem:[#allocation2 + $0x58] sm:$0xff] }
 0x6d3   :  { %2863 = vtanh.f32 %v330_v33 }
 0x6d9   :  { %v2864_v34 = vpop.eup %2863 }
 0x6da   :  { %v332_v35 = vsub.f32 %v274_v6, %v2864_v34 }
 0x6dc   :  { %334 = vrot.lane.b32.xlu1 %v332_v35, %s3097_s12 }
 0x74e   :  { %v335_v36 = vpop.permute.xlu1 %334 }
 0x74f   :  { %v337_v37 = vmul.f32 %v335_v36, %v318_v30 }
 0x751   :  { %339 = vrot.lane.b32.xlu2 %v337_v37, %s3098_s13 }
 0x7ab   :  { %v340_v39 = vpop.permute.xlu2 %339 }
 0x7ac   :  { %v342_v40 = vadd.f32 %v2864_v34, %v340_v39 }
 0x7ae   :  { %344 = vrot.lane.b32.xlu0 %v342_v40, %s3095_s9 }
 0x820   :  { %v3239_v41 = vpop.permute.xlu0 %344 }
 0x821   :  { %2727 = vmatmul.msk.f32.vlgmr.msra.gmra.mxu1 %vm136_vm5, %v3239_v41 }
 0x822   :  { %742 = vmatpush.msra.mxu1 %v721_v14 }
 0x89e   :  { %v365_v43 = vpop.f32.mrf.mxu1 }
 0x89f   :  { %v388_v44 = vadd.f32 %v365_v43, %v3187_v11  ;;  %v368_v47 = vadd.f32 %v365_v43, %v121_v46  ;;  %v57_v43 = vld [vmem:[%s3804_s0 + $0x28] sm:$0xff] }
 0x8a0   :  { %2719 = vmatmul.msk.f32.gmra.mxu0 %vm69_vm0, %v57_v43 }
 0x8a1   :  { %390 = vrot.lane.b32.xlu1 %v388_v44, %s3095_s9  ;;  %v2728_v48 = vmul.f32 -1.442695, %v368_v47 }
 0x8a3   :  { %2865 = vpow2.f32 %v2728_v48 }
 0x8a8   :  { %2720 = vmatmul.msk.f32.gmra.mxu0 %vm69_vm0, %v58_v7  ;;  %v684_v7 = vld [vmem:[#allocation4 + $0x8] sm:$0xff] }
 0x8a9   :  { %v2866_v49 = vpop.eup %2865 }
 0x8aa   :  { %v372_v50 = vadd.f32 1.0, %v2866_v49 }
 0x8ac   :  { %2867 = vrcp.f32 %v372_v50  ;;  %v384_v56 = vand.u32 2147483648, %v372_v50  ;;  %vm378_vm15 = vweird.f32 %v372_v50  ;;  %v382_v57 = vand.u32 2147483647, %v372_v50 }
 0x8ae   :  { %v385_v59 = vor.u32 1.1754944e-38, %v384_v56  ;;  %vm383_vm2 = vcmp.eq.f32.partialorder %v382_v57, 8.507059e+37 }
 0x8b2   :  { %v2868_v51 = vpop.eup %2867 }
 0x8b3   :  { %v374_v52 = vmul.f32 %v2868_v51, %v372_v50  ;;  %vm379_vm14 = vweird.f32 %v2868_v51 }
 0x8b4   :  { %vm380_vm1 = vmor %vm378_vm15, %vm379_vm14 }
 0x8b5   :  { %v375_v53 = vsub.f32 1.0, %v374_v52 }
 0x8b7   :  { %v376_v54 = vmul.f32 %v2868_v51, %v375_v53 }
 0x8b9   :  { %v377_v55 = vadd.f32 %v2868_v51, %v376_v54 }
 0x8bb   :  { %v381_v58 = vsel %vm380_vm1, %v2868_v51, %v377_v55 }
 0x8bc   :  { %v386_v61 = vsel %vm383_vm2, %v385_v59, %v381_v58 }
 0x913   :  { %v391_v60 = vpop.permute.xlu1 %390 }
 0x914   :  { %v393_v62 = vmul.f32 %v391_v60, %v386_v61 }
 0x916   :  { %395 = vrot.lane.b32.xlu2 %v393_v62, %s3095_s9 }
 0x91d   :  { %v126_v47 = vpop.f32.mrf.mxu0 }
 0x91e   :  { %v127_v48 = vadd.f32 %v3194_v15, %v126_v47 }
 0x970   :  { %v396_v63 = vpop.permute.xlu2 %395 }
 0x971   :  { %v398_v0 = vadd.f32 %v396_v63, %v121_v46 }
 0x973   :  { %2869 = vtanh.f32 %v398_v0 }
 0x979   :  { %v2870_v1 = vpop.eup %2869 }
 0x97a   :  { %v400_v2 = vsub.f32 %v342_v40, %v2870_v1 }
 0x97c   :  { %402 = vrot.lane.b32.xlu0 %v400_v2, %s3097_s12 }
 0x9ee   :  { %v403_v3 = vpop.permute.xlu0 %402 }
 0x9ef   :  { %v405_v4 = vmul.f32 %v403_v3, %v386_v61 }
 0x9f1   :  { %407 = vrot.lane.b32.xlu1 %v405_v4, %s3098_s13 }
 0xa63   :  { %v408_v5 = vpop.permute.xlu1 %407 }
 0xa64   :  { %v410_v6 = vadd.f32 %v2870_v1, %v408_v5 }
 0xa66   :  { %412 = vrot.lane.b32.xlu2 %v410_v6, %s3095_s9 }
 0xac0   :  { %v3254_v9 = vpop.permute.xlu2 %412 }
 0xac1   :  { %2729 = vmatmul.msk.f32.vlgmr.msrb.gmra.mxu2 %vm136_vm5, %v3254_v9 }
 0xb44   :  { %v433_v12 = vpop.f32.mrf.mxu2 }
 0xb45   :  { %v456_v13 = vadd.f32 %v433_v12, %v3187_v11  ;;  %v436_v17 = vadd.f32 %v433_v12, %v124_v16 }
 0xb47   :  { %458 = vrot.lane.b32.xlu0 %v456_v13, %s3095_s9  ;;  %v2730_v18 = vmul.f32 -1.442695, %v436_v17  ;;  %v719_v17 = vld [vmem:[#allocation2 + $0x48] sm:$0xff] }
 0xb49   :  { %2871 = vpow2.f32 %v2730_v18  ;;  %v718_v18 = vld [vmem:[#allocation2 + $0x40] sm:$0xff] }
 0xb4f   :  { %v2872_v19 = vpop.eup %2871 }
 0xb50   :  { %v440_v20 = vadd.f32 1.0, %v2872_v19 }
 0xb52   :  { %2873 = vrcp.f32 %v440_v20  ;;  %v452_v26 = vand.u32 2147483648, %v440_v20  ;;  %vm446_vm4 = vweird.f32 %v440_v20  ;;  %v450_v27 = vand.u32 2147483647, %v440_v20 }
 0xb54   :  { %v453_v29 = vor.u32 1.1754944e-38, %v452_v26  ;;  %vm451_vm7 = vcmp.eq.f32.partialorder %v450_v27, 8.507059e+37 }
 0xb58   :  { %v2874_v21 = vpop.eup %2873 }
 0xb59   :  { %v442_v22 = vmul.f32 %v2874_v21, %v440_v20  ;;  %vm447_vm3 = vweird.f32 %v2874_v21 }
 0xb5a   :  { %vm448_vm6 = vmor %vm446_vm4, %vm447_vm3 }
 0xb5b   :  { %v443_v23 = vsub.f32 1.0, %v442_v22  ;;  %v129_v22 = vpop.f32.mrf.mxu0 }
 0xb5d   :  { %v444_v24 = vmul.f32 %v2874_v21, %v443_v23 }
 0xb5f   :  { %v445_v25 = vadd.f32 %v2874_v21, %v444_v24 }
 0xb61   :  { %v449_v28 = vsel %vm448_vm6, %v2874_v21, %v445_v25 }
 0xb62   :  { %v454_v31 = vsel %vm451_vm7, %v453_v29, %v449_v28 }
 0xbb9   :  { %v459_v30 = vpop.permute.xlu0 %458 }
 0xbba   :  { %v461_v32 = vmul.f32 %v459_v30, %v454_v31 }
 0xbbc   :  { %463 = vrot.lane.b32.xlu1 %v461_v32, %s3095_s9 }
 0xc2e   :  { %v464_v33 = vpop.permute.xlu1 %463 }
 0xc2f   :  { %v466_v34 = vadd.f32 %v464_v33, %v124_v16  ;;  %v720_v16 = vld [vmem:[#allocation2 + $0x50] sm:$0xff] }
 0xc30   :  { %743 = vmatpush.msra.mxu1 %v720_v16 }
 0xc31   :  { %2875 = vtanh.f32 %v466_v34 }
 0xc32   :  { %744 = vmatpush.msra.mxu1 %v719_v17  ;;  %v3314_v17 = vld [vmem:[#allocation2 + $0x78] sm:$0xff] }
 0xc33   :  { %787 = vmatpush.msrb.mxu2 %v3314_v17 }
 0xc34   :  { %745 = vmatpush.msra.mxu1 %v718_v18  ;;  %v3318_v18 = vld [vmem:[#allocation2 + $0x70] sm:$0xff] }
 0xc35   :  { %788 = vmatpush.msrb.mxu2 %v3318_v18 }
 0xc37   :  { %v2876_v35 = vpop.eup %2875 }
 0xc38   :  { %v468_v36 = vsub.f32 %v410_v6, %v2876_v35 }
 0xc3a   :  { %470 = vrot.lane.b32.xlu2 %v468_v36, %s3097_s12 }
 0xc94   :  { %v471_v37 = vpop.permute.xlu2 %470 }
 0xc95   :  { %v473_v38 = vmul.f32 %v471_v37, %v454_v31 }
 0xc97   :  { %475 = vrot.lane.b32.xlu0 %v473_v38, %s3098_s13 }
 0xd09   :  { %v476_v39 = vpop.permute.xlu0 %475 }
 0xd0a   :  { %v478_v40 = vadd.f32 %v2876_v35, %v476_v39 }
 0xd0c   :  { %480 = vrot.lane.b32.xlu1 %v478_v40, %s3095_s9 }
 0xd7e   :  { %v481_v44 = vpop.permute.xlu1 %480 }
 0xd7f   :  { %2731 = vmatmul.msk.f32.vlgmr.msrb.gmra.mxu3 %vm136_vm5, %v481_v44 }
 0xe02   :  { %v501_v45 = vpop.f32.mrf.mxu3 }
 0xe03   :  { %v524_v46 = vadd.f32 %v501_v45, %v3187_v11  ;;  %v504_v49 = vadd.f32 %v501_v45, %v127_v48 }
 0xe05   :  { %526 = vrot.lane.b32.xlu2 %v524_v46, %s3095_s9  ;;  %v2732_v50 = vmul.f32 -1.442695, %v504_v49  ;;  %v133_v49 = vadd.f32 %v3194_v15, %v3185_v10 }
 0xe07   :  { %2877 = vpow2.f32 %v2732_v50 }
 0xe0d   :  { %v2878_v51 = vpop.eup %2877 }
 0xe0e   :  { %v508_v52 = vadd.f32 1.0, %v2878_v51 }
 0xe10   :  { %2879 = vrcp.f32 %v508_v52  ;;  %v520_v58 = vand.u32 2147483648, %v508_v52  ;;  %vm514_vm9 = vweird.f32 %v508_v52  ;;  %v518_v59 = vand.u32 2147483647, %v508_v52 }
 0xe12   :  { %v521_v61 = vor.u32 1.1754944e-38, %v520_v58  ;;  %vm519_vm11 = vcmp.eq.f32.partialorder %v518_v59, 8.507059e+37 }
 0xe16   :  { %v2880_v53 = vpop.eup %2879 }
 0xe17   :  { %v510_v54 = vmul.f32 %v2880_v53, %v508_v52  ;;  %vm515_vm8 = vweird.f32 %v2880_v53 }
 0xe18   :  { %vm516_vm10 = vmor %vm514_vm9, %vm515_vm8 }
 0xe19   :  { %v511_v55 = vsub.f32 1.0, %v510_v54 }
 0xe1b   :  { %v512_v56 = vmul.f32 %v2880_v53, %v511_v55 }
 0xe1d   :  { %v513_v57 = vadd.f32 %v2880_v53, %v512_v56 }
 0xe1f   :  { %v517_v60 = vsel %vm516_vm10, %v2880_v53, %v513_v57 }
 0xe20   :  { %v522_v63 = vsel %vm519_vm11, %v521_v61, %v517_v60 }
 0xe5f   :  { %v527_v62 = vpop.permute.xlu2 %526 }
 0xe60   :  { %v529_v0 = vmul.f32 %v527_v62, %v522_v63 }
 0xe62   :  { %531 = vrot.lane.b32.xlu0 %v529_v0, %s3095_s9 }
 0xed4   :  { %v532_v1 = vpop.permute.xlu0 %531 }
 0xed5   :  { %v534_v2 = vadd.f32 %v532_v1, %v127_v48 }
 0xed7   :  { %2881 = vtanh.f32 %v534_v2 }
 0xedd   :  { %v2882_v3 = vpop.eup %2881 }
 0xede   :  { %v536_v4 = vsub.f32 %v478_v40, %v2882_v3 }
 0xee0   :  { %538 = vrot.lane.b32.xlu1 %v536_v4, %s3097_s12 }
 0xf52   :  { %v539_v5 = vpop.permute.xlu1 %538 }
 0xf53   :  { %v541_v6 = vmul.f32 %v539_v5, %v522_v63  ;;  %v686_v5 = vld [vmem:[#allocation4 + $0x18] sm:$0xff] }
 0xf54   :  { %706 = vmatpush.msra.mxu3 %v686_v5 }
 0xf55   :  { %543 = vrot.lane.b32.xlu2 %v541_v6, %s3098_s13  ;;  %v685_v6 = vld [vmem:[#allocation4 + $0x10] sm:$0xff] }
 0xf56   :  { %707 = vmatpush.msra.mxu3 %v685_v6 }
 0xf58   :  { %708 = vmatpush.msra.mxu3 %v684_v7 }
 0xfaf   :  { %v544_v12 = vpop.permute.xlu2 %543 }
 0xfb0   :  { %v546_v13 = vadd.f32 %v2882_v3, %v544_v12  ;;  %v683_v12 = vld [vmem:[#allocation4] sm:$0xff] }
 0xfb1   :  { %709 = vmatpush.msra.mxu3 %v683_v12 }
 0xfb2   :  { %548 = vrot.lane.b32.xlu0 %v546_v13, %s3095_s9 }
 0xfb3   :  { %863 = vmatpush.msrb.mxu3 %v3314_v17 }
 0xfb5   :  { %864 = vmatpush.msrb.mxu3 %v3318_v18 }
0x1024   :  { %v549_v19 = vpop.permute.xlu0 %548 }
0x1025   :  { %2733 = vmatmul.msk.f32.vlgmr.msrb.gmra.mxu1 %vm136_vm5, %v549_v19 }
0x102d   :  { %2740 = vmatmul.msk.f32.vlgmr.msra.gmra.mxu1 %vm136_vm5, %v3205_v42  ;;  %v130_v42 = vadd.f32 %v3194_v15, %v129_v22  ;;  %v2838_v22 = vld [vmem:[%s3808_s4] ss:$0 sm:$0xff] }
0x1035   :  { %2741 = vmatmul.msk.f32.gmra.mxu1 %vm136_vm5, %v3224_v8 }
0x103d   :  { %2742 = vmatmul.msk.f32.gmra.mxu1 %vm136_vm5, %v3239_v41 }
0x1045   :  { %2743 = vmatmul.msk.f32.gmra.mxu1 %vm136_vm5, %v3254_v9 }
0x104d   :  { %2744 = vmatmul.msk.f32.gmra.mxu1 %vm136_vm5, %v481_v44 }
0x1055   :  { %2745 = vmatmul.msk.f32.gmra.mxu1 %vm136_vm5, %v549_v19  ;;  %v3322_v19 = vld [vmem:[#allocation2 + $0x68] sm:$0xff] }
0x1056   :  { %789 = vmatpush.msrb.mxu2 %v3322_v19  ;;  %865 = vmatpush.msrb.mxu3 %v3322_v19 }
0x10a2   :  { %v569_v20 = vpop.f32.mrf.mxu1 }
0x10a3   :  { %v592_v21 = vadd.f32 %v569_v20, %v3187_v11  ;;  %v572_v23 = vadd.f32 %v569_v20, %v130_v42  ;;  %v3326_v20 = vld [vmem:[#allocation2 + $0x60] sm:$0xff] }
0x10a4   :  { %790 = vmatpush.msrb.mxu2 %v3326_v20  ;;  %866 = vmatpush.msrb.mxu3 %v3326_v20 }
0x10a5   :  { %594 = vrot.lane.b32.xlu1 %v592_v21, %s3095_s9  ;;  %v2734_v8 = vmul.f32 -1.442695, %v572_v23  ;;  %v2839_v21 = vld [vmem:[%s3806_s2 + $0x3] ss:$0 sm:$0xff] }
0x10a7   :  { %2883 = vpow2.f32 %v2734_v8 }
0x10ad   :  { %v2884_v24 = vpop.eup %2883 }
0x10ae   :  { %v576_v41 = vadd.f32 1.0, %v2884_v24 }
0x10b0   :  { %2885 = vrcp.f32 %v576_v41  ;;  %v588_v29 = vand.u32 2147483648, %v576_v41  ;;  %vm582_vm13 = vweird.f32 %v576_v41  ;;  %v586_v30 = vand.u32 2147483647, %v576_v41 }
0x10b2   :  { %v589_v32 = vor.u32 1.1754944e-38, %v588_v29  ;;  %vm587_vm15 = vcmp.eq.f32.partialorder %v586_v30, 8.507059e+37 }
0x10b6   :  { %v2886_v25 = vpop.eup %2885 }
0x10b7   :  { %v578_v9 = vmul.f32 %v2886_v25, %v576_v41  ;;  %vm583_vm12 = vweird.f32 %v2886_v25 }
0x10b8   :  { %vm584_vm14 = vmor %vm582_vm13, %vm583_vm12 }
0x10b9   :  { %v579_v26 = vsub.f32 1.0, %v578_v9 }
0x10bb   :  { %v580_v27 = vmul.f32 %v2886_v25, %v579_v26  ;;  %v3357_v26 = vld [vmem:[%s3806_s2 + $0x2] ss:$0 sm:$0xff] }
0x10bd   :  { %v581_v28 = vadd.f32 %v2886_v25, %v580_v27  ;;  %v747_v27 = vpop.f32.mrf.mxu1 }
0x10bf   :  { %v585_v31 = vsel %vm584_vm14, %v2886_v25, %v581_v28  ;;  %v748_v28 = vadd.f32 %v3357_v26, %v747_v27 }
0x10c0   :  { %v590_v34 = vsel %vm587_vm15, %v589_v32, %v585_v31 }
0x1117   :  { %v595_v33 = vpop.permute.xlu1 %594 }
0x1118   :  { %v597_v35 = vmul.f32 %v595_v33, %v590_v34 }
0x111a   :  { %599 = vrot.lane.b32.xlu2 %v597_v35, %s3095_s9 }
0x1174   :  { %v600_v36 = vpop.permute.xlu2 %599 }
0x1175   :  { %v602_v37 = vadd.f32 %v600_v36, %v130_v42 }
0x1177   :  { %2887 = vtanh.f32 %v602_v37 }
0x117d   :  { %v2888_v38 = vpop.eup %2887 }
0x117e   :  { %v604_v39 = vsub.f32 %v546_v13, %v2888_v38 }
0x1180   :  { %606 = vrot.lane.b32.xlu0 %v604_v39, %s3097_s12 }
0x11f2   :  { %v607_v40 = vpop.permute.xlu0 %606 }
0x11f3   :  { %v609_v43 = vmul.f32 %v607_v40, %v590_v34 }
0x11f5   :  { %611 = vrot.lane.b32.xlu1 %v609_v43, %s3098_s13 }
0x1267   :  { %v612_v44 = vpop.permute.xlu1 %611 }
0x1268   :  { %v614_v45 = vadd.f32 %v2888_v38, %v612_v44 }
0x126a   :  { %616 = vrot.lane.b32.xlu2 %v614_v45, %s3095_s9 }
0x12c4   :  { %v617_v46 = vpop.permute.xlu2 %616 }
0x12c5   :  { %2735 = vmatmul.msk.f32.vlgmr.msra.gmra.mxu2 %vm136_vm5, %v617_v46  ;;  %2746 = vmatmul.msk.f32.gmra.mxu1 %vm136_vm5, %v617_v46 }
0x12c6   :  { %931 = vmatpush.msra.mxu2 %v3314_v17 }
0x12c8   :  { %932 = vmatpush.msra.mxu2 %v3318_v18 }
0x12ca   :  { %933 = vmatpush.msra.mxu2 %v3322_v19 }
0x12cc   :  { %934 = vmatpush.msra.mxu2 %v3326_v20 }
0x1348   :  { %v637_v47 = vpop.f32.mrf.mxu2 }
0x1349   :  { %v660_v48 = vadd.f32 %v637_v47, %v3187_v11  ;;  %v640_v50 = vadd.f32 %v637_v47, %v133_v49 }
0x134b   :  { %662 = vrot.lane.b32.xlu0 %v660_v48, %s3095_s9  ;;  %v2736_v51 = vmul.f32 -1.442695, %v640_v50 }
0x134d   :  { %2889 = vpow2.f32 %v2736_v51 }
0x1353   :  { %v2890_v52 = vpop.eup %2889 }
0x1354   :  { %v644_v53 = vadd.f32 1.0, %v2890_v52 }
0x1356   :  { %2891 = vrcp.f32 %v644_v53  ;;  %v656_v59 = vand.u32 2147483648, %v644_v53  ;;  %vm650_vm2 = vweird.f32 %v644_v53  ;;  %v654_v11 = vand.u32 2147483647, %v644_v53 }
0x1358   :  { %v657_v61 = vor.u32 1.1754944e-38, %v656_v59  ;;  %vm655_vm4 = vcmp.eq.f32.partialorder %v654_v11, 8.507059e+37  ;;  %v750_v59 = vpop.f32.mrf.mxu1 }
0x1359   :  { %v751_v11 = vadd.f32 %v3357_v26, %v750_v59 }
0x135c   :  { %v2892_v54 = vpop.eup %2891 }
0x135d   :  { %v646_v55 = vmul.f32 %v2892_v54, %v644_v53  ;;  %vm651_vm1 = vweird.f32 %v2892_v54 }
0x135e   :  { %vm652_vm3 = vmor %vm650_vm2, %vm651_vm1 }
0x135f   :  { %v647_v56 = vsub.f32 1.0, %v646_v55 }
0x1361   :  { %v648_v57 = vmul.f32 %v2892_v54, %v647_v56 }
0x1363   :  { %v649_v58 = vadd.f32 %v2892_v54, %v648_v57 }
0x1365   :  { %v653_v60 = vsel %vm652_vm3, %v2892_v54, %v649_v58 }
0x1366   :  { %v658_v15 = vsel %vm655_vm4, %v657_v61, %v653_v60 }
0x13bd   :  { %v663_v10 = vpop.permute.xlu0 %662 }
0x13be   :  { %v665_v62 = vmul.f32 %v663_v10, %v658_v15 }
0x13c0   :  { %667 = vrot.lane.b32.xlu1 %v665_v62, %s3095_s9 }
0x1432   :  { %v668_v63 = vpop.permute.xlu1 %667 }
0x1433   :  { %v670_v0 = vadd.f32 %v668_v63, %v133_v49 }
0x1435   :  { %2893 = vtanh.f32 %v670_v0 }
0x143b   :  { %v2894_v1 = vpop.eup %2893 }
0x143c   :  { %v672_v2 = vsub.f32 %v614_v45, %v2894_v1 }
0x143e   :  { %674 = vrot.lane.b32.xlu2 %v672_v2, %s3097_s12 }
0x1446   :  { %816 = vrot.lane.b32.xlu2 %v2839_v21, %s3095_s9 }
0x1498   :  { %v675_v3 = vpop.permute.xlu2 %674 }
0x1499   :  { %v677_v4 = vmul.f32 %v675_v3, %v658_v15 }
0x149b   :  { %679 = vrot.lane.b32.xlu0 %v677_v4, %s3098_s13 }
0x14a0   :  { %v3350_v41 = vpop.permute.xlu2 %816 }
0x150d   :  { %v680_v13 = vpop.permute.xlu0 %679 }
0x150e   :  { %v3308_v14 = vadd.f32 %v2894_v1, %v680_v13 }
0x1510   :  { %690 = vrot.lane.b32.xlu1 %v3308_v14, %s3095_s9 }
0x1582   :  { %v691_v16 = vpop.permute.xlu1 %690 }
0x1583   :  { %2737 = vmatmul.msk.f32.vlgmr.msra.gmra.mxu3 %vm136_vm5, %v691_v16  ;;  %2747 = vmatmul.msk.f32.gmra.mxu1 %vm136_vm5, %v691_v16 }
0x1584   :  { %999 = vmatpush.msra.mxu3 %v3314_v17 }
0x1586   :  { %1000 = vmatpush.msra.mxu3 %v3318_v18 }
0x1588   :  { %1001 = vmatpush.msra.mxu3 %v3322_v19 }
0x158a   :  { %1002 = vmatpush.msra.mxu3 %v3326_v20 }
0x1606   :  { %v711_v42 = vpop.f32.mrf.mxu3 }
0x1607   :  { %v712_v23 = vadd.f32 %v2838_v22, %v711_v42 }
0x1609   :  { %vm714_vm6 = vcmp.ge.f32.partialorder %v712_v23, 0.0  ;;  %v715_v8 = vmul.f32 0.2, %v712_v23 }
0x160b   :  { %v716_v24 = vsel %vm714_vm6, %v712_v23, %v715_v8 }
0x160c   :  { %2748 = vmatmul.msk.f32.vlgmr.msrb.gmra.mxu2 %vm136_vm5, %v716_v24 }
0x160d   :  { %1067 = vmatpush.msrb.mxu2 %v3314_v17 }
0x160f   :  { %1068 = vmatpush.msrb.mxu2 %v3318_v18 }
0x1611   :  { %1069 = vmatpush.msrb.mxu2 %v3322_v19 }
0x1613   :  { %1070 = vmatpush.msrb.mxu2 %v3326_v20 }
0x168f   :  { %v792_v25 = vpop.f32.mrf.mxu2 }
0x1690   :  { %v819_v9 = vadd.f32 %v3350_v41, %v792_v25  ;;  %v795_v29 = vadd.f32 %v792_v25, %v748_v28 }
0x1692   :  { %821 = vrot.lane.b32.xlu0 %v819_v9, %s3095_s9  ;;  %v2749_v30 = vmul.f32 -1.442695, %v795_v29  ;;  %v753_v29 = vpop.f32.mrf.mxu1 }
0x1694   :  { %2895 = vpow2.f32 %v2749_v30  ;;  %v754_v30 = vadd.f32 %v3357_v26, %v753_v29 }
0x169a   :  { %v2896_v31 = vpop.eup %2895 }
0x169b   :  { %v799_v32 = vadd.f32 1.0, %v2896_v31 }
0x169d   :  { %2897 = vrcp.f32 %v799_v32  ;;  %v811_v38 = vand.u32 2147483648, %v799_v32  ;;  %vm805_vm8 = vweird.f32 %v799_v32  ;;  %v809_v39 = vand.u32 2147483647, %v799_v32 }
0x169f   :  { %v812_v43 = vor.u32 1.1754944e-38, %v811_v38  ;;  %vm810_vm10 = vcmp.eq.f32.partialorder %v809_v39, 8.507059e+37 }
0x16a3   :  { %v2898_v33 = vpop.eup %2897 }
0x16a4   :  { %v801_v34 = vmul.f32 %v2898_v33, %v799_v32  ;;  %vm806_vm7 = vweird.f32 %v2898_v33 }
0x16a5   :  { %vm807_vm9 = vmor %vm805_vm8, %vm806_vm7 }
0x16a6   :  { %v802_v35 = vsub.f32 1.0, %v801_v34 }
0x16a8   :  { %v803_v36 = vmul.f32 %v2898_v33, %v802_v35 }
0x16aa   :  { %v804_v37 = vadd.f32 %v2898_v33, %v803_v36 }
0x16ac   :  { %v808_v40 = vsel %vm807_vm9, %v2898_v33, %v804_v37 }
0x16ad   :  { %v813_v44 = vsel %vm810_vm10, %v812_v43, %v808_v40 }
0x1704   :  { %v822_v45 = vpop.permute.xlu0 %821 }
0x1705   :  { %v824_v46 = vmul.f32 %v822_v45, %v813_v44 }
0x1707   :  { %826 = vrot.lane.b32.xlu1 %v824_v46, %s3095_s9 }
0x1779   :  { %v827_v47 = vpop.permute.xlu1 %826 }
0x177a   :  { %v829_v48 = vadd.f32 %v827_v47, %v748_v28 }
0x177c   :  { %2899 = vtanh.f32 %v829_v48 }
0x1782   :  { %v2900_v49 = vpop.eup %2899 }
0x1783   :  { %832 = vrot.lane.b32.xlu2 %v2900_v49, %s3095_s9 }
0x17dd   :  { %v833_v50 = vpop.permute.xlu2 %832 }
0x17de   :  { %v835_v51 = vsub.f32 %v716_v24, %v833_v50 }
0x17e0   :  { %837 = vrot.lane.b32.xlu0 %v835_v51, %s3098_s13 }
0x1852   :  { %v838_v52 = vpop.permute.xlu0 %837 }
0x1853   :  { %v840_v53 = vmul.f32 %v838_v52, %v813_v44 }
0x1855   :  { %842 = vrot.lane.b32.xlu1 %v840_v53, %s3098_s13 }
0x18c7   :  { %v843_v54 = vpop.permute.xlu1 %842 }
0x18c8   :  { %v845_v55 = vadd.f32 %v2900_v49, %v843_v54 }
0x18ca   :  { %847 = vrot.lane.b32.xlu2 %v845_v55, %s3095_s9 }
0x1924   :  { %v848_v56 = vpop.permute.xlu2 %847 }
0x1925   :  { %2750 = vmatmul.msk.f32.vlgmr.msrb.gmra.mxu3 %vm136_vm5, %v848_v56 }
0x1926   :  { %1135 = vmatpush.msrb.mxu3 %v3314_v17 }
0x1928   :  { %1136 = vmatpush.msrb.mxu3 %v3318_v18 }
0x192a   :  { %1137 = vmatpush.msrb.mxu3 %v3322_v19 }
0x192c   :  { %1138 = vmatpush.msrb.mxu3 %v3326_v20 }
0x19a8   :  { %v868_v57 = vpop.f32.mrf.mxu3 }
0x19a9   :  { %v891_v58 = vadd.f32 %v868_v57, %v3350_v41  ;;  %v871_v60 = vadd.f32 %v868_v57, %v751_v11 }
0x19ab   :  { %893 = vrot.lane.b32.xlu0 %v891_v58, %s3095_s9  ;;  %v2751_v61 = vmul.f32 -1.442695, %v871_v60 }
0x19ad   :  { %2901 = vpow2.f32 %v2751_v61 }
0x19b3   :  { %v2902_v10 = vpop.eup %2901 }
0x19b4   :  { %v875_v15 = vadd.f32 1.0, %v2902_v10 }
0x19b6   :  { %2903 = vrcp.f32 %v875_v15  ;;  %v887_v3 = vand.u32 2147483648, %v875_v15  ;;  %vm881_vm12 = vweird.f32 %v875_v15  ;;  %v885_v4 = vand.u32 2147483647, %v875_v15 }
0x19b8   :  { %v888_v6 = vor.u32 1.1754944e-38, %v887_v3  ;;  %vm886_vm14 = vcmp.eq.f32.partialorder %v885_v4, 8.507059e+37 }
0x19bc   :  { %v2904_v62 = vpop.eup %2903 }
0x19bd   :  { %v877_v63 = vmul.f32 %v2904_v62, %v875_v15  ;;  %vm882_vm11 = vweird.f32 %v2904_v62 }
0x19be   :  { %vm883_vm13 = vmor %vm881_vm12, %vm882_vm11 }
0x19bf   :  { %v878_v0 = vsub.f32 1.0, %v877_v63 }
0x19c1   :  { %v879_v1 = vmul.f32 %v2904_v62, %v878_v0 }
0x19c3   :  { %v880_v2 = vadd.f32 %v2904_v62, %v879_v1 }
0x19c5   :  { %v884_v5 = vsel %vm883_vm13, %v2904_v62, %v880_v2 }
0x19c6   :  { %v889_v12 = vsel %vm886_vm14, %v888_v6, %v884_v5 }
0x1a1d   :  { %v894_v7 = vpop.permute.xlu0 %893 }
0x1a1e   :  { %v896_v13 = vmul.f32 %v894_v7, %v889_v12 }
0x1a20   :  { %898 = vrot.lane.b32.xlu1 %v896_v13, %s3095_s9 }
0x1a92   :  { %v899_v16 = vpop.permute.xlu1 %898 }
0x1a93   :  { %v901_v21 = vadd.f32 %v899_v16, %v751_v11  ;;  %v756_v11 = vpop.f32.mrf.mxu1 }
0x1a94   :  { %v757_v60 = vadd.f32 %v3357_v26, %v756_v11 }
0x1a95   :  { %2905 = vtanh.f32 %v901_v21 }
0x1a9b   :  { %v2906_v22 = vpop.eup %2905 }
0x1a9c   :  { %v903_v42 = vsub.f32 %v845_v55, %v2906_v22 }
0x1a9e   :  { %905 = vrot.lane.b32.xlu2 %v903_v42, %s3097_s12 }
0x1af8   :  { %v906_v23 = vpop.permute.xlu2 %905 }
0x1af9   :  { %v908_v8 = vmul.f32 %v906_v23, %v889_v12 }
0x1afb   :  { %910 = vrot.lane.b32.xlu0 %v908_v8, %s3098_s13 }
0x1b6d   :  { %v911_v24 = vpop.permute.xlu0 %910 }
0x1b6e   :  { %v913_v25 = vadd.f32 %v2906_v22, %v911_v24 }
0x1b70   :  { %915 = vrot.lane.b32.xlu1 %v913_v25, %s3095_s9 }
0x1be2   :  { %v916_v9 = vpop.permute.xlu1 %915 }
0x1be3   :  { %2752 = vmatmul.msk.f32.vlgmr.msra.gmra.mxu2 %vm136_vm5, %v916_v9  ;;  %v759_v9 = vpop.f32.mrf.mxu1 }
0x1be4   :  { %1203 = vmatpush.msra.mxu2 %v3314_v17 }
0x1be6   :  { %1204 = vmatpush.msra.mxu2 %v3318_v18 }
0x1be8   :  { %1205 = vmatpush.msra.mxu2 %v3322_v19 }
0x1bea   :  { %1206 = vmatpush.msra.mxu2 %v3326_v20 }
0x1c66   :  { %v936_v27 = vpop.f32.mrf.mxu2 }
0x1c67   :  { %v959_v28 = vadd.f32 %v936_v27, %v3350_v41  ;;  %v939_v31 = vadd.f32 %v936_v27, %v754_v30  ;;  %v760_v27 = vadd.f32 %v3357_v26, %v759_v9 }
0x1c69   :  { %961 = vrot.lane.b32.xlu2 %v959_v28, %s3095_s9  ;;  %v2753_v32 = vmul.f32 -1.442695, %v939_v31 }
0x1c6b   :  { %2907 = vpow2.f32 %v2753_v32 }
0x1c71   :  { %v2908_v33 = vpop.eup %2907 }
0x1c72   :  { %v943_v34 = vadd.f32 1.0, %v2908_v33 }
0x1c74   :  { %2909 = vrcp.f32 %v943_v34  ;;  %v955_v40 = vand.u32 2147483648, %v943_v34  ;;  %vm949_vm1 = vweird.f32 %v943_v34  ;;  %v953_v43 = vand.u32 2147483647, %v943_v34 }
0x1c76   :  { %v956_v45 = vor.u32 1.1754944e-38, %v955_v40  ;;  %vm954_vm3 = vcmp.eq.f32.partialorder %v953_v43, 8.507059e+37 }
0x1c7a   :  { %v2910_v35 = vpop.eup %2909 }
0x1c7b   :  { %v945_v36 = vmul.f32 %v2910_v35, %v943_v34  ;;  %vm950_vm15 = vweird.f32 %v2910_v35 }
0x1c7c   :  { %vm951_vm2 = vmor %vm949_vm1, %vm950_vm15 }
0x1c7d   :  { %v946_v37 = vsub.f32 1.0, %v945_v36 }
0x1c7f   :  { %v947_v38 = vmul.f32 %v2910_v35, %v946_v37 }
0x1c81   :  { %v948_v39 = vadd.f32 %v2910_v35, %v947_v38 }
0x1c83   :  { %v952_v44 = vsel %vm951_vm2, %v2910_v35, %v948_v39 }
0x1c84   :  { %v957_v47 = vsel %vm954_vm3, %v956_v45, %v952_v44 }
0x1cc3   :  { %v962_v46 = vpop.permute.xlu2 %961 }
0x1cc4   :  { %v964_v48 = vmul.f32 %v962_v46, %v957_v47 }
0x1cc6   :  { %966 = vrot.lane.b32.xlu0 %v964_v48, %s3095_s9 }
0x1d38   :  { %v967_v49 = vpop.permute.xlu0 %966 }
0x1d39   :  { %v969_v50 = vadd.f32 %v967_v49, %v754_v30 }
0x1d3b   :  { %2911 = vtanh.f32 %v969_v50 }
0x1d41   :  { %v2912_v51 = vpop.eup %2911 }
0x1d42   :  { %v971_v52 = vsub.f32 %v913_v25, %v2912_v51 }
0x1d44   :  { %973 = vrot.lane.b32.xlu1 %v971_v52, %s3097_s12 }
0x1db6   :  { %v974_v53 = vpop.permute.xlu1 %973 }
0x1db7   :  { %v976_v54 = vmul.f32 %v974_v53, %v957_v47 }
0x1db9   :  { %978 = vrot.lane.b32.xlu2 %v976_v54, %s3098_s13 }
0x1e13   :  { %v979_v55 = vpop.permute.xlu2 %978 }
0x1e14   :  { %v981_v56 = vadd.f32 %v2912_v51, %v979_v55 }
0x1e16   :  { %983 = vrot.lane.b32.xlu0 %v981_v56, %s3095_s9 }
0x1e88   :  { %v984_v57 = vpop.permute.xlu0 %983 }
0x1e89   :  { %2754 = vmatmul.msk.f32.vlgmr.msra.gmra.mxu3 %vm136_vm5, %v984_v57  ;;  %v762_v57 = vpop.f32.mrf.mxu1 }
0x1e8a   :  { %1271 = vmatpush.msra.mxu3 %v3314_v17 }
0x1e8c   :  { %1272 = vmatpush.msra.mxu3 %v3318_v18 }
0x1e8e   :  { %1273 = vmatpush.msra.mxu3 %v3322_v19 }
0x1e90   :  { %1274 = vmatpush.msra.mxu3 %v3326_v20 }
0x1f0c   :  { %v1004_v58 = vpop.f32.mrf.mxu3 }
0x1f0d   :  { %v1027_v59 = vadd.f32 %v1004_v58, %v3350_v41  ;;  %v1007_v61 = vadd.f32 %v1004_v58, %v757_v60  ;;  %v763_v58 = vadd.f32 %v3357_v26, %v762_v57 }
0x1f0f   :  { %1029 = vrot.lane.b32.xlu1 %v1027_v59, %s3095_s9  ;;  %v2755_v10 = vmul.f32 -1.442695, %v1007_v61 }
0x1f11   :  { %2913 = vpow2.f32 %v2755_v10 }
0x1f17   :  { %v2914_v15 = vpop.eup %2913 }
0x1f18   :  { %v1011_v62 = vadd.f32 1.0, %v2914_v15 }
0x1f1a   :  { %2915 = vrcp.f32 %v1011_v62  ;;  %v1023_v20 = vand.u32 2147483648, %v1011_v62  ;;  %vm1017_vm6 = vweird.f32 %v1011_v62  ;;  %v1021_v1 = vand.u32 2147483647, %v1011_v62 }
0x1f1c   :  { %v1024_v3 = vor.u32 1.1754944e-38, %v1023_v20  ;;  %vm1022_vm8 = vcmp.eq.f32.partialorder %v1021_v1, 8.507059e+37 }
0x1f20   :  { %v2916_v17 = vpop.eup %2915 }
0x1f21   :  { %v1013_v18 = vmul.f32 %v2916_v17, %v1011_v62  ;;  %vm1018_vm4 = vweird.f32 %v2916_v17 }
0x1f22   :  { %vm1019_vm7 = vmor %vm1017_vm6, %vm1018_vm4 }
0x1f23   :  { %v1014_v63 = vsub.f32 1.0, %v1013_v18 }
0x1f25   :  { %v1015_v19 = vmul.f32 %v2916_v17, %v1014_v63 }
0x1f27   :  { %v1016_v0 = vadd.f32 %v2916_v17, %v1015_v19 }
0x1f29   :  { %v1020_v2 = vsel %vm1019_vm7, %v2916_v17, %v1016_v0 }
0x1f2a   :  { %v1025_v5 = vsel %vm1022_vm8, %v1024_v3, %v1020_v2 }
0x1f81   :  { %v1030_v4 = vpop.permute.xlu1 %1029 }
0x1f82   :  { %v1032_v6 = vmul.f32 %v1030_v4, %v1025_v5 }
0x1f84   :  { %1034 = vrot.lane.b32.xlu2 %v1032_v6, %s3095_s9 }
0x1fde   :  { %v1035_v7 = vpop.permute.xlu2 %1034 }
0x1fdf   :  { %v1037_v12 = vadd.f32 %v1035_v7, %v757_v60 }
0x1fe1   :  { %2917 = vtanh.f32 %v1037_v12 }
0x1fe7   :  { %v2918_v13 = vpop.eup %2917 }
0x1fe8   :  { %v1039_v16 = vsub.f32 %v981_v56, %v2918_v13 }
0x1fea   :  { %1041 = vrot.lane.b32.xlu0 %v1039_v16, %s3097_s12 }
0x205c   :  { %v1042_v21 = vpop.permute.xlu0 %1041 }
0x205d   :  { %v1044_v22 = vmul.f32 %v1042_v21, %v1025_v5 }
0x205f   :  { %1046 = vrot.lane.b32.xlu1 %v1044_v22, %s3098_s13 }
0x20d1   :  { %v1047_v42 = vpop.permute.xlu1 %1046 }
0x20d2   :  { %v1049_v23 = vadd.f32 %v2918_v13, %v1047_v42 }
0x20d4   :  { %1051 = vrot.lane.b32.xlu2 %v1049_v23, %s3095_s9 }
0x212e   :  { %v1052_v8 = vpop.permute.xlu2 %1051 }
0x212f   :  { %2756 = vmatmul.msk.f32.vlgmr.msrb.gmra.mxu2 %vm136_vm5, %v1052_v8  ;;  %v765_v8 = vpop.f32.mrf.mxu1 }
0x21b2   :  { %v1072_v24 = vpop.f32.mrf.mxu2 }
0x21b3   :  { %v1095_v25 = vadd.f32 %v1072_v24, %v3350_v41  ;;  %v1075_v28 = vadd.f32 %v1072_v24, %v760_v27  ;;  %v766_v24 = vadd.f32 %v3357_v26, %v765_v8 }
0x21b5   :  { %1097 = vrot.lane.b32.xlu0 %v1095_v25, %s3095_s9  ;;  %v2757_v29 = vmul.f32 -1.442695, %v1075_v28 }
0x21b7   :  { %2919 = vpow2.f32 %v2757_v29 }
0x21bd   :  { %v2920_v30 = vpop.eup %2919 }
0x21be   :  { %v1079_v31 = vadd.f32 1.0, %v2920_v30 }
0x21c0   :  { %2921 = vrcp.f32 %v1079_v31  ;;  %v1091_v37 = vand.u32 2147483648, %v1079_v31  ;;  %vm1085_vm10 = vweird.f32 %v1079_v31  ;;  %v1089_v38 = vand.u32 2147483647, %v1079_v31 }
0x21c2   :  { %v1092_v40 = vor.u32 1.1754944e-38, %v1091_v37  ;;  %vm1090_vm12 = vcmp.eq.f32.partialorder %v1089_v38, 8.507059e+37 }
0x21c6   :  { %v2922_v32 = vpop.eup %2921 }
0x21c7   :  { %v1081_v33 = vmul.f32 %v2922_v32, %v1079_v31  ;;  %vm1086_vm9 = vweird.f32 %v2922_v32 }
0x21c8   :  { %vm1087_vm11 = vmor %vm1085_vm10, %vm1086_vm9 }
0x21c9   :  { %v1082_v34 = vsub.f32 1.0, %v1081_v33 }
0x21cb   :  { %v1083_v35 = vmul.f32 %v2922_v32, %v1082_v34 }
0x21cd   :  { %v1084_v36 = vadd.f32 %v2922_v32, %v1083_v35 }
0x21cf   :  { %v1088_v39 = vsel %vm1087_vm11, %v2922_v32, %v1084_v36 }
0x21d0   :  { %v1093_v44 = vsel %vm1090_vm12, %v1092_v40, %v1088_v39 }
0x2227   :  { %v1098_v43 = vpop.permute.xlu0 %1097 }
0x2228   :  { %v1100_v45 = vmul.f32 %v1098_v43, %v1093_v44 }
0x222a   :  { %1102 = vrot.lane.b32.xlu1 %v1100_v45, %s3095_s9 }
0x229c   :  { %v1103_v46 = vpop.permute.xlu1 %1102 }
0x229d   :  { %v1105_v47 = vadd.f32 %v1103_v46, %v760_v27 }
0x229f   :  { %2923 = vtanh.f32 %v1105_v47 }
0x22a5   :  { %v2924_v48 = vpop.eup %2923 }
0x22a6   :  { %v1107_v49 = vsub.f32 %v1049_v23, %v2924_v48 }
0x22a8   :  { %1109 = vrot.lane.b32.xlu2 %v1107_v49, %s3097_s12 }
0x2302   :  { %v1110_v50 = vpop.permute.xlu2 %1109 }
0x2303   :  { %v1112_v51 = vmul.f32 %v1110_v50, %v1093_v44 }
0x2305   :  { %1114 = vrot.lane.b32.xlu0 %v1112_v51, %s3098_s13 }
0x2377   :  { %v1115_v52 = vpop.permute.xlu0 %1114 }
0x2378   :  { %v1117_v53 = vadd.f32 %v2924_v48, %v1115_v52 }
0x237a   :  { %1119 = vrot.lane.b32.xlu1 %v1117_v53, %s3095_s9 }
0x23ec   :  { %v1120_v54 = vpop.permute.xlu1 %1119 }
0x23ed   :  { %2758 = vmatmul.msk.f32.vlgmr.msrb.gmra.mxu3 %vm136_vm5, %v1120_v54  ;;  %v768_v54 = vpop.f32.mrf.mxu1 }
0x2470   :  { %v1140_v55 = vpop.f32.mrf.mxu3 }
0x2471   :  { %v1163_v56 = vadd.f32 %v1140_v55, %v3350_v41  ;;  %v1143_v59 = vadd.f32 %v1140_v55, %v763_v58  ;;  %v769_v55 = vadd.f32 %v3357_v26, %v768_v54 }
0x2473   :  { %1165 = vrot.lane.b32.xlu2 %v1163_v56, %s3095_s9  ;;  %v2759_v11 = vmul.f32 -1.442695, %v1143_v59 }
0x2475   :  { %2925 = vpow2.f32 %v2759_v11 }
0x247b   :  { %v2926_v60 = vpop.eup %2925 }
0x247c   :  { %v1147_v61 = vadd.f32 1.0, %v2926_v60 }
0x247e   :  { %2927 = vrcp.f32 %v1147_v61  ;;  %v1159_v63 = vand.u32 2147483648, %v1147_v61  ;;  %vm1153_vm14 = vweird.f32 %v1147_v61  ;;  %v1157_v19 = vand.u32 2147483647, %v1147_v61 }
0x2480   :  { %v1160_v20 = vor.u32 1.1754944e-38, %v1159_v63  ;;  %vm1158_vm1 = vcmp.eq.f32.partialorder %v1157_v19, 8.507059e+37 }
0x2484   :  { %v2928_v10 = vpop.eup %2927 }
0x2485   :  { %v1149_v15 = vmul.f32 %v2928_v10, %v1147_v61  ;;  %vm1154_vm13 = vweird.f32 %v2928_v10 }
0x2486   :  { %vm1155_vm15 = vmor %vm1153_vm14, %vm1154_vm13 }
0x2487   :  { %v1150_v62 = vsub.f32 1.0, %v1149_v15 }
0x2489   :  { %v1151_v17 = vmul.f32 %v2928_v10, %v1150_v62 }
0x248b   :  { %v1152_v18 = vadd.f32 %v2928_v10, %v1151_v17 }
0x248d   :  { %v1156_v0 = vsel %vm1155_vm15, %v2928_v10, %v1152_v18 }
0x248e   :  { %v1161_v2 = vsel %vm1158_vm1, %v1160_v20, %v1156_v0 }
0x24cd   :  { %v1166_v1 = vpop.permute.xlu2 %1165 }
0x24ce   :  { %v1168_v3 = vmul.f32 %v1166_v1, %v1161_v2 }
0x24d0   :  { %1170 = vrot.lane.b32.xlu0 %v1168_v3, %s3095_s9 }
0x2542   :  { %v1171_v4 = vpop.permute.xlu0 %1170 }
0x2543   :  { %v1173_v5 = vadd.f32 %v1171_v4, %v763_v58 }
0x2545   :  { %2929 = vtanh.f32 %v1173_v5  ;;  %v1327_v5 = vld [vmem:[#allocation4 + $0x38] sm:$0xff] }
0x2546   :  { %1347 = vmatpush.msrb.mxu2 %v1327_v5 }
0x254b   :  { %v2930_v6 = vpop.eup %2929 }
0x254c   :  { %v1175_v7 = vsub.f32 %v1117_v53, %v2930_v6 }
0x254e   :  { %1177 = vrot.lane.b32.xlu1 %v1175_v7, %s3097_s12  ;;  %v1326_v7 = vld [vmem:[#allocation4 + $0x30] sm:$0xff] }
0x254f   :  { %1348 = vmatpush.msrb.mxu2 %v1326_v7 }
0x25c0   :  { %v1178_v12 = vpop.permute.xlu1 %1177 }
0x25c1   :  { %v1180_v13 = vmul.f32 %v1178_v12, %v1161_v2  ;;  %v1361_v12 = vld [vmem:[#allocation2 + $0x90] sm:$0xff] }
0x25c3   :  { %1182 = vrot.lane.b32.xlu2 %v1180_v13, %s3098_s13  ;;  %v1325_v13 = vld [vmem:[#allocation4 + $0x28] sm:$0xff] }
0x25c4   :  { %1349 = vmatpush.msrb.mxu2 %v1325_v13 }
0x261d   :  { %v1183_v16 = vpop.permute.xlu2 %1182 }
0x261e   :  { %v1185_v21 = vadd.f32 %v2930_v6, %v1183_v16  ;;  %v1362_v6 = vld [vmem:[#allocation2 + $0x98] sm:$0xff]  ;;  %v1360_v16 = vld [vmem:[#allocation2 + $0x88] sm:$0xff] }
0x261f   :  { %1383 = vmatpush.msrb.mxu3 %v1362_v6 }
0x2620   :  { %1187 = vrot.lane.b32.xlu0 %v1185_v21, %s3095_s9 }
0x2621   :  { %1384 = vmatpush.msrb.mxu3 %v1361_v12 }
0x2623   :  { %1385 = vmatpush.msrb.mxu3 %v1360_v16 }
0x2692   :  { %v1188_v22 = vpop.permute.xlu0 %1187 }
0x2693   :  { %2760 = vmatmul.msk.f32.vlgmr.msra.gmra.mxu2 %vm136_vm5, %v1188_v22  ;;  %v1359_v22 = vld [vmem:[#allocation2 + $0x80] sm:$0xff] }
0x2694   :  { %1386 = vmatpush.msrb.mxu3 %v1359_v22 }
0x2716   :  { %v1208_v42 = vpop.f32.mrf.mxu2 }
0x2717   :  { %v1231_v23 = vadd.f32 %v1208_v42, %v3350_v41  ;;  %v1211_v25 = vadd.f32 %v1208_v42, %v766_v24 }
0x2719   :  { %1233 = vrot.lane.b32.xlu1 %v1231_v23, %s3095_s9  ;;  %v2761_v9 = vmul.f32 -1.442695, %v1211_v25 }
0x271b   :  { %2931 = vpow2.f32 %v2761_v9  ;;  %v3441_v9 = vld [vmem:[#allocation2 + $0xb0] sm:$0xff] }
0x2721   :  { %v2932_v27 = vpop.eup %2931 }
0x2722   :  { %v1215_v28 = vadd.f32 1.0, %v2932_v27  ;;  %v3450_v27 = vld [vmem:[#allocation2 + $0xa0] sm:$0xff] }
0x2724   :  { %2933 = vrcp.f32 %v1215_v28  ;;  %v1227_v34 = vand.u32 2147483648, %v1215_v28  ;;  %vm1221_vm3 = vweird.f32 %v1215_v28  ;;  %v1225_v35 = vand.u32 2147483647, %v1215_v28 }
0x2726   :  { %v1228_v37 = vor.u32 1.1754944e-38, %v1227_v34  ;;  %vm1226_vm6 = vcmp.eq.f32.partialorder %v1225_v35, 8.507059e+37 }
0x272a   :  { %v2934_v29 = vpop.eup %2933 }
0x272b   :  { %v1217_v30 = vmul.f32 %v2934_v29, %v1215_v28  ;;  %vm1222_vm2 = vweird.f32 %v2934_v29  ;;  %v2842_v28 = vld [vmem:[%s3806_s2 + $0x5] ss:$0 sm:$0xff] }
0x272c   :  { %vm1223_vm4 = vmor %vm1221_vm3, %vm1222_vm2 }
0x272d   :  { %v1218_v31 = vsub.f32 1.0, %v1217_v30 }
0x272f   :  { %v1219_v32 = vmul.f32 %v2934_v29, %v1218_v31 }
0x2731   :  { %v1220_v33 = vadd.f32 %v2934_v29, %v1219_v32 }
0x2733   :  { %v1224_v36 = vsel %vm1223_vm4, %v2934_v29, %v1220_v33  ;;  %v2840_v29 = vld [vmem:[%s3808_s4 + $0x1] ss:$0 sm:$0xff] }
0x2734   :  { %v1229_v39 = vsel %vm1226_vm6, %v1228_v37, %v1224_v36  ;;  %v2841_v37 = vld [vmem:[%s3806_s2 + $0x4] ss:$0 sm:$0xff] }
0x278b   :  { %v1234_v38 = vpop.permute.xlu1 %1233 }
0x278c   :  { %v1236_v40 = vmul.f32 %v1234_v38, %v1229_v39 }
0x278e   :  { %1238 = vrot.lane.b32.xlu2 %v1236_v40, %s3095_s9 }
0x27e8   :  { %v1239_v43 = vpop.permute.xlu2 %1238 }
0x27e9   :  { %v1241_v44 = vadd.f32 %v1239_v43, %v766_v24  ;;  %v3434_v24 = vld [vmem:[#allocation2 + $0xb8] sm:$0xff] }
0x27ea   :  { %1619 = vmatpush.msrb.mxu0 %v3434_v24 }
0x27eb   :  { %2935 = vtanh.f32 %v1241_v44 }
0x27ec   :  { %1620 = vmatpush.msrb.mxu0 %v3441_v9 }
0x27f1   :  { %v2936_v45 = vpop.eup %2935 }
0x27f2   :  { %v1243_v46 = vsub.f32 %v1185_v21, %v2936_v45  ;;  %v1324_v21 = vld [vmem:[#allocation4 + $0x20] sm:$0xff] }
0x27f3   :  { %1350 = vmatpush.msrb.mxu2 %v1324_v21 }
0x27f4   :  { %1245 = vrot.lane.b32.xlu0 %v1243_v46, %s3097_s12 }
0x27f5   :  { %1407 = vmatpush.msra.mxu2 %v3434_v24 }
0x27f7   :  { %1408 = vmatpush.msra.mxu2 %v3441_v9 }
0x2866   :  { %v1246_v47 = vpop.permute.xlu0 %1245 }
0x2867   :  { %v1248_v48 = vmul.f32 %v1246_v47, %v1229_v39 }
0x2869   :  { %1250 = vrot.lane.b32.xlu1 %v1248_v48, %s3098_s13 }
0x28db   :  { %v1251_v49 = vpop.permute.xlu1 %1250 }
0x28dc   :  { %v1253_v50 = vadd.f32 %v2936_v45, %v1251_v49 }
0x28de   :  { %1255 = vrot.lane.b32.xlu2 %v1253_v50, %s3095_s9 }
0x2938   :  { %v1256_v51 = vpop.permute.xlu2 %1255 }
0x2939   :  { %2762 = vmatmul.msk.f32.vlgmr.msra.gmra.mxu3 %vm136_vm5, %v1256_v51 }
0x293a   :  { %1551 = vmatpush.msra.mxu3 %v3434_v24 }
0x293c   :  { %1552 = vmatpush.msra.mxu3 %v3441_v9 }
0x29bc   :  { %v1276_v52 = vpop.f32.mrf.mxu3 }
0x29bd   :  { %v1299_v53 = vadd.f32 %v1276_v52, %v3350_v41  ;;  %v1279_v56 = vadd.f32 %v1276_v52, %v769_v55 }
0x29bf   :  { %1301 = vrot.lane.b32.xlu0 %v1299_v53, %s3095_s9  ;;  %v2763_v57 = vmul.f32 -1.442695, %v1279_v56 }
0x29c1   :  { %2937 = vpow2.f32 %v2763_v57 }
0x29c7   :  { %v2938_v58 = vpop.eup %2937 }
0x29c8   :  { %v1283_v59 = vadd.f32 1.0, %v2938_v58 }
0x29ca   :  { %2939 = vrcp.f32 %v1283_v59  ;;  %v1295_v62 = vand.u32 2147483648, %v1283_v59  ;;  %vm1289_vm8 = vweird.f32 %v1283_v59  ;;  %v1293_v41 = vand.u32 2147483647, %v1283_v59 }
0x29cc   :  { %v1296_v18 = vor.u32 1.1754944e-38, %v1295_v62  ;;  %vm1294_vm10 = vcmp.eq.f32.partialorder %v1293_v41, 8.507059e+37 }
0x29d0   :  { %v2940_v11 = vpop.eup %2939 }
0x29d1   :  { %v1285_v60 = vmul.f32 %v2940_v11, %v1283_v59  ;;  %vm1290_vm7 = vweird.f32 %v2940_v11 }
0x29d2   :  { %vm1291_vm9 = vmor %vm1289_vm8, %vm1290_vm7 }
0x29d3   :  { %v1286_v61 = vsub.f32 1.0, %v1285_v60 }
0x29d5   :  { %v1287_v10 = vmul.f32 %v2940_v11, %v1286_v61 }
0x29d7   :  { %v1288_v15 = vadd.f32 %v2940_v11, %v1287_v10 }
0x29d9   :  { %v1292_v17 = vsel %vm1291_vm9, %v2940_v11, %v1288_v15 }
0x29da   :  { %v1297_v63 = vsel %vm1294_vm10, %v1296_v18, %v1292_v17 }
0x2a31   :  { %v1302_v26 = vpop.permute.xlu0 %1301 }
0x2a32   :  { %v1304_v19 = vmul.f32 %v1302_v26, %v1297_v63 }
0x2a34   :  { %1306 = vrot.lane.b32.xlu1 %v1304_v19, %s3095_s9 }
0x2aa6   :  { %v1307_v0 = vpop.permute.xlu1 %1306 }
0x2aa7   :  { %v1309_v20 = vadd.f32 %v1307_v0, %v769_v55 }
0x2aa9   :  { %2941 = vtanh.f32 %v1309_v20 }
0x2aaf   :  { %v2942_v1 = vpop.eup %2941 }
0x2ab0   :  { %v1311_v2 = vsub.f32 %v1253_v50, %v2942_v1 }
0x2ab2   :  { %1313 = vrot.lane.b32.xlu2 %v1311_v2, %s3097_s12 }
0x2aba   :  { %1436 = vrot.lane.b32.xlu2 %v2842_v28, %s3095_s9 }
0x2b0c   :  { %v1314_v3 = vpop.permute.xlu2 %1313 }
0x2b0d   :  { %v1316_v4 = vmul.f32 %v1314_v3, %v1297_v63 }
0x2b0f   :  { %1318 = vrot.lane.b32.xlu0 %v1316_v4, %s3098_s13 }
0x2b14   :  { %v3480_v34 = vpop.permute.xlu2 %1436 }
0x2b81   :  { %v1319_v42 = vpop.permute.xlu0 %1318 }
0x2b82   :  { %v1321_v23 = vadd.f32 %v2942_v1, %v1319_v42 }
0x2b84   :  { %v1322_v8 = vadd.f32 %v1321_v23, %v3308_v14  ;;  %v3445_v14 = vld [vmem:[#allocation2 + $0xa8] sm:$0xff] }
0x2b85   :  { %1409 = vmatpush.msra.mxu2 %v3445_v14  ;;  %1553 = vmatpush.msra.mxu3 %v3445_v14 }
0x2b86   :  { %1331 = vrot.lane.b32.xlu1 %v1322_v8, %s3095_s9  ;;  %1621 = vmatpush.msrb.mxu0 %v3445_v14 }
0x2b87   :  { %1410 = vmatpush.msra.mxu2 %v3450_v27  ;;  %1554 = vmatpush.msra.mxu3 %v3450_v27 }
0x2b88   :  { %1622 = vmatpush.msrb.mxu0 %v3450_v27 }
0x2b8a   :  { %1823 = vmatpush.msra.mxu0 %v3434_v24 }
0x2b8c   :  { %1824 = vmatpush.msra.mxu0 %v3441_v9 }
0x2b8e   :  { %1825 = vmatpush.msra.mxu0 %v3445_v14 }
0x2b90   :  { %1826 = vmatpush.msra.mxu0 %v3450_v27 }
0x2bf8   :  { %v1332_v25 = vpop.permute.xlu1 %1331 }
0x2bf9   :  { %2764 = vmatmul.msk.f32.vlgmr.msrb.gmra.mxu2 %vm136_vm5, %v1332_v25  ;;  %2767 = vmatmul.msk.f32.vlgmr.msrb.gmra.mxu3 %vm136_vm5, %v1332_v25 }
0x2bfa   :  { %1483 = vmatpush.msrb.mxu2 %v3434_v24  ;;  %1755 = vmatpush.msrb.mxu3 %v3434_v24 }
0x2bfc   :  { %1484 = vmatpush.msrb.mxu2 %v3441_v9  ;;  %1756 = vmatpush.msrb.mxu3 %v3441_v9 }
0x2bfe   :  { %1485 = vmatpush.msrb.mxu2 %v3445_v14  ;;  %1757 = vmatpush.msrb.mxu3 %v3445_v14 }
0x2c00   :  { %1486 = vmatpush.msrb.mxu2 %v3450_v27  ;;  %1758 = vmatpush.msrb.mxu3 %v3450_v27 }
0x2c7c   :  { %v1352_v30 = vpop.f32.mrf.mxu2  ;;  %v1388_v38 = vpop.f32.mrf.mxu3 }
0x2c7d   :  { %v1353_v31 = vadd.f32 %v2840_v29, %v1352_v30  ;;  %v3487_v39 = vadd.f32 %v2841_v37, %v1388_v38 }
0x2c7f   :  { %vm1355_vm11 = vcmp.ge.f32.partialorder %v1353_v31, 0.0  ;;  %v1356_v32 = vmul.f32 0.2, %v1353_v31 }
0x2c81   :  { %v1357_v33 = vsel %vm1355_vm11, %v1353_v31, %v1356_v32 }
0x2c82   :  { %2768 = vmatmul.msk.f32.vlgmr.msra.gmra.mxu2 %vm136_vm5, %v1357_v33 }
0x2c83   :  { %1687 = vmatpush.msra.mxu2 %v3434_v24 }
0x2c85   :  { %1688 = vmatpush.msra.mxu2 %v3441_v9 }
0x2c87   :  { %1689 = vmatpush.msra.mxu2 %v3445_v14 }
0x2c89   :  { %1690 = vmatpush.msra.mxu2 %v3450_v27 }
0x2d05   :  { %v1412_v35 = vpop.f32.mrf.mxu2 }
0x2d06   :  { %v1439_v36 = vadd.f32 %v3480_v34, %v1412_v35  ;;  %v1415_v40 = vadd.f32 %v1412_v35, %v3487_v39 }
0x2d08   :  { %1441 = vrot.lane.b32.xlu0 %v1439_v36, %s3095_s9  ;;  %v2769_v43 = vmul.f32 -1.442695, %v1415_v40 }
0x2d0a   :  { %2943 = vpow2.f32 %v2769_v43 }
0x2d10   :  { %v2944_v44 = vpop.eup %2943 }
0x2d11   :  { %v1419_v45 = vadd.f32 1.0, %v2944_v44 }
0x2d13   :  { %2945 = vrcp.f32 %v1419_v45  ;;  %v1431_v51 = vand.u32 2147483648, %v1419_v45  ;;  %vm1425_vm13 = vweird.f32 %v1419_v45  ;;  %v1429_v52 = vand.u32 2147483647, %v1419_v45 }
0x2d15   :  { %v1432_v54 = vor.u32 1.1754944e-38, %v1431_v51  ;;  %vm1430_vm15 = vcmp.eq.f32.partialorder %v1429_v52, 8.507059e+37 }
0x2d19   :  { %v2946_v46 = vpop.eup %2945 }
0x2d1a   :  { %v1421_v47 = vmul.f32 %v2946_v46, %v1419_v45  ;;  %vm1426_vm12 = vweird.f32 %v2946_v46 }
0x2d1b   :  { %vm1427_vm14 = vmor %vm1425_vm13, %vm1426_vm12 }
0x2d1c   :  { %v1422_v48 = vsub.f32 1.0, %v1421_v47 }
0x2d1e   :  { %v1423_v49 = vmul.f32 %v2946_v46, %v1422_v48 }
0x2d20   :  { %v1424_v50 = vadd.f32 %v2946_v46, %v1423_v49 }
0x2d22   :  { %v1428_v53 = vsel %vm1427_vm14, %v2946_v46, %v1424_v50 }
0x2d23   :  { %v1433_v55 = vsel %vm1430_vm15, %v1432_v54, %v1428_v53 }
0x2d7a   :  { %v1442_v56 = vpop.permute.xlu0 %1441 }
0x2d7b   :  { %v1444_v57 = vmul.f32 %v1442_v56, %v1433_v55 }
0x2d7d   :  { %1446 = vrot.lane.b32.xlu1 %v1444_v57, %s3095_s9 }
0x2def   :  { %v1447_v58 = vpop.permute.xlu1 %1446 }
0x2df0   :  { %v1449_v59 = vadd.f32 %v1447_v58, %v3487_v39 }
0x2df2   :  { %2947 = vtanh.f32 %v1449_v59 }
0x2df8   :  { %v2948_v11 = vpop.eup %2947 }
0x2df9   :  { %1452 = vrot.lane.b32.xlu2 %v2948_v11, %s3095_s9 }
0x2e53   :  { %v1453_v60 = vpop.permute.xlu2 %1452 }
0x2e54   :  { %v1455_v61 = vsub.f32 %v1357_v33, %v1453_v60 }
0x2e56   :  { %1457 = vrot.lane.b32.xlu0 %v1455_v61, %s3098_s13 }
0x2ec8   :  { %v1458_v10 = vpop.permute.xlu0 %1457 }
0x2ec9   :  { %v1460_v15 = vmul.f32 %v1458_v10, %v1433_v55 }
0x2ecb   :  { %1462 = vrot.lane.b32.xlu1 %v1460_v15, %s3098_s13 }
0x2f3d   :  { %v1463_v62 = vpop.permute.xlu1 %1462 }
0x2f3e   :  { %v1465_v41 = vadd.f32 %v2948_v11, %v1463_v62 }
0x2f40   :  { %1467 = vrot.lane.b32.xlu2 %v1465_v41, %s3095_s9 }
0x2f9a   :  { %v3496_v17 = vpop.permute.xlu2 %1467 }
0x2f9b   :  { %2770 = vmatmul.msk.f32.vlgmr.msrb.gmra.mxu2 %vm136_vm5, %v3496_v17 }
0x2f9c   :  { %1891 = vmatpush.msrb.mxu2 %v3434_v24 }
0x2f9e   :  { %1892 = vmatpush.msrb.mxu2 %v3441_v9 }
0x2fa0   :  { %1893 = vmatpush.msrb.mxu2 %v3445_v14 }
0x2fa2   :  { %1894 = vmatpush.msrb.mxu2 %v3450_v27 }
0x301e   :  { %v1488_v18 = vpop.f32.mrf.mxu2 }
0x301f   :  { %v1511_v26 = vadd.f32 %v1488_v18, %v3480_v34  ;;  %v1491_v63 = vadd.f32 %v1488_v18, %v3487_v39 }
0x3021   :  { %1513 = vrot.lane.b32.xlu0 %v1511_v26, %s3095_s9  ;;  %v2771_v19 = vmul.f32 -1.442695, %v1491_v63 }
0x3023   :  { %2949 = vpow2.f32 %v2771_v19 }
0x3029   :  { %v2950_v0 = vpop.eup %2949 }
0x302a   :  { %v1495_v20 = vadd.f32 1.0, %v2950_v0 }
0x302c   :  { %2951 = vrcp.f32 %v1495_v20  ;;  %v1507_v6 = vand.u32 2147483648, %v1495_v20  ;;  %vm1501_vm2 = vweird.f32 %v1495_v20  ;;  %v1505_v7 = vand.u32 2147483647, %v1495_v20 }
0x302e   :  { %v1508_v13 = vor.u32 1.1754944e-38, %v1507_v6  ;;  %vm1506_vm4 = vcmp.eq.f32.partialorder %v1505_v7, 8.507059e+37 }
0x3032   :  { %v2952_v1 = vpop.eup %2951 }
0x3033   :  { %v1497_v2 = vmul.f32 %v2952_v1, %v1495_v20  ;;  %vm1502_vm1 = vweird.f32 %v2952_v1 }
0x3034   :  { %vm1503_vm3 = vmor %vm1501_vm2, %vm1502_vm1 }
0x3035   :  { %v1498_v3 = vsub.f32 1.0, %v1497_v2 }
0x3037   :  { %v1499_v4 = vmul.f32 %v2952_v1, %v1498_v3 }
0x3039   :  { %v1500_v5 = vadd.f32 %v2952_v1, %v1499_v4 }
0x303b   :  { %v1504_v12 = vsel %vm1503_vm3, %v2952_v1, %v1500_v5 }
0x303c   :  { %v1509_v21 = vsel %vm1506_vm4, %v1508_v13, %v1504_v12 }
0x3093   :  { %v1514_v16 = vpop.permute.xlu0 %1513 }
0x3094   :  { %v1516_v22 = vmul.f32 %v1514_v16, %v1509_v21 }
0x3096   :  { %1518 = vrot.lane.b32.xlu1 %v1516_v22, %s3095_s9 }
0x3108   :  { %v1519_v42 = vpop.permute.xlu1 %1518 }
0x3109   :  { %v1521_v23 = vadd.f32 %v1519_v42, %v3487_v39 }
0x310b   :  { %2953 = vtanh.f32 %v1521_v23 }
0x3111   :  { %v2954_v8 = vpop.eup %2953 }
0x3112   :  { %v1523_v24 = vsub.f32 %v1465_v41, %v2954_v8 }
0x3114   :  { %1525 = vrot.lane.b32.xlu2 %v1523_v24, %s3097_s12 }
0x316e   :  { %v1526_v25 = vpop.permute.xlu2 %1525 }
0x316f   :  { %v1528_v9 = vmul.f32 %v1526_v25, %v1509_v21 }
0x3171   :  { %1530 = vrot.lane.b32.xlu0 %v1528_v9, %s3098_s13 }
0x31e3   :  { %v1531_v14 = vpop.permute.xlu0 %1530 }
0x31e4   :  { %v1533_v27 = vadd.f32 %v2954_v8, %v1531_v14 }
0x31e6   :  { %1535 = vrot.lane.b32.xlu1 %v1533_v27, %s3095_s9 }
0x3258   :  { %v3512_v28 = vpop.permute.xlu1 %1535 }
0x3259   :  { %2772 = vmatmul.msk.f32.vlgmr.msra.gmra.mxu3 %vm136_vm5, %v3512_v28 }
0x32dc   :  { %v1556_v29 = vpop.f32.mrf.mxu3 }
0x32dd   :  { %v1579_v30 = vadd.f32 %v1556_v29, %v3480_v34  ;;  %v1559_v31 = vadd.f32 %v1556_v29, %v3487_v39 }
0x32df   :  { %1581 = vrot.lane.b32.xlu2 %v1579_v30, %s3095_s9  ;;  %v2773_v32 = vmul.f32 -1.442695, %v1559_v31 }
0x32e1   :  { %2955 = vpow2.f32 %v2773_v32 }
0x32e7   :  { %v2956_v33 = vpop.eup %2955 }
0x32e8   :  { %v1563_v35 = vadd.f32 1.0, %v2956_v33 }
0x32ea   :  { %2957 = vrcp.f32 %v1563_v35  ;;  %v1575_v44 = vand.u32 2147483648, %v1563_v35  ;;  %vm1569_vm7 = vweird.f32 %v1563_v35  ;;  %v1573_v45 = vand.u32 2147483647, %v1563_v35 }
0x32ec   :  { %v1576_v47 = vor.u32 1.1754944e-38, %v1575_v44  ;;  %vm1574_vm9 = vcmp.eq.f32.partialorder %v1573_v45, 8.507059e+37 }
0x32f0   :  { %v2958_v36 = vpop.eup %2957 }
0x32f1   :  { %v1565_v37 = vmul.f32 %v2958_v36, %v1563_v35  ;;  %vm1570_vm6 = vweird.f32 %v2958_v36 }
0x32f2   :  { %vm1571_vm8 = vmor %vm1569_vm7, %vm1570_vm6 }
0x32f3   :  { %v1566_v38 = vsub.f32 1.0, %v1565_v37 }
0x32f5   :  { %v1567_v40 = vmul.f32 %v2958_v36, %v1566_v38 }
0x32f7   :  { %v1568_v43 = vadd.f32 %v2958_v36, %v1567_v40 }
0x32f9   :  { %v1572_v46 = vsel %vm1571_vm8, %v2958_v36, %v1568_v43 }
0x32fa   :  { %v1577_v49 = vsel %vm1574_vm9, %v1576_v47, %v1572_v46 }
0x3339   :  { %v1582_v48 = vpop.permute.xlu2 %1581 }
0x333a   :  { %v1584_v50 = vmul.f32 %v1582_v48, %v1577_v49 }
0x333c   :  { %1586 = vrot.lane.b32.xlu0 %v1584_v50, %s3095_s9 }
0x33ae   :  { %v1587_v51 = vpop.permute.xlu0 %1586 }
0x33af   :  { %v1589_v52 = vadd.f32 %v1587_v51, %v3487_v39 }
0x33b1   :  { %2959 = vtanh.f32 %v1589_v52 }
0x33b7   :  { %v2960_v53 = vpop.eup %2959 }
0x33b8   :  { %v1591_v54 = vsub.f32 %v1533_v27, %v2960_v53 }
0x33ba   :  { %1593 = vrot.lane.b32.xlu1 %v1591_v54, %s3097_s12 }
0x342c   :  { %v1594_v55 = vpop.permute.xlu1 %1593 }
0x342d   :  { %v1596_v56 = vmul.f32 %v1594_v55, %v1577_v49 }
0x342f   :  { %1598 = vrot.lane.b32.xlu2 %v1596_v56, %s3098_s13 }
0x3489   :  { %v1599_v57 = vpop.permute.xlu2 %1598 }
0x348a   :  { %v1601_v58 = vadd.f32 %v2960_v53, %v1599_v57 }
0x348c   :  { %1603 = vrot.lane.b32.xlu0 %v1601_v58, %s3095_s9 }
0x34fe   :  { %v3524_v59 = vpop.permute.xlu0 %1603 }
0x34ff   :  { %2774 = vmatmul.msk.f32.vlgmr.msrb.gmra.mxu0 %vm136_vm5, %v3524_v59 }
0x357c   :  { %v1624_v11 = vpop.f32.mrf.mxu0 }
0x357d   :  { %v1647_v60 = vadd.f32 %v1624_v11, %v3480_v34  ;;  %v1627_v61 = vadd.f32 %v1624_v11, %v3487_v39 }
0x357f   :  { %1649 = vrot.lane.b32.xlu1 %v1647_v60, %s3095_s9  ;;  %v2775_v10 = vmul.f32 -1.442695, %v1627_v61 }
0x3581   :  { %2961 = vpow2.f32 %v2775_v10 }
0x3587   :  { %v2962_v15 = vpop.eup %2961 }
0x3588   :  { %v1631_v62 = vadd.f32 1.0, %v2962_v15 }
0x358a   :  { %2963 = vrcp.f32 %v1631_v62  ;;  %v1643_v0 = vand.u32 2147483648, %v1631_v62  ;;  %vm1637_vm11 = vweird.f32 %v1631_v62  ;;  %v1641_v20 = vand.u32 2147483647, %v1631_v62 }
0x358c   :  { %v1644_v2 = vor.u32 1.1754944e-38, %v1643_v0  ;;  %vm1642_vm13 = vcmp.eq.f32.partialorder %v1641_v20, 8.507059e+37 }
0x3590   :  { %v2964_v41 = vpop.eup %2963 }
0x3591   :  { %v1633_v18 = vmul.f32 %v2964_v41, %v1631_v62  ;;  %vm1638_vm10 = vweird.f32 %v2964_v41 }
0x3592   :  { %vm1639_vm12 = vmor %vm1637_vm11, %vm1638_vm10 }
0x3593   :  { %v1634_v26 = vsub.f32 1.0, %v1633_v18 }
0x3595   :  { %v1635_v63 = vmul.f32 %v2964_v41, %v1634_v26 }
0x3597   :  { %v1636_v19 = vadd.f32 %v2964_v41, %v1635_v63 }
0x3599   :  { %v1640_v1 = vsel %vm1639_vm12, %v2964_v41, %v1636_v19 }
0x359a   :  { %v1645_v4 = vsel %vm1642_vm13, %v1644_v2, %v1640_v1 }
0x35f1   :  { %v1650_v3 = vpop.permute.xlu1 %1649 }
0x35f2   :  { %v1652_v5 = vmul.f32 %v1650_v3, %v1645_v4 }
0x35f4   :  { %1654 = vrot.lane.b32.xlu2 %v1652_v5, %s3095_s9 }
0x364e   :  { %v1655_v6 = vpop.permute.xlu2 %1654 }
0x364f   :  { %v1657_v7 = vadd.f32 %v1655_v6, %v3487_v39 }
0x3651   :  { %2965 = vtanh.f32 %v1657_v7 }
0x3657   :  { %v2966_v12 = vpop.eup %2965 }
0x3658   :  { %v1659_v13 = vsub.f32 %v1601_v58, %v2966_v12 }
0x365a   :  { %1661 = vrot.lane.b32.xlu0 %v1659_v13, %s3097_s12  ;;  %v1981_v13 = vld [vmem:[#allocation2 + $0xd8] sm:$0xff] }
0x365b   :  { %2000 = vmatpush.msrb.mxu0 %v1981_v13  ;;  %v1944_v13 = vld [vmem:[#allocation4 + $0x48] sm:$0xff] }
0x36cc   :  { %v1662_v16 = vpop.permute.xlu0 %1661 }
0x36cd   :  { %v1664_v21 = vmul.f32 %v1662_v16, %v1645_v4  ;;  %v1980_v16 = vld [vmem:[#allocation2 + $0xd0] sm:$0xff] }
0x36ce   :  { %2001 = vmatpush.msrb.mxu0 %v1980_v16  ;;  %v1943_v16 = vld [vmem:[#allocation4 + $0x40] sm:$0xff] }
0x36cf   :  { %1666 = vrot.lane.b32.xlu1 %v1664_v21, %s3098_s13  ;;  %v1979_v21 = vld [vmem:[#allocation2 + $0xc8] sm:$0xff] }
0x36d0   :  { %2002 = vmatpush.msrb.mxu0 %v1979_v21 }
0x3741   :  { %v1667_v22 = vpop.permute.xlu1 %1666 }
0x3742   :  { %v1669_v42 = vadd.f32 %v2966_v12, %v1667_v22  ;;  %v1978_v22 = vld [vmem:[#allocation2 + $0xc0] sm:$0xff] }
0x3743   :  { %2003 = vmatpush.msrb.mxu0 %v1978_v22 }
0x3744   :  { %1671 = vrot.lane.b32.xlu2 %v1669_v42, %s3095_s9 }
0x379e   :  { %v3536_v23 = vpop.permute.xlu2 %1671 }
0x379f   :  { %2776 = vmatmul.msk.f32.vlgmr.msra.gmra.mxu2 %vm136_vm5, %v3536_v23 }
0x3822   :  { %v1692_v8 = vpop.f32.mrf.mxu2 }
0x3823   :  { %v1715_v24 = vadd.f32 %v1692_v8, %v3480_v34  ;;  %v1695_v25 = vadd.f32 %v1692_v8, %v3487_v39 }
0x3825   :  { %1717 = vrot.lane.b32.xlu0 %v1715_v24, %s3095_s9  ;;  %v2777_v9 = vmul.f32 -1.442695, %v1695_v25 }
0x3827   :  { %2967 = vpow2.f32 %v2777_v9 }
0x382d   :  { %v2968_v14 = vpop.eup %2967 }
0x382e   :  { %v1699_v27 = vadd.f32 1.0, %v2968_v14 }
0x3830   :  { %2969 = vrcp.f32 %v1699_v27  ;;  %v1711_v35 = vand.u32 2147483648, %v1699_v27  ;;  %vm1705_vm15 = vweird.f32 %v1699_v27  ;;  %v1709_v36 = vand.u32 2147483647, %v1699_v27 }
0x3832   :  { %v1712_v38 = vor.u32 1.1754944e-38, %v1711_v35  ;;  %vm1710_vm2 = vcmp.eq.f32.partialorder %v1709_v36, 8.507059e+37 }
0x3836   :  { %v2970_v29 = vpop.eup %2969 }
0x3837   :  { %v1701_v30 = vmul.f32 %v2970_v29, %v1699_v27  ;;  %vm1706_vm14 = vweird.f32 %v2970_v29 }
0x3838   :  { %vm1707_vm1 = vmor %vm1705_vm15, %vm1706_vm14 }
0x3839   :  { %v1702_v31 = vsub.f32 1.0, %v1701_v30 }
0x383b   :  { %v1703_v32 = vmul.f32 %v2970_v29, %v1702_v31 }
0x383d   :  { %v1704_v33 = vadd.f32 %v2970_v29, %v1703_v32 }
0x383f   :  { %v1708_v37 = vsel %vm1707_vm1, %v2970_v29, %v1704_v33 }
0x3840   :  { %v1713_v43 = vsel %vm1710_vm2, %v1712_v38, %v1708_v37 }
0x3897   :  { %v1718_v40 = vpop.permute.xlu0 %1717 }
0x3898   :  { %v1720_v44 = vmul.f32 %v1718_v40, %v1713_v43 }
0x389a   :  { %1722 = vrot.lane.b32.xlu1 %v1720_v44, %s3095_s9 }
0x390c   :  { %v1723_v45 = vpop.permute.xlu1 %1722 }
0x390d   :  { %v1725_v46 = vadd.f32 %v1723_v45, %v3487_v39 }
0x390f   :  { %2971 = vtanh.f32 %v1725_v46 }
0x3915   :  { %v2972_v47 = vpop.eup %2971 }
0x3916   :  { %v1727_v48 = vsub.f32 %v1669_v42, %v2972_v47 }
0x3918   :  { %1729 = vrot.lane.b32.xlu2 %v1727_v48, %s3097_s12 }
0x3972   :  { %v1730_v49 = vpop.permute.xlu2 %1729 }
0x3973   :  { %v1732_v50 = vmul.f32 %v1730_v49, %v1713_v43 }
0x3975   :  { %1734 = vrot.lane.b32.xlu0 %v1732_v50, %s3098_s13 }
0x39e7   :  { %v1735_v51 = vpop.permute.xlu0 %1734 }
0x39e8   :  { %v1737_v52 = vadd.f32 %v2972_v47, %v1735_v51 }
0x39ea   :  { %1739 = vrot.lane.b32.xlu1 %v1737_v52, %s3095_s9 }
0x3a5c   :  { %v3548_v53 = vpop.permute.xlu1 %1739 }
0x3a5d   :  { %2778 = vmatmul.msk.f32.vlgmr.msrb.gmra.mxu3 %vm136_vm5, %v3548_v53 }
0x3ae0   :  { %v1760_v54 = vpop.f32.mrf.mxu3 }
0x3ae1   :  { %v1783_v55 = vadd.f32 %v1760_v54, %v3480_v34  ;;  %v1763_v56 = vadd.f32 %v1760_v54, %v3487_v39 }
0x3ae3   :  { %1785 = vrot.lane.b32.xlu2 %v1783_v55, %s3095_s9  ;;  %v2779_v57 = vmul.f32 -1.442695, %v1763_v56 }
0x3ae5   :  { %2973 = vpow2.f32 %v2779_v57 }
0x3aeb   :  { %v2974_v58 = vpop.eup %2973 }
0x3aec   :  { %v1767_v11 = vadd.f32 1.0, %v2974_v58 }
0x3aee   :  { %2975 = vrcp.f32 %v1767_v11  ;;  %v1779_v41 = vand.u32 2147483648, %v1767_v11  ;;  %vm1773_vm4 = vweird.f32 %v1767_v11  ;;  %v1777_v18 = vand.u32 2147483647, %v1767_v11 }
0x3af0   :  { %v1780_v63 = vor.u32 1.1754944e-38, %v1779_v41  ;;  %vm1778_vm7 = vcmp.eq.f32.partialorder %v1777_v18, 8.507059e+37 }
0x3af4   :  { %v2976_v60 = vpop.eup %2975 }
0x3af5   :  { %v1769_v61 = vmul.f32 %v2976_v60, %v1767_v11  ;;  %vm1774_vm3 = vweird.f32 %v2976_v60 }
0x3af6   :  { %vm1775_vm6 = vmor %vm1773_vm4, %vm1774_vm3 }
0x3af7   :  { %v1770_v10 = vsub.f32 1.0, %v1769_v61 }
0x3af9   :  { %v1771_v15 = vmul.f32 %v2976_v60, %v1770_v10 }
0x3afb   :  { %v1772_v62 = vadd.f32 %v2976_v60, %v1771_v15 }
0x3afd   :  { %v1776_v26 = vsel %vm1775_vm6, %v2976_v60, %v1772_v62 }
0x3afe   :  { %v1781_v0 = vsel %vm1778_vm7, %v1780_v63, %v1776_v26 }
0x3b3d   :  { %v1786_v19 = vpop.permute.xlu2 %1785 }
0x3b3e   :  { %v1788_v20 = vmul.f32 %v1786_v19, %v1781_v0 }
0x3b40   :  { %1790 = vrot.lane.b32.xlu0 %v1788_v20, %s3095_s9 }
0x3bb2   :  { %v1791_v1 = vpop.permute.xlu0 %1790 }
0x3bb3   :  { %v1793_v2 = vadd.f32 %v1791_v1, %v3487_v39 }
0x3bb5   :  { %2977 = vtanh.f32 %v1793_v2 }
0x3bbb   :  { %v2978_v3 = vpop.eup %2977 }
0x3bbc   :  { %v1795_v4 = vsub.f32 %v1737_v52, %v2978_v3 }
0x3bbe   :  { %1797 = vrot.lane.b32.xlu1 %v1795_v4, %s3097_s12 }
0x3c30   :  { %v1798_v5 = vpop.permute.xlu1 %1797 }
0x3c31   :  { %v1800_v6 = vmul.f32 %v1798_v5, %v1781_v0 }
0x3c33   :  { %1802 = vrot.lane.b32.xlu2 %v1800_v6, %s3098_s13 }
0x3c8d   :  { %v1803_v7 = vpop.permute.xlu2 %1802 }
0x3c8e   :  { %v1805_v12 = vadd.f32 %v2978_v3, %v1803_v7  ;;  %v1946_v7 = vld [vmem:[#allocation4 + $0x58] sm:$0xff] }
0x3c8f   :  { %1966 = vmatpush.msra.mxu3 %v1946_v7 }
0x3c90   :  { %1807 = vrot.lane.b32.xlu0 %v1805_v12, %s3095_s9 }
0x3d02   :  { %v3560_v42 = vpop.permute.xlu0 %1807 }
0x3d03   :  { %2780 = vmatmul.msk.f32.vlgmr.msra.gmra.mxu0 %vm136_vm5, %v3560_v42 }
0x3d0b   :  { %2787 = vmatmul.msk.f32.vlgmr.msrb.gmra.mxu0 %vm136_vm5, %v3496_v17 }
0x3d13   :  { %2788 = vmatmul.msk.f32.gmra.mxu0 %vm136_vm5, %v3512_v28 }
0x3d1b   :  { %2789 = vmatmul.msk.f32.gmra.mxu0 %vm136_vm5, %v3524_v59 }
0x3d23   :  { %2790 = vmatmul.msk.f32.gmra.mxu0 %vm136_vm5, %v3536_v23 }
0x3d2b   :  { %2791 = vmatmul.msk.f32.gmra.mxu0 %vm136_vm5, %v3548_v53 }
0x3d33   :  { %2792 = vmatmul.msk.f32.gmra.mxu0 %vm136_vm5, %v3560_v42 }
0x3d80   :  { %v1828_v8 = vpop.f32.mrf.mxu0 }
0x3d81   :  { %v1851_v24 = vadd.f32 %v1828_v8, %v3480_v34  ;;  %v1831_v25 = vadd.f32 %v1828_v8, %v3487_v39  ;;  %v3600_v8 = vld [vmem:[#allocation2 + $0xe0] sm:$0xff] }
0x3d83   :  { %1853 = vrot.lane.b32.xlu1 %v1851_v24, %s3095_s9  ;;  %v2781_v9 = vmul.f32 -1.442695, %v1831_v25  ;;  %v2845_v25 = vld [vmem:[%s3806_s2 + $0x7] ss:$0 sm:$0xff] }
0x3d85   :  { %2979 = vpow2.f32 %v2781_v9  ;;  %v2844_v9 = vld [vmem:[%s3808_s4 + $0x2] ss:$0 sm:$0xff] }
0x3d8b   :  { %v2980_v14 = vpop.eup %2979 }
0x3d8c   :  { %v1835_v27 = vadd.f32 1.0, %v2980_v14 }
0x3d8e   :  { %2981 = vrcp.f32 %v1835_v27  ;;  %v1847_v35 = vand.u32 2147483648, %v1835_v27  ;;  %vm1841_vm9 = vweird.f32 %v1835_v27  ;;  %v1845_v36 = vand.u32 2147483647, %v1835_v27 }
0x3d90   :  { %v1848_v38 = vor.u32 1.1754944e-38, %v1847_v35  ;;  %vm1846_vm11 = vcmp.eq.f32.partialorder %v1845_v36, 8.507059e+37  ;;  %v3637_v35 = vld [vmem:[%s3806_s2 + $0x6] ss:$0 sm:$0xff]  ;;  %v2005_v36 = vpop.f32.mrf.mxu0  ;;  %s3099_s2 = smov 16  }
0x3d94   :  { %v2982_v29 = vpop.eup %2981 }
0x3d95   :  { %v1837_v30 = vmul.f32 %v2982_v29, %v1835_v27  ;;  %vm1842_vm8 = vweird.f32 %v2982_v29 }
0x3d96   :  { %vm1843_vm10 = vmor %vm1841_vm9, %vm1842_vm8 }
0x3d97   :  { %v1838_v31 = vsub.f32 1.0, %v1837_v30 }
0x3d99   :  { %v1839_v32 = vmul.f32 %v2982_v29, %v1838_v31 }
0x3d9b   :  { %v1840_v33 = vadd.f32 %v2982_v29, %v1839_v32 }
0x3d9d   :  { %v1844_v37 = vsel %vm1843_vm10, %v2982_v29, %v1840_v33 }
0x3d9e   :  { %v1849_v43 = vsel %vm1846_vm11, %v1848_v38, %v1844_v37  ;;  %v2006_v37 = vadd.f32 %v3637_v35, %v2005_v36 }
0x3df5   :  { %v1854_v40 = vpop.permute.xlu1 %1853 }
0x3df6   :  { %v1856_v44 = vmul.f32 %v1854_v40, %v1849_v43 }
0x3df8   :  { %1858 = vrot.lane.b32.xlu2 %v1856_v44, %s3095_s9 }
0x3e52   :  { %v1859_v45 = vpop.permute.xlu2 %1858 }
0x3e53   :  { %v1861_v46 = vadd.f32 %v1859_v45, %v3487_v39 }
0x3e55   :  { %2983 = vtanh.f32 %v1861_v46 }
0x3e5b   :  { %v2984_v47 = vpop.eup %2983 }
0x3e5c   :  { %v1863_v48 = vsub.f32 %v1805_v12, %v2984_v47  ;;  %v1945_v12 = vld [vmem:[#allocation4 + $0x50] sm:$0xff] }
0x3e5d   :  { %1967 = vmatpush.msra.mxu3 %v1945_v12 }
0x3e5e   :  { %1865 = vrot.lane.b32.xlu0 %v1863_v48, %s3097_s12 }
0x3e5f   :  { %1968 = vmatpush.msra.mxu3 %v1944_v13 }
0x3e61   :  { %1969 = vmatpush.msra.mxu3 %v1943_v16 }
0x3ed0   :  { %v1866_v49 = vpop.permute.xlu0 %1865 }
0x3ed1   :  { %v1868_v50 = vmul.f32 %v1866_v49, %v1849_v43 }
0x3ed3   :  { %1870 = vrot.lane.b32.xlu1 %v1868_v50, %s3098_s13 }
0x3f45   :  { %v1871_v51 = vpop.permute.xlu1 %1870 }
0x3f46   :  { %v1873_v52 = vadd.f32 %v2984_v47, %v1871_v51 }
0x3f48   :  { %1875 = vrot.lane.b32.xlu2 %v1873_v52, %s3095_s9 }
0x3fa2   :  { %v3584_v54 = vpop.permute.xlu2 %1875 }
0x3fa3   :  { %2782 = vmatmul.msk.f32.vlgmr.msrb.gmra.mxu2 %vm136_vm5, %v3584_v54  ;;  %2793 = vmatmul.msk.f32.gmra.mxu0 %vm136_vm5, %v3584_v54 }
0x4026   :  { %v1896_v55 = vpop.f32.mrf.mxu2 }
0x4027   :  { %v1919_v56 = vadd.f32 %v1896_v55, %v3480_v34  ;;  %v1899_v57 = vadd.f32 %v1896_v55, %v3487_v39 }
0x4029   :  { %1921 = vrot.lane.b32.xlu0 %v1919_v56, %s3095_s9  ;;  %v2783_v58 = vmul.f32 -1.442695, %v1899_v57 }
0x402b   :  { %2985 = vpow2.f32 %v2783_v58 }
0x4031   :  { %v2986_v11 = vpop.eup %2985 }
0x4032   :  { %v1903_v60 = vadd.f32 1.0, %v2986_v11 }
0x4034   :  { %2987 = vrcp.f32 %v1903_v60  ;;  %v1915_v18 = vand.u32 2147483648, %v1903_v60  ;;  %vm1909_vm13 = vweird.f32 %v1903_v60  ;;  %v1913_v26 = vand.u32 2147483647, %v1903_v60 }
0x4036   :  { %v1916_v63 = vor.u32 1.1754944e-38, %v1915_v18  ;;  %vm1914_vm15 = vcmp.eq.f32.partialorder %v1913_v26, 8.507059e+37 }
0x403a   :  { %v2988_v61 = vpop.eup %2987 }
0x403b   :  { %v1905_v10 = vmul.f32 %v2988_v61, %v1903_v60  ;;  %vm1910_vm12 = vweird.f32 %v2988_v61 }
0x403c   :  { %vm1911_vm14 = vmor %vm1909_vm13, %vm1910_vm12 }
0x403d   :  { %v1906_v15 = vsub.f32 1.0, %v1905_v10 }
0x403f   :  { %v1907_v62 = vmul.f32 %v2988_v61, %v1906_v15 }
0x4041   :  { %v1908_v41 = vadd.f32 %v2988_v61, %v1907_v62 }
0x4043   :  { %v1912_v34 = vsel %vm1911_vm14, %v2988_v61, %v1908_v41 }
0x4044   :  { %v1917_v0 = vsel %vm1914_vm15, %v1916_v63, %v1912_v34 }
0x409b   :  { %v1922_v19 = vpop.permute.xlu0 %1921 }
0x409c   :  { %v1924_v20 = vmul.f32 %v1922_v19, %v1917_v0 }
0x409e   :  { %1926 = vrot.lane.b32.xlu1 %v1924_v20, %s3095_s9 }
0x4110   :  { %v1927_v1 = vpop.permute.xlu1 %1926 }
0x4111   :  { %v1929_v2 = vadd.f32 %v1927_v1, %v3487_v39  ;;  %v3598_v39 = vld [vmem:[#allocation2 + $0xe8] sm:$0xff] }
0x4112   :  { %2047 = vmatpush.msrb.mxu1 %v3598_v39  ;;  %2123 = vmatpush.msra.mxu2 %v3598_v39 }
0x4113   :  { %2989 = vtanh.f32 %v1929_v2  ;;  %2191 = vmatpush.msrb.mxu3 %v3598_v39 }
0x4114   :  { %2048 = vmatpush.msrb.mxu1 %v3600_v8  ;;  %2124 = vmatpush.msra.mxu2 %v3600_v8 }
0x4115   :  { %2192 = vmatpush.msrb.mxu3 %v3600_v8 }
0x4116   :  { %2259 = vmatpush.msra.mxu1 %v3598_v39  ;;  %2327 = vmatpush.msrb.mxu2 %v3598_v39 }
0x4118   :  { %2260 = vmatpush.msra.mxu1 %v3600_v8  ;;  %2328 = vmatpush.msrb.mxu2 %v3600_v8 }
0x4119   :  { %v2990_v3 = vpop.eup %2989 }
0x411a   :  { %v1931_v4 = vsub.f32 %v1873_v52, %v2990_v3 }
0x411c   :  { %1933 = vrot.lane.b32.xlu2 %v1931_v4, %s3097_s12 }
0x4124   :  { %2074 = vrot.lane.b32.xlu2 %v2845_v25, %s3098_s13 }
0x4176   :  { %v1934_v5 = vpop.permute.xlu2 %1933 }
0x4177   :  { %v1936_v6 = vmul.f32 %v1934_v5, %v1917_v0  ;;  %v2008_v0 = vpop.f32.mrf.mxu0 }
0x4178   :  { %v2009_v20 = vadd.f32 %v3637_v35, %v2008_v0 }
0x4179   :  { %1938 = vrot.lane.b32.xlu0 %v1936_v6, %s3098_s13 }
0x417e   :  { %v3630_v31 = vpop.permute.xlu2 %2074 }
0x41eb   :  { %v1939_v21 = vpop.permute.xlu0 %1938 }
0x41ec   :  { %v1941_v22 = vadd.f32 %v2990_v3, %v1939_v21 }
0x41ee   :  { %1950 = vrot.lane.b32.xlu1 %v1941_v22, %s3095_s9 }
0x4260   :  { %v3612_v24 = vpop.permute.xlu1 %1950 }
0x4261   :  { %2784 = vmatmul.msk.f32.vlgmr.msra.gmra.mxu3 %vm136_vm5, %v3612_v24  ;;  %2794 = vmatmul.msk.f32.gmra.mxu0 %vm136_vm5, %v3612_v24 }
0x4262   :  { %2395 = vmatpush.msra.mxu3 %v3598_v39 }
0x4264   :  { %2396 = vmatpush.msra.mxu3 %v3600_v8 }
0x42e4   :  { %v1971_v14 = vpop.f32.mrf.mxu3 }
0x42e5   :  { %v1972_v27 = vadd.f32 %v2844_v9, %v1971_v14 }
0x42e7   :  { %vm1974_vm1 = vcmp.ge.f32.partialorder %v1972_v27, 0.0  ;;  %v1975_v29 = vmul.f32 0.2, %v1972_v27 }
0x42e9   :  { %v1976_v30 = vsel %vm1974_vm1, %v1972_v27, %v1975_v29 }
0x42ea   :  { %2795 = vmatmul.msk.f32.vlgmr.msrb.gmra.mxu1 %vm69_vm0, %v1976_v30 }
0x42eb   :  { %2463 = vmatpush.msrb.mxu1 %v3598_v39 }
0x42ed   :  { %2464 = vmatpush.msrb.mxu1 %v3600_v8 }
0x4367   :  { %v2050_v32 = vpop.f32.mrf.mxu1 }
0x4368   :  { %v2077_v33 = vadd.f32 %v3630_v31, %v2050_v32  ;;  %v2053_v38 = vadd.f32 %v2050_v32, %v2006_v37 }
0x436a   :  { %2079 = vrot.lane.b32.xlu0 %v2077_v33, %s3097_s12  ;;  %v2796_v40 = vmul.f32 -1.442695, %v2053_v38 }
0x436c   :  { %2991 = vpow2.f32 %v2796_v40 }
0x4372   :  { %v2992_v43 = vpop.eup %2991 }
0x4373   :  { %v2057_v44 = vadd.f32 1.0, %v2992_v43 }
0x4375   :  { %2993 = vrcp.f32 %v2057_v44  ;;  %v2069_v50 = vand.u32 2147483648, %v2057_v44  ;;  %vm2063_vm3 = vweird.f32 %v2057_v44  ;;  %v2067_v51 = vand.u32 2147483647, %v2057_v44 }
0x4377   :  { %v2070_v55 = vor.u32 1.1754944e-38, %v2069_v50  ;;  %vm2068_vm6 = vcmp.eq.f32.partialorder %v2067_v51, 8.507059e+37 }
0x437b   :  { %v2994_v45 = vpop.eup %2993 }
0x437c   :  { %v2059_v46 = vmul.f32 %v2994_v45, %v2057_v44  ;;  %vm2064_vm2 = vweird.f32 %v2994_v45  ;;  %v2011_v44 = vpop.f32.mrf.mxu0 }
0x437d   :  { %vm2065_vm4 = vmor %vm2063_vm3, %vm2064_vm2 }
0x437e   :  { %v2060_v47 = vsub.f32 1.0, %v2059_v46 }
0x4380   :  { %v2061_v48 = vmul.f32 %v2994_v45, %v2060_v47 }
0x4382   :  { %v2062_v49 = vadd.f32 %v2994_v45, %v2061_v48 }
0x4384   :  { %v2066_v52 = vsel %vm2065_vm4, %v2994_v45, %v2062_v49  ;;  %v2012_v45 = vadd.f32 %v3637_v35, %v2011_v44 }
0x4385   :  { %v2071_v56 = vsel %vm2068_vm6, %v2070_v55, %v2066_v52 }
0x43dc   :  { %v2080_v57 = vpop.permute.xlu0 %2079 }
0x43dd   :  { %v2082_v58 = vmul.f32 %v2080_v57, %v2071_v56 }
0x43df   :  { %2084 = vrot.lane.b32.xlu1 %v2082_v58, %s3098_s13 }
0x4451   :  { %v2085_v11 = vpop.permute.xlu1 %2084 }
0x4452   :  { %v2087_v60 = vadd.f32 %v2085_v11, %v2006_v37 }
0x4454   :  { %2995 = vtanh.f32 %v2087_v60 }
0x445a   :  { %v2996_v61 = vpop.eup %2995 }
0x445b   :  { %2090 = vrot.lane.b32.xlu2 %v2996_v61, %s3097_s12 }
0x44b5   :  { %v2091_v10 = vpop.permute.xlu2 %2090 }
0x44b6   :  { %v2093_v15 = vsub.f32 %v1976_v30, %v2091_v10 }
0x44b8   :  { %2095 = vrot.lane.b32.xlu0 %v2093_v15, %s3099_s2 }
0x452a   :  { %v2096_v62 = vpop.permute.xlu0 %2095 }
0x452b   :  { %v2098_v41 = vmul.f32 %v2096_v62, %v2071_v56 }
0x452d   :  { %2100 = vrot.lane.b32.xlu1 %v2098_v41, %s3099_s2 }
0x459f   :  { %v2101_v18 = vpop.permute.xlu1 %2100 }
0x45a0   :  { %v3644_v26 = vadd.f32 %v2996_v61, %v2101_v18 }
0x45a2   :  { %2105 = vrot.lane.b32.xlu2 %v3644_v26, %s3097_s12 }
0x45fc   :  { %v2106_v34 = vpop.permute.xlu2 %2105 }
0x45fd   :  { %2797 = vmatmul.msk.f32.vlgmr.msra.gmra.mxu2 %vm69_vm0, %v2106_v34 }
0x45fe   :  { %2531 = vmatpush.msra.mxu2 %v3598_v39 }
0x4600   :  { %2532 = vmatpush.msra.mxu2 %v3600_v8 }
0x4680   :  { %v2126_v63 = vpop.f32.mrf.mxu2 }
0x4681   :  { %v2149_v19 = vadd.f32 %v2126_v63, %v3630_v31  ;;  %v2129_v1 = vadd.f32 %v2126_v63, %v2009_v20 }
0x4683   :  { %2151 = vrot.lane.b32.xlu0 %v2149_v19, %s3097_s12  ;;  %v2798_v2 = vmul.f32 -1.442695, %v2129_v1 }
0x4685   :  { %2997 = vpow2.f32 %v2798_v2 }
0x468b   :  { %v2998_v3 = vpop.eup %2997 }
0x468c   :  { %v2133_v4 = vadd.f32 1.0, %v2998_v3 }
0x468e   :  { %2999 = vrcp.f32 %v2133_v4  ;;  %v2145_v16 = vand.u32 2147483648, %v2133_v4  ;;  %vm2139_vm8 = vweird.f32 %v2133_v4  ;;  %v2143_v21 = vand.u32 2147483647, %v2133_v4 }
0x4690   :  { %v2146_v39 = vor.u32 1.1754944e-38, %v2145_v16  ;;  %vm2144_vm10 = vcmp.eq.f32.partialorder %v2143_v21, 8.507059e+37 }
0x4694   :  { %v3000_v5 = vpop.eup %2999 }
0x4695   :  { %v2135_v6 = vmul.f32 %v3000_v5, %v2133_v4  ;;  %vm2140_vm7 = vweird.f32 %v3000_v5  ;;  %v2014_v4 = vpop.f32.mrf.mxu0 }
0x4696   :  { %vm2141_vm9 = vmor %vm2139_vm8, %vm2140_vm7 }
0x4697   :  { %v2136_v7 = vsub.f32 1.0, %v2135_v6 }
0x4699   :  { %v2137_v12 = vmul.f32 %v3000_v5, %v2136_v7 }
0x469b   :  { %v2138_v13 = vadd.f32 %v3000_v5, %v2137_v12 }
0x469d   :  { %v2142_v22 = vsel %vm2141_vm9, %v3000_v5, %v2138_v13  ;;  %v2015_v5 = vadd.f32 %v3637_v35, %v2014_v4 }
0x469e   :  { %v2147_v25 = vsel %vm2144_vm10, %v2146_v39, %v2142_v22 }
0x46f5   :  { %v2152_v8 = vpop.permute.xlu0 %2151 }
0x46f6   :  { %v2154_v9 = vmul.f32 %v2152_v8, %v2147_v25 }
0x46f8   :  { %2156 = vrot.lane.b32.xlu1 %v2154_v9, %s3098_s13 }
0x476a   :  { %v2157_v14 = vpop.permute.xlu1 %2156 }
0x476b   :  { %v2159_v27 = vadd.f32 %v2157_v14, %v2009_v20 }
0x476d   :  { %3001 = vtanh.f32 %v2159_v27 }
0x4773   :  { %v3002_v29 = vpop.eup %3001 }
0x4774   :  { %v2161_v30 = vsub.f32 %v3644_v26, %v3002_v29 }
0x4776   :  { %2163 = vrot.lane.b32.xlu2 %v2161_v30, %s3100_s18 }
0x47d0   :  { %v2164_v32 = vpop.permute.xlu2 %2163 }
0x47d1   :  { %v2166_v33 = vmul.f32 %v2164_v32, %v2147_v25 }
0x47d3   :  { %2168 = vrot.lane.b32.xlu0 %v2166_v33, %s3099_s2 }
0x4845   :  { %v2169_v36 = vpop.permute.xlu0 %2168 }
0x4846   :  { %v3658_v37 = vadd.f32 %v3002_v29, %v2169_v36 }
0x4848   :  { %2173 = vrot.lane.b32.xlu1 %v3658_v37, %s3097_s12 }
0x48ba   :  { %v2174_v38 = vpop.permute.xlu1 %2173 }
0x48bb   :  { %2799 = vmatmul.msk.f32.vlgmr.msrb.gmra.mxu3 %vm69_vm0, %v2174_v38 }
0x493e   :  { %v2194_v40 = vpop.f32.mrf.mxu3 }
0x493f   :  { %v2217_v43 = vadd.f32 %v2194_v40, %v3630_v31  ;;  %v2197_v46 = vadd.f32 %v2194_v40, %v2012_v45 }
0x4941   :  { %2219 = vrot.lane.b32.xlu2 %v2217_v43, %s3097_s12  ;;  %v2800_v47 = vmul.f32 -1.442695, %v2197_v46 }
0x4943   :  { %3003 = vpow2.f32 %v2800_v47 }
0x4949   :  { %v3004_v48 = vpop.eup %3003 }
0x494a   :  { %v2201_v49 = vadd.f32 1.0, %v3004_v48 }
0x494c   :  { %3005 = vrcp.f32 %v2201_v49  ;;  %v2213_v57 = vand.u32 2147483648, %v2201_v49  ;;  %vm2207_vm12 = vweird.f32 %v2201_v49  ;;  %v2211_v58 = vand.u32 2147483647, %v2201_v49 }
0x494e   :  { %v2214_v60 = vor.u32 1.1754944e-38, %v2213_v57  ;;  %vm2212_vm14 = vcmp.eq.f32.partialorder %v2211_v58, 8.507059e+37 }
0x4952   :  { %v3006_v50 = vpop.eup %3005 }
0x4953   :  { %v2203_v51 = vmul.f32 %v3006_v50, %v2201_v49  ;;  %vm2208_vm11 = vweird.f32 %v3006_v50 }
0x4954   :  { %vm2209_vm13 = vmor %vm2207_vm12, %vm2208_vm11 }
0x4955   :  { %v2204_v52 = vsub.f32 1.0, %v2203_v51 }
0x4957   :  { %v2205_v55 = vmul.f32 %v3006_v50, %v2204_v52 }
0x4959   :  { %v2206_v56 = vadd.f32 %v3006_v50, %v2205_v55 }
0x495b   :  { %v2210_v11 = vsel %vm2209_vm13, %v3006_v50, %v2206_v56  ;;  %v2017_v50 = vpop.f32.mrf.mxu0 }
0x495c   :  { %v2215_v10 = vsel %vm2212_vm14, %v2214_v60, %v2210_v11  ;;  %v2018_v51 = vadd.f32 %v3637_v35, %v2017_v50 }
0x499b   :  { %v2220_v61 = vpop.permute.xlu2 %2219 }
0x499c   :  { %v2222_v15 = vmul.f32 %v2220_v61, %v2215_v10 }
0x499e   :  { %2224 = vrot.lane.b32.xlu0 %v2222_v15, %s3098_s13 }
0x4a10   :  { %v2225_v62 = vpop.permute.xlu0 %2224 }
0x4a11   :  { %v2227_v41 = vadd.f32 %v2225_v62, %v2012_v45 }
0x4a13   :  { %3007 = vtanh.f32 %v2227_v41 }
0x4a19   :  { %v3008_v18 = vpop.eup %3007 }
0x4a1a   :  { %v2229_v34 = vsub.f32 %v3658_v37, %v3008_v18 }
0x4a1c   :  { %2231 = vrot.lane.b32.xlu1 %v2229_v34, %s3100_s18 }
0x4a8e   :  { %v2232_v63 = vpop.permute.xlu1 %2231 }
0x4a8f   :  { %v2234_v19 = vmul.f32 %v2232_v63, %v2215_v10 }
0x4a91   :  { %2236 = vrot.lane.b32.xlu2 %v2234_v19, %s3099_s2 }
0x4aeb   :  { %v2237_v0 = vpop.permute.xlu2 %2236 }
0x4aec   :  { %v3670_v20 = vadd.f32 %v3008_v18, %v2237_v0 }
0x4aee   :  { %2241 = vrot.lane.b32.xlu0 %v3670_v20, %s3097_s12 }
0x4b60   :  { %v2242_v1 = vpop.permute.xlu0 %2241 }
0x4b61   :  { %2801 = vmatmul.msk.f32.vlgmr.msra.gmra.mxu1 %vm69_vm0, %v2242_v1 }
0x4bde   :  { %v2262_v2 = vpop.f32.mrf.mxu1 }
0x4bdf   :  { %v2285_v3 = vadd.f32 %v2262_v2, %v3630_v31  ;;  %v2265_v6 = vadd.f32 %v2262_v2, %v2015_v5 }
0x4be1   :  { %2287 = vrot.lane.b32.xlu1 %v2285_v3, %s3097_s12  ;;  %v2802_v7 = vmul.f32 -1.442695, %v2265_v6 }
0x4be3   :  { %3009 = vpow2.f32 %v2802_v7 }
0x4be9   :  { %v3010_v12 = vpop.eup %3009 }
0x4bea   :  { %v2269_v13 = vadd.f32 1.0, %v3010_v12  ;;  %v2584_v12 = vld [vmem:[#allocation4 + $0x78] sm:$0xff] }
0x4beb   :  { %2821 = vmatpush.msrb.mxu3 %v2584_v12  ;;  %2599 = vmatpush.msra.mxu1 %v2584_v12 }
0x4bec   :  { %3011 = vrcp.f32 %v2269_v13  ;;  %v2281_v25 = vand.u32 2147483648, %v2269_v13  ;;  %vm2275_vm1 = vweird.f32 %v2269_v13  ;;  %v2279_v9 = vand.u32 2147483647, %v2269_v13 }
0x4bee   :  { %v2282_v27 = vor.u32 1.1754944e-38, %v2281_v25  ;;  %vm2280_vm3 = vcmp.eq.f32.partialorder %v2279_v9, 8.507059e+37  ;;  %v2020_v25 = vpop.f32.mrf.mxu0 }
0x4bef   :  { %v2021_v9 = vadd.f32 %v3637_v35, %v2020_v25 }
0x4bf2   :  { %v3012_v16 = vpop.eup %3011 }
0x4bf3   :  { %v2271_v21 = vmul.f32 %v3012_v16, %v2269_v13  ;;  %vm2276_vm15 = vweird.f32 %v3012_v16  ;;  %v2583_v13 = vld [vmem:[#allocation4 + $0x70] sm:$0xff] }
0x4bf4   :  { %vm2277_vm2 = vmor %vm2275_vm1, %vm2276_vm15  ;;  %2822 = vmatpush.msrb.mxu3 %v2583_v13  ;;  %2600 = vmatpush.msra.mxu1 %v2583_v13 }
0x4bf5   :  { %v2272_v22 = vsub.f32 1.0, %v2271_v21  ;;  %v2581_v21 = vld [vmem:[#allocation4 + $0x60] sm:$0xff] }
0x4bf7   :  { %v2273_v39 = vmul.f32 %v3012_v16, %v2272_v22 }
0x4bf9   :  { %v2274_v8 = vadd.f32 %v3012_v16, %v2273_v39 }
0x4bfb   :  { %v2278_v14 = vsel %vm2277_vm2, %v3012_v16, %v2274_v8  ;;  %v2582_v16 = vld [vmem:[#allocation4 + $0x68] sm:$0xff] }
0x4bfc   :  { %v2283_v30 = vsel %vm2280_vm3, %v2282_v27, %v2278_v14  ;;  %2823 = vmatpush.msrb.mxu3 %v2582_v16  ;;  %2601 = vmatpush.msra.mxu1 %v2582_v16 }
0x4bfe   :  { %2824 = vmatpush.msrb.mxu3 %v2581_v21  ;;  %2602 = vmatpush.msra.mxu1 %v2581_v21 }
0x4c53   :  { %v2288_v29 = vpop.permute.xlu1 %2287 }
0x4c54   :  { %v2290_v32 = vmul.f32 %v2288_v29, %v2283_v30 }
0x4c56   :  { %2292 = vrot.lane.b32.xlu2 %v2290_v32, %s3098_s13 }
0x4cb0   :  { %v2293_v33 = vpop.permute.xlu2 %2292 }
0x4cb1   :  { %v2295_v36 = vadd.f32 %v2293_v33, %v2015_v5 }
0x4cb3   :  { %3013 = vtanh.f32 %v2295_v36 }
0x4cb9   :  { %v3014_v38 = vpop.eup %3013 }
0x4cba   :  { %v2297_v40 = vsub.f32 %v3670_v20, %v3014_v38 }
0x4cbc   :  { %2299 = vrot.lane.b32.xlu0 %v2297_v40, %s3100_s18 }
0x4d2e   :  { %v2300_v43 = vpop.permute.xlu0 %2299 }
0x4d2f   :  { %v2302_v44 = vmul.f32 %v2300_v43, %v2283_v30 }
0x4d31   :  { %2304 = vrot.lane.b32.xlu1 %v2302_v44, %s3099_s2 }
0x4da3   :  { %v2305_v45 = vpop.permute.xlu1 %2304 }
0x4da4   :  { %v3682_v46 = vadd.f32 %v3014_v38, %v2305_v45 }
0x4da6   :  { %2309 = vrot.lane.b32.xlu2 %v3682_v46, %s3097_s12 }
0x4e00   :  { %v2310_v47 = vpop.permute.xlu2 %2309 }
0x4e01   :  { %2803 = vmatmul.msk.f32.vlgmr.msrb.gmra.mxu2 %vm69_vm0, %v2310_v47 }
0x4e84   :  { %v2330_v48 = vpop.f32.mrf.mxu2 }
0x4e85   :  { %v2353_v49 = vadd.f32 %v2330_v48, %v3630_v31  ;;  %v2333_v52 = vadd.f32 %v2330_v48, %v2018_v51 }
0x4e87   :  { %2355 = vrot.lane.b32.xlu0 %v2353_v49, %s3097_s12  ;;  %v2804_v55 = vmul.f32 -1.442695, %v2333_v52 }
0x4e89   :  { %3015 = vpow2.f32 %v2804_v55 }
0x4e8f   :  { %v3016_v56 = vpop.eup %3015 }
0x4e90   :  { %v2337_v57 = vadd.f32 1.0, %v3016_v56 }
0x4e92   :  { %3017 = vrcp.f32 %v2337_v57  ;;  %v2349_v15 = vand.u32 2147483648, %v2337_v57  ;;  %vm2343_vm6 = vweird.f32 %v2337_v57  ;;  %v2347_v62 = vand.u32 2147483647, %v2337_v57 }
0x4e94   :  { %v2350_v18 = vor.u32 1.1754944e-38, %v2349_v15  ;;  %vm2348_vm8 = vcmp.eq.f32.partialorder %v2347_v62, 8.507059e+37 }
0x4e98   :  { %v3018_v58 = vpop.eup %3017 }
0x4e99   :  { %v2339_v11 = vmul.f32 %v3018_v58, %v2337_v57  ;;  %vm2344_vm4 = vweird.f32 %v3018_v58 }
0x4e9a   :  { %vm2345_vm7 = vmor %vm2343_vm6, %vm2344_vm4 }
0x4e9b   :  { %v2340_v60 = vsub.f32 1.0, %v2339_v11 }
0x4e9d   :  { %v2341_v61 = vmul.f32 %v3018_v58, %v2340_v60  ;;  %v2023_v60 = vpop.f32.mrf.mxu0 }
0x4e9f   :  { %v2342_v10 = vadd.f32 %v3018_v58, %v2341_v61  ;;  %v2024_v61 = vadd.f32 %v3637_v35, %v2023_v60 }
0x4ea1   :  { %v2346_v41 = vsel %vm2345_vm7, %v3018_v58, %v2342_v10 }
0x4ea2   :  { %v2351_v63 = vsel %vm2348_vm8, %v2350_v18, %v2346_v41 }
0x4ef9   :  { %v2356_v34 = vpop.permute.xlu0 %2355 }
0x4efa   :  { %v2358_v19 = vmul.f32 %v2356_v34, %v2351_v63 }
0x4efc   :  { %2360 = vrot.lane.b32.xlu1 %v2358_v19, %s3098_s13 }
0x4f6e   :  { %v2361_v0 = vpop.permute.xlu1 %2360 }
0x4f6f   :  { %v2363_v1 = vadd.f32 %v2361_v0, %v2018_v51 }
0x4f71   :  { %3019 = vtanh.f32 %v2363_v1 }
0x4f77   :  { %v3020_v2 = vpop.eup %3019 }
0x4f78   :  { %v2365_v3 = vsub.f32 %v3682_v46, %v3020_v2 }
0x4f7a   :  { %2367 = vrot.lane.b32.xlu2 %v2365_v3, %s3100_s18 }
0x4fd4   :  { %v2368_v4 = vpop.permute.xlu2 %2367 }
0x4fd5   :  { %v2370_v5 = vmul.f32 %v2368_v4, %v2351_v63 }
0x4fd7   :  { %2372 = vrot.lane.b32.xlu0 %v2370_v5, %s3099_s2 }
0x5049   :  { %v2373_v6 = vpop.permute.xlu0 %2372 }
0x504a   :  { %v3694_v7 = vadd.f32 %v3020_v2, %v2373_v6 }
0x504c   :  { %2377 = vrot.lane.b32.xlu1 %v3694_v7, %s3097_s12 }
0x50be   :  { %v2378_v22 = vpop.permute.xlu1 %2377 }
0x50bf   :  { %2805 = vmatmul.msk.f32.vlgmr.msra.gmra.mxu3 %vm69_vm0, %v2378_v22 }
0x50c7   :  { %2815 = vmatmul.msk.f32.vlgmr.msrb.gmra.mxu3 %vm136_vm5, %v3548_v53 }
0x50cf   :  { %2816 = vmatmul.msk.f32.gmra.mxu3 %vm136_vm5, %v3560_v42 }
0x50d7   :  { %2817 = vmatmul.msk.f32.gmra.mxu3 %vm136_vm5, %v3584_v54 }
0x50df   :  { %2818 = vmatmul.msk.f32.gmra.mxu3 %vm136_vm5, %v3612_v24 }
0x5142   :  { %v2398_v39 = vpop.f32.mrf.mxu3 }
0x5143   :  { %v2421_v8 = vadd.f32 %v2398_v39, %v3630_v31  ;;  %v2401_v14 = vadd.f32 %v2398_v39, %v2021_v9 }
0x5145   :  { %2423 = vrot.lane.b32.xlu2 %v2421_v8, %s3097_s12  ;;  %v2806_v27 = vmul.f32 -1.442695, %v2401_v14 }
0x5147   :  { %3021 = vpow2.f32 %v2806_v27 }
0x514d   :  { %v3022_v53 = vpop.eup %3021 }
0x514e   :  { %v2405_v29 = vadd.f32 1.0, %v3022_v53  ;;  %v2846_v53 = vld [vmem:[%s3808_s4 + $0x3] ss:$0 sm:$0xff] }
0x5150   :  { %3023 = vrcp.f32 %v2405_v29  ;;  %v2417_v24 = vand.u32 2147483648, %v2405_v29  ;;  %vm2411_vm10 = vweird.f32 %v2405_v29  ;;  %v2415_v36 = vand.u32 2147483647, %v2405_v29 }
0x5152   :  { %v2418_v40 = vor.u32 1.1754944e-38, %v2417_v24  ;;  %vm2416_vm12 = vcmp.eq.f32.partialorder %v2415_v36, 8.507059e+37 }
0x5156   :  { %v3024_v42 = vpop.eup %3023 }
0x5157   :  { %v2407_v30 = vmul.f32 %v3024_v42, %v2405_v29  ;;  %vm2412_vm9 = vweird.f32 %v3024_v42 }
0x5158   :  { %vm2413_vm11 = vmor %vm2411_vm10, %vm2412_vm9 }
0x5159   :  { %v2408_v54 = vsub.f32 1.0, %v2407_v30 }
0x515b   :  { %v2409_v32 = vmul.f32 %v3024_v42, %v2408_v54 }
0x515d   :  { %v2410_v33 = vadd.f32 %v3024_v42, %v2409_v32 }
0x515f   :  { %v2414_v38 = vsel %vm2413_vm11, %v3024_v42, %v2410_v33  ;;  %v2026_v42 = vpop.f32.mrf.mxu0 }
0x5160   :  { %v2419_v44 = vsel %vm2416_vm12, %v2418_v40, %v2414_v38  ;;  %v2027_v30 = vadd.f32 %v3637_v35, %v2026_v42 }
0x519f   :  { %v2424_v43 = vpop.permute.xlu2 %2423 }
0x51a0   :  { %v2426_v45 = vmul.f32 %v2424_v43, %v2419_v44 }
0x51a2   :  { %2428 = vrot.lane.b32.xlu0 %v2426_v45, %s3098_s13 }
0x5214   :  { %v2429_v47 = vpop.permute.xlu0 %2428 }
0x5215   :  { %v2431_v48 = vadd.f32 %v2429_v47, %v2021_v9 }
0x5217   :  { %3025 = vtanh.f32 %v2431_v48 }
0x521d   :  { %v3026_v49 = vpop.eup %3025 }
0x521e   :  { %v2433_v50 = vsub.f32 %v3694_v7, %v3026_v49 }
0x5220   :  { %2435 = vrot.lane.b32.xlu1 %v2433_v50, %s3100_s18 }
0x5292   :  { %v2436_v51 = vpop.permute.xlu1 %2435 }
0x5293   :  { %v2438_v52 = vmul.f32 %v2436_v51, %v2419_v44  ;;  %v2616_v51 = vpop.f32.mrf.mxu3 }
0x5295   :  { %2440 = vrot.lane.b32.xlu2 %v2438_v52, %s3099_s2 }
0x52ef   :  { %v2441_v55 = vpop.permute.xlu2 %2440 }
0x52f0   :  { %v3714_v56 = vadd.f32 %v3026_v49, %v2441_v55  ;;  %v2619_v55 = vpop.f32.mrf.mxu3 }
0x52f2   :  { %2445 = vrot.lane.b32.xlu0 %v3714_v56, %s3097_s12 }
0x5364   :  { %v2446_v57 = vpop.permute.xlu0 %2445 }
0x5365   :  { %2807 = vmatmul.msk.f32.vlgmr.msrb.gmra.mxu1 %vm69_vm0, %v2446_v57 }
0x536d   :  { %2811 = vmatmul.msk.f32.vlgmr.msra.gmra.mxu1 %vm136_vm5, %v3496_v17 }
0x5375   :  { %2812 = vmatmul.msk.f32.gmra.mxu1 %vm136_vm5, %v3512_v28 }
0x537d   :  { %2813 = vmatmul.msk.f32.gmra.mxu1 %vm136_vm5, %v3524_v59 }
0x5385   :  { %2814 = vmatmul.msk.f32.gmra.mxu1 %vm136_vm5, %v3536_v23 }
0x53e2   :  { %v2466_v58 = vpop.f32.mrf.mxu1 }
0x53e3   :  { %v2489_v11 = vadd.f32 %v2466_v58, %v3630_v31  ;;  %v2469_v10 = vadd.f32 %v2466_v58, %v2024_v61 }
0x53e5   :  { %2491 = vrot.lane.b32.xlu1 %v2489_v11, %s3097_s12  ;;  %v2808_v15 = vmul.f32 -1.442695, %v2469_v10  ;;  %v2622_v11 = vpop.f32.mrf.mxu3 }
0x53e6   :  { %v2623_v60 = vadd.f32 %v2846_v53, %v2622_v11 }
0x53e7   :  { %3027 = vpow2.f32 %v2808_v15 }
0x53ea   :  { %v2604_v8 = vpop.f32.mrf.mxu1 }
0x53eb   :  { %v2605_v52 = vadd.f32 %v2846_v53, %v2604_v8 }
0x53ed   :  { %v3028_v17 = vpop.eup %3027 }
0x53ee   :  { %v2473_v62 = vadd.f32 1.0, %v3028_v17 }
0x53f0   :  { %3029 = vrcp.f32 %v2473_v62  ;;  %v2485_v23 = vand.u32 2147483648, %v2473_v62  ;;  %vm2479_vm13 = vweird.f32 %v2473_v62  ;;  %v2483_v63 = vand.u32 2147483647, %v2473_v62 }
0x53f2   :  { %v2486_v0 = vor.u32 1.1754944e-38, %v2485_v23  ;;  %vm2484_vm15 = vcmp.eq.f32.partialorder %v2483_v63, 8.507059e+37  ;;  %v2607_v25 = vpop.f32.mrf.mxu1 }
0x53f6   :  { %v3030_v28 = vpop.eup %3029 }
0x53f7   :  { %v2475_v41 = vmul.f32 %v3030_v28, %v2473_v62  ;;  %vm2480_vm5 = vweird.f32 %v3030_v28  ;;  %v2608_v62 = vadd.f32 %v2846_v53, %v2607_v25 }
0x53f8   :  { %vm2481_vm14 = vmor %vm2479_vm13, %vm2480_vm5 }
0x53f9   :  { %v2476_v59 = vsub.f32 1.0, %v2475_v41  ;;  %v2625_v41 = vpop.f32.mrf.mxu3 }
0x53fa   :  { %v2610_v27 = vpop.f32.mrf.mxu1 }
0x53fb   :  { %v2477_v18 = vmul.f32 %v3030_v28, %v2476_v59  ;;  %v2611_v29 = vadd.f32 %v2846_v53, %v2610_v27  ;;  %v2626_v59 = vadd.f32 %v2846_v53, %v2625_v41 }
0x53fd   :  { %v2478_v34 = vadd.f32 %v3030_v28, %v2477_v18 }
0x53ff   :  { %v2482_v19 = vsel %vm2481_vm14, %v3030_v28, %v2478_v34  ;;  %v2617_v28 = vadd.f32 %v2846_v53, %v2616_v51 }
0x5400   :  { %v2487_v2 = vsel %vm2484_vm15, %v2486_v0, %v2482_v19  ;;  %v2620_v0 = vadd.f32 %v2846_v53, %v2619_v55 }
0x5402   :  { %v2613_v57 = vpop.f32.mrf.mxu1 }
0x5403   :  { %v2614_v58 = vadd.f32 %v2846_v53, %v2613_v57 }
0x5457   :  { %v2492_v1 = vpop.permute.xlu1 %2491 }
0x5458   :  { %v2494_v3 = vmul.f32 %v2492_v1, %v2487_v2 }
0x545a   :  { %2496 = vrot.lane.b32.xlu2 %v2494_v3, %s3098_s13 }
0x54b4   :  { %v2497_v4 = vpop.permute.xlu2 %2496 }
0x54b5   :  { %v2499_v5 = vadd.f32 %v2497_v4, %v2024_v61 }
0x54b7   :  { %3031 = vtanh.f32 %v2499_v5 }
0x54bd   :  { %v3032_v6 = vpop.eup %3031 }
0x54be   :  { %v2501_v12 = vsub.f32 %v3714_v56, %v3032_v6 }
0x54c0   :  { %2503 = vrot.lane.b32.xlu0 %v2501_v12, %s3100_s18 }
0x5532   :  { %v2504_v13 = vpop.permute.xlu0 %2503 }
0x5533   :  { %v2506_v16 = vmul.f32 %v2504_v13, %v2487_v2 }
0x5535   :  { %2508 = vrot.lane.b32.xlu1 %v2506_v16, %s3099_s2 }
0x55a7   :  { %v2509_v21 = vpop.permute.xlu1 %2508 }
0x55a8   :  { %v3734_v22 = vadd.f32 %v3032_v6, %v2509_v21 }
0x55aa   :  { %2513 = vrot.lane.b32.xlu2 %v3734_v22, %s3097_s12 }
0x5604   :  { %v2514_v39 = vpop.permute.xlu2 %2513 }
0x5605   :  { %2809 = vmatmul.msk.f32.vlgmr.msra.gmra.mxu2 %vm69_vm0, %v2514_v39 }
0x5688   :  { %v2534_v9 = vpop.f32.mrf.mxu2 }
0x5689   :  { %v2557_v14 = vadd.f32 %v2534_v9, %v3630_v31  ;;  %v2537_v54 = vadd.f32 %v2534_v9, %v2027_v30 }
0x568b   :  { %2559 = vrot.lane.b32.xlu0 %v2557_v14, %s3097_s12  ;;  %v2810_v32 = vmul.f32 -1.442695, %v2537_v54 }
0x568d   :  { %3033 = vpow2.f32 %v2810_v32 }
0x5693   :  { %2640 = vrot.lane.b32.xlu0 %v2611_v29, %s3098_s13  ;;  %v3034_v33 = vpop.eup %3033 }
0x5694   :  { %v2541_v24 = vadd.f32 1.0, %v3034_v33 }
0x5696   :  { %3035 = vrcp.f32 %v2541_v24  ;;  %v2553_v44 = vand.u32 2147483648, %v2541_v24  ;;  %vm2547_vm2 = vweird.f32 %v2541_v24  ;;  %v2551_v45 = vand.u32 2147483647, %v2541_v24 }
0x5698   :  { %v2554_v48 = vor.u32 1.1754944e-38, %v2553_v44  ;;  %vm2552_vm4 = vcmp.eq.f32.partialorder %v2551_v45, 8.507059e+37 }
0x569c   :  { %v3036_v31 = vpop.eup %3035 }
0x569d   :  { %v2543_v36 = vmul.f32 %v3036_v31, %v2541_v24  ;;  %vm2548_vm1 = vweird.f32 %v3036_v31 }
0x569e   :  { %vm2549_vm3 = vmor %vm2547_vm2, %vm2548_vm1 }
0x569f   :  { %v2544_v38 = vsub.f32 1.0, %v2543_v36 }
0x56a1   :  { %v2545_v40 = vmul.f32 %v3036_v31, %v2544_v38 }
0x56a3   :  { %v2546_v43 = vadd.f32 %v3036_v31, %v2545_v40 }
0x56a5   :  { %v2550_v47 = vsel %vm2549_vm3, %v3036_v31, %v2546_v43 }
0x56a6   :  { %v2555_v49 = vsel %vm2552_vm4, %v2554_v48, %v2550_v47 }
0x56fd   :  { %v2560_v35 = vpop.permute.xlu0 %2559 }
0x56fe   :  { %v2562_v50 = vmul.f32 %v2560_v35, %v2555_v49 }
0x5700   :  { %2564 = vrot.lane.b32.xlu1 %v2562_v50, %s3098_s13 }
0x5705   :  { %v2641_v18 = vpop.permute.xlu0 %2640 }
0x5706   :  { %v2662_v34 = vadd.f32 %v2641_v18, %v3670_v20 }
0x5708   :  { %2636 = vrot.lane.b32.xlu1 %v2605_v52, %s3098_s13 }
0x5710   :  { %2642 = vrot.lane.b32.xlu1 %v2614_v58, %s3098_s13 }
0x5718   :  { %2648 = vrot.lane.b32.xlu1 %v2623_v60, %s3098_s13 }
0x5772   :  { %v2565_v61 = vpop.permute.xlu1 %2564 }
0x5773   :  { %v2567_v10 = vadd.f32 %v2565_v61, %v2027_v30 }
0x5775   :  { %3037 = vtanh.f32 %v2567_v10 }
0x577a   :  { %v2637_v2 = vpop.permute.xlu1 %2636 }
0x577b   :  { %v3038_v15 = vpop.eup %3037  ;;  %v2660_v4 = vadd.f32 %v2637_v2, %v3644_v26 }
0x577c   :  { %v2569_v17 = vsub.f32 %v3734_v22, %v3038_v15 }
0x577e   :  { %2571 = vrot.lane.b32.xlu2 %v2569_v17, %s3100_s18 }
0x5782   :  { %v2643_v5 = vpop.permute.xlu1 %2642 }
0x5783   :  { %v2663_v12 = vadd.f32 %v2643_v5, %v3682_v46 }
0x5786   :  { %2638 = vrot.lane.b32.xlu2 %v2608_v62, %s3098_s13 }
0x578e   :  { %2644 = vrot.lane.b32.xlu2 %v2617_v28, %s3098_s13 }
0x5796   :  { %2650 = vrot.lane.b32.xlu2 %v2626_v59, %s3098_s13 }
0x579e   :  { %2680 = vrot.lane.b32.xlu2 %v2662_v34, %s3097_s12 }
0x57d8   :  { %v2572_v23 = vpop.permute.xlu2 %2571 }
0x57d9   :  { %v2574_v63 = vmul.f32 %v2572_v23, %v2555_v49 }
0x57db   :  { %2576 = vrot.lane.b32.xlu0 %v2574_v63, %s3099_s2 }
0x57e0   :  { %v2639_v19 = vpop.permute.xlu2 %2638 }
0x57e1   :  { %v2661_v1 = vadd.f32 %v2639_v19, %v3658_v37  ;;  %v2649_v37 = vpop.permute.xlu1 %2648 }
0x57e2   :  { %v2666_v16 = vadd.f32 %v2649_v37, %v3734_v22 }
0x57e3   :  { %2646 = vrot.lane.b32.xlu0 %v2620_v0, %s3098_s13  ;;  %2678 = vrot.lane.b32.xlu1 %v2661_v1, %s3097_s12 }
0x57e8   :  { %v2645_v3 = vpop.permute.xlu2 %2644 }
0x57e9   :  { %v2664_v20 = vadd.f32 %v2645_v3, %v3694_v7 }
0x57eb   :  { %2684 = vrot.lane.b32.xlu1 %v2664_v20, %s3097_s12  ;;  %2676 = vrot.lane.b32.xlu0 %v2660_v4, %s3097_s12 }
0x57f0   :  { %v2651_v6 = vpop.permute.xlu2 %2650 }
0x57f3   :  { %2682 = vrot.lane.b32.xlu0 %v2663_v12, %s3097_s12 }
0x57f8   :  { %v2681_v13 = vpop.permute.xlu2 %2680 }
0x57f9   :  { %2702 = vst.msk [vmem:[%s3809_s5 + $0x10] sm:$0xff] %vm69_vm0, %v2681_v13 }
0x57fb   :  { %2688 = vrot.lane.b32.xlu0 %v2666_v16, %s3097_s12 }
0x584d   :  { %v2577_v26 = vpop.permute.xlu0 %2576 }
0x584e   :  { %v2579_v7 = vadd.f32 %v3038_v15, %v2577_v26 }
0x5850   :  { %v2667_v21 = vadd.f32 %v2651_v6, %v2579_v7 }
0x5852   :  { %2690 = vrot.lane.b32.xlu1 %v2667_v21, %s3097_s12 }
0x5855   :  { %v2647_v39 = vpop.permute.xlu0 %2646  ;;  %v2679_v46 = vpop.permute.xlu1 %2678 }
0x5856   :  { %v2665_v8 = vadd.f32 %v2647_v39, %v3714_v56  ;;  %2701 = vst.msk [vmem:[%s3809_s5 + $0x8] sm:$0xff] %vm69_vm0, %v2679_v46 }
0x5858   :  { %2686 = vrot.lane.b32.xlu2 %v2665_v8, %s3097_s12 }
0x585d   :  { %v2677_v22 = vpop.permute.xlu0 %2676  ;;  %v2685_v25 = vpop.permute.xlu1 %2684 }
0x585e   :  { %2700 = vst.msk [vmem:[%s3809_s5] sm:$0xff] %vm69_vm0, %v2677_v22 }
0x585f   :  { %2704 = vst.msk [vmem:[%s3809_s5 + $0x20] sm:$0xff] %vm69_vm0, %v2685_v25 }
0x5865   :  { %v2683_v56 = vpop.permute.xlu0 %2682 }
0x5866   :  { %2703 = vst.msk [vmem:[%s3809_s5 + $0x18] sm:$0xff] %vm69_vm0, %v2683_v56 }
0x586d   :  { %v2689_v9 = vpop.permute.xlu0 %2688 }
0x586e   :  { %2706 = vst.msk [vmem:[%s3809_s5 + $0x30] sm:$0xff] %vm69_vm0, %v2689_v9 }
0x58b2   :  { %v2687_v14 = vpop.permute.xlu2 %2686 }
0x58b3   :  { %2705 = vst.msk [vmem:[%s3809_s5 + $0x28] sm:$0xff] %vm69_vm0, %v2687_v14 }
0x58c4   :  { %v2691_v27 = vpop.permute.xlu1 %2690 }
0x58c5   :  { %2707 = vst.msk [vmem:[%s3809_s5 + $0x38] sm:$0xff] %vm69_vm0, %v2691_v27 }
0x58c6   :  { %2712 = vsyncpa [#allocation3], 1 }
0x58c7   :  { %2713 = vsyncpa [#allocation5], 1 }

</bundles_post_ra>
